<compile_context>
chip_gen: v7x
topology: tpu7x:2x2x1
jax: 0.10.0
libtpu: 0.0.40
codegen_flags: <defaults>
</compile_context>

<pallas_src>
import functools

import numpy as np
import jax
import jax.numpy as jnp
from jax.experimental import pallas as pl
from jax.experimental.pallas import tpu as pltpu


# ----------------------------------------------------------------------------
# Static architecture / packing layout (shared by init_params and the kernel)
# ----------------------------------------------------------------------------
_CONVS = [  # (name, C_in, C_out, K, padding)
    ("c1", 1, 16, 5, 1),
    ("c2", 16, 16, 5, 1),
    ("c3", 16, 32, 3, 1),
    ("c4", 32, 32, 3, 1),
    ("c5", 32, 64, 3, 1),
    ("c6", 64, 64, 3, 0),
]
_BN_C = [16, 16, 32, 32, 64, 64]
_DIM = 64


def _make_layout():
    wrow = {}
    r = 0
    for name, _ci, co, _k, _p in _CONVS:
        wrow[name] = r
        r += co
    wrows = r                                                   # 224
    wwidth = max(k * ci for _, ci, _co, k, _p in _CONVS)        # 192
    voff = {}
    v = 0
    for name, _ci, co, _k, _p in _CONVS:
        voff[name + "_b"] = v
        v += co
    for i, c in enumerate(_BN_C):
        voff[f"bn{i + 1}_g"] = v
        v += c
        voff[f"bn{i + 1}_b"] = v
        v += c
    voff["bqkv"] = v
    v += 3 * _DIM
    voff["bp"] = v
    v += _DIM
    return wrow, wrows, wwidth, voff, v


_WROW, _WROWS, _WWIDTH, _VOFF, _VROWS = _make_layout()


# ----------------------------------------------------------------------------
# Fused forward kernel
# ----------------------------------------------------------------------------
def _fused_forward_kernel(x_ref, wconv_ref, wattn_ref, vecs_ref, pool_ref,
                          o_ref, *, B, L0):
    f32 = jnp.float32
    N = B * 128
    # lane position within each 128-wide batch block (hoisted, reused for all masks)
    lanepos = jax.lax.broadcasted_iota(jnp.int32, (1, N), 1) & 127

    def vec(name, ln):
        off = _VOFF[name]
        return vecs_ref[off:off + ln, :]                        # (ln, 1)

    def conv(x, L, name, ci, co, K, P):
        """im2col Conv1d on the (ci, B*128) slab: K rolls + ONE MXU matmul."""
        xm = jnp.where(lanepos < L, x, 0.0)                     # zero pad lanes
        taps = []
        for k in range(K):                                      # K static (3 or 5)
            sh = (P - k) % N
            taps.append(xm if sh == 0 else pltpu.roll(xm, sh, axis=1))
        t = jnp.concatenate(taps, axis=0)                       # (K*ci, N)
        r0 = _WROW[name]
        w = wconv_ref[r0:r0 + co, 0:K * ci]                     # (co, K*ci)
        y = jnp.dot(w, t, preferred_element_type=f32) + vec(name + "_b", co)
        return y, L + 2 * P - K + 1

    def bn_silu(x, L, idx, C):
        """Training-mode BatchNorm1d (one-pass masked stats over B*L) + SiLU."""
        n = float(B * L)
        xm = jnp.where(lanepos < L, x, 0.0)
        s1 = jnp.sum(xm, axis=-1, keepdims=True)                # (C, 1)
        s2 = jnp.sum(xm * xm, axis=-1, keepdims=True)
        mean = s1 * (1.0 / n)
        var = jnp.maximum(s2 * (1.0 / n) - mean * mean, 0.0)
        g = vec(f"bn{idx}_g", C)
        b = vec(f"bn{idx}_b", C)
        y = (x - mean) * (g * jax.lax.rsqrt(var + 1e-5)) + b
        sig = 0.5 * (jnp.tanh(0.5 * y) + 1.0)                   # sigmoid via EUP tanh
        return y * sig

    def gem2(x, L, eps=1e-6):
        """GeM(kernel_size=2, p=3): clamp, cube (VPU), avg-pool via precomputed
        pooling matrix (MXU), cube root (one exp/log pair)."""
        xc = jnp.maximum(jnp.where(lanepos < L, x, eps), eps)
        x3 = xc * xc * xc
        avg = jnp.dot(x3, pool_ref[...], preferred_element_type=f32)   # (C, N)
        avg = jnp.maximum(avg, 1e-30)
        return jnp.exp(jnp.log(avg) * (1.0 / 3.0)), L // 2

    # ---- CNN trunk ----------------------------------------------------------
    x = x_ref[...]                                              # (1, B*128)
    h, L = conv(x, L0, "c1", 1, 16, 5, 1)                       # L=62
    h = bn_silu(h, L, 1, 16)
    h, L = conv(h, L, "c2", 16, 16, 5, 1)                       # L=60
    h, L = gem2(h, L)                                           # L=30
    h = bn_silu(h, L, 2, 16)
    h, L = conv(h, L, "c3", 16, 32, 3, 1)                       # L=30
    h = bn_silu(h, L, 3, 32)
    h, L = conv(h, L, "c4", 32, 32, 3, 1)                       # L=30
    h, L = gem2(h, L)                                           # L=15
    h = bn_silu(h, L, 4, 32)
    h, L = conv(h, L, "c5", 32, 64, 3, 1)                       # L=15
    h = bn_silu(h, L, 5, 64)
    h, L = conv(h, L, "c6", 64, 64, 3, 0)                       # L=13
    h = bn_silu(h, L, 6, 64)

    # ---- temporal attention (scale already folded into q weights/bias) ------
    C = _DIM
    T = L
    hm = jnp.where(lanepos < T, h, 0.0)
    wqkv = wattn_ref[0:3 * C, :]                                # (3C, C)
    qkv = jnp.dot(wqkv, hm, preferred_element_type=f32) + vec("bqkv", 3 * C)
    q, k, v = qkv[0:C], qkv[C:2 * C], qkv[2 * C:3 * C]          # each (C, B*128)
    colmask = jax.lax.broadcasted_iota(jnp.int32, (1, 128), 1) < T
    outs = []
    for bb in range(B):                                         # 128-aligned lane groups
        sl = slice(bb * 128, (bb + 1) * 128)
        qb, kb, vb = q[:, sl], k[:, sl], v[:, sl]
        s = jax.lax.dot_general(qb, kb, (((0,), (0,)), ((), ())),
                                preferred_element_type=f32)     # (128, 128)
        s = jnp.where(colmask, s, -1e30)                        # mask pad keys
        e = jnp.exp(s - jnp.max(s, axis=-1, keepdims=True))
        attn = e / jnp.sum(e, axis=-1, keepdims=True)
        outs.append(jax.lax.dot_general(vb, attn, (((1,), (1,)), ((), ())),
                                        preferred_element_type=f32))   # (C, 128)
    att = jnp.concatenate(outs, axis=-1)                        # (C, B*128), aligned
    wp = wattn_ref[3 * C:4 * C, :]
    out = jnp.dot(wp, att, preferred_element_type=f32) + vec("bp", C) + h

    # ---- lane-dense output write --------------------------------------------
    o_ref[...] = out                                            # (64, B*128)


# ----------------------------------------------------------------------------
# Wrapper: one pallas_call for the whole model
# ----------------------------------------------------------------------------
def cnn1d_middle(x, p):
    """x: (B, 1, L) float32 (NCL, like the torch module). Returns (B, 64, T)."""
    B, C_in, L = x.shape
    assert C_in == 1 and L <= 127

    # static length bookkeeping (mirrors the nn.Sequential)
    def clen(l, k, pad):
        return l + 2 * pad - k + 1
    L1 = clen(L, 5, 1)
    L2 = clen(L1, 5, 1)
    assert L2 % 2 == 0
    L3 = clen(L2 // 2, 3, 1)
    L4 = clen(L3, 3, 1)
    assert L4 % 2 == 0
    L5 = clen(L4 // 2, 3, 1)
    T = clen(L5, 3, 0)                  # 64 -> 62 -> 60 -> 30 -> 30 -> 30 -> 15 -> 15 -> 13

    N = B * 128
    # lane-padded input slab: batch b occupies lanes [b*128, b*128+L), zeros elsewhere
    x_slab = jnp.pad(x.reshape(B, L).astype(jnp.float32),
                     ((0, 0), (0, 128 - L))).reshape(1, N)

    # precomputed avg_pool1d(kernel=2) matrix in the lane-padded layout
    j = np.arange(N)
    tgt = (j // 128) * 128 + (j % 128) // 2
    pool_np = np.zeros((N, N), np.float32)
    pool_np[j, tgt] = 0.5
    pool = jnp.asarray(pool_np)

    kern = functools.partial(_fused_forward_kernel, B=B, L0=L)
    vmem = pl.BlockSpec(memory_space=pltpu.MemorySpace.VMEM)
    slab = pl.pallas_call(
        kern,
        out_shape=jax.ShapeDtypeStruct((64, N), jnp.float32),
        in_specs=[vmem] * 5,
        out_specs=vmem,
    )(x_slab, p["wconv"], p["wattn"], p["vecs"], pool)

    out = slab.reshape(64, B, 128)[:, :, :T]          # cheap XLA glue, outside kernel
    return jnp.transpose(out, (1, 0, 2))              # (B, 64, T)


# ----------------------------------------------------------------------------
# Parameter init: torch-layout weights, packed into 3 kernel slabs
# ----------------------------------------------------------------------------
def init_params(key):
    keys = jax.random.split(key, 2 * len(_CONVS) + 8)
    ki = 0
    wconv = jnp.zeros((_WROWS, _WWIDTH), jnp.float32)           # (224, 192)
    vecs = jnp.zeros((_VROWS, 1), jnp.float32)                  # (928, 1)
    for name, ci, co, k, _pad in _CONVS:
        w = 0.1 * jax.random.normal(keys[ki], (co, ci, k), jnp.float32)  # torch layout
        ki += 1
        b = 0.1 * jax.random.normal(keys[ki], (co,), jnp.float32)
        ki += 1
        w2 = jnp.transpose(w, (0, 2, 1)).reshape(co, k * ci)    # im2col: col = k*ci + cin
        r0 = _WROW[name]
        wconv = wconv.at[r0:r0 + co, 0:k * ci].set(w2)
        o = _VOFF[name + "_b"]
        vecs = vecs.at[o:o + co, 0].set(b)
    for i, c in enumerate(_BN_C):                               # gamma=1, beta=0
        o = _VOFF[f"bn{i + 1}_g"]
        vecs = vecs.at[o:o + c, 0].set(jnp.ones((c,), jnp.float32))

    dim = _DIM
    scale = float(dim) ** (-0.5)

    def lin(kk):
        return (0.1 * jax.random.normal(keys[kk], (dim, dim), jnp.float32),
                0.1 * jax.random.normal(keys[kk + 1], (dim,), jnp.float32))

    wq, bq = lin(ki); ki += 2
    wk, bk = lin(ki); ki += 2
    wv, bv = lin(ki); ki += 2
    wp, bp = lin(ki); ki += 2
    # attention scale folded into the q block at init
    wattn = jnp.concatenate([scale * wq, wk, wv, wp], axis=0)   # (4*dim, dim)
    o = _VOFF["bqkv"]
    vecs = vecs.at[o:o + 3 * dim, 0].set(jnp.concatenate([scale * bq, bk, bv]))
    o = _VOFF["bp"]
    vecs = vecs.at[o:o + dim, 0].set(bp)
    return {"wconv": wconv, "wattn": wattn, "vecs": vecs}


if __name__ == "__main__":
    key = jax.random.PRNGKey(0)
    k_param, k_x = jax.random.split(key)
    params = init_params(k_param)

    B, C_in, L = 2, 1, 64
    x = jax.random.normal(k_x, (B, C_in, L), jnp.float32)       # NCL, like torch (B,1,L)

    fwd = jax.jit(cnn1d_middle)
    out = jax.block_until_ready(fwd(x, params))

    # Expected lengths: 64 -> 62 -> 60 -> 30 -> 30 -> 30 -> 15 -> 15 -> 13, C=64
    assert out.shape == (B, 64, 13), out.shape
    assert bool(jnp.all(jnp.isfinite(out)))
    print("KERNEL_OK")
</pallas_src>

<mosaic_0001>
module attributes {stable_mosaic.version = 11 : i64} {
  func.func @_fused_forward_kernel(%arg0: memref<1x256xf32, #tpu.memory_space<vmem>>, %arg1: memref<224x192xf32, #tpu.memory_space<vmem>>, %arg2: memref<256x64xf32, #tpu.memory_space<vmem>>, %arg3: memref<928x1xf32, #tpu.memory_space<vmem>>, %arg4: memref<256x256xf32, #tpu.memory_space<vmem>>, %arg5: memref<64x256xf32, #tpu.memory_space<vmem>>) attributes {dimension_semantics = [], scalar_prefetch = 0 : i64, scratch_operands = 0 : i64, tpu.core_type = #tpu.core_type<tc>} {
    %0 = tpu.iota {dimensions = array<i32: 1>} : vector<1x256xi32>
    %c127_i32 = arith.constant 127 : i32
    %1 = vector.broadcast %c127_i32 : i32 to vector<1x256xi32>
    %2 = arith.andi %0, %1 : vector<1x256xi32>
    %c0 = arith.constant 0 : index
    %c0_0 = arith.constant 0 : index
    %3 = vector.load %arg0[%c0, %c0_0] : memref<1x256xf32, #tpu.memory_space<vmem>>, vector<1x256xf32>
    %c64_i32 = arith.constant 64 : i32
    %4 = vector.broadcast %c64_i32 : i32 to vector<1x256xi32>
    %5 = arith.cmpi slt, %2, %4 : vector<1x256xi32>
    %cst = arith.constant 0.000000e+00 : f32
    %6 = vector.broadcast %cst : f32 to vector<1x256xf32>
    %7 = arith.select %5, %3, %6 : vector<1x256xi1>, vector<1x256xf32>
    %c1_i32 = arith.constant 1 : i32
    %8 = tpu.dynamic_rotate %7 by %c1_i32 dim 1 : vector<1x256xf32>, i32 -> vector<1x256xf32>
    %c255_i32 = arith.constant 255 : i32
    %9 = tpu.dynamic_rotate %7 by %c255_i32 dim 1 : vector<1x256xf32>, i32 -> vector<1x256xf32>
    %c254_i32 = arith.constant 254 : i32
    %10 = tpu.dynamic_rotate %7 by %c254_i32 dim 1 : vector<1x256xf32>, i32 -> vector<1x256xf32>
    %c253_i32 = arith.constant 253 : i32
    %11 = tpu.dynamic_rotate %7 by %c253_i32 dim 1 : vector<1x256xf32>, i32 -> vector<1x256xf32>
    %12 = tpu.concatenate %8, %7, %9, %10, %11 in 0 : vector<1x256xf32>, vector<1x256xf32>, vector<1x256xf32>, vector<1x256xf32>, vector<1x256xf32> -> vector<5x256xf32>
    %c0_1 = arith.constant 0 : index
    %c0_2 = arith.constant 0 : index
    %13 = vector.load %arg1[%c0_1, %c0_2] : memref<224x192xf32, #tpu.memory_space<vmem>>, vector<16x5xf32>
    %cst_3 = arith.constant dense<0.000000e+00> : vector<16x256xf32>
    %14 = tpu.matmul %13, %12, %cst_3 {dimension_numbers = #tpu.dot_dimension_numbers<[1], [0], [0], [1], [0, 0, 1, 1], [], []>} : vector<16x5xf32>, vector<5x256xf32>, vector<16x256xf32> -> vector<16x256xf32>
    %c0_4 = arith.constant 0 : index
    %c0_5 = arith.constant 0 : index
    %15 = vector.load %arg3[%c0_4, %c0_5] : memref<928x1xf32, #tpu.memory_space<vmem>>, vector<16x1xf32>
    %16 = vector.broadcast %15 : vector<16x1xf32> to vector<16x256xf32>
    %17 = arith.addf %14, %16 : vector<16x256xf32>
    %c62_i32 = arith.constant 62 : i32
    %18 = vector.broadcast %c62_i32 : i32 to vector<1x256xi32>
    %19 = arith.cmpi slt, %2, %18 : vector<1x256xi32>
    %cst_6 = arith.constant 0.000000e+00 : f32
    %20 = vector.shape_cast %19 : vector<1x256xi1> to vector<1x256xi1>
    %21 = vector.broadcast %20 : vector<1x256xi1> to vector<16x256xi1>
    %22 = vector.broadcast %cst_6 : f32 to vector<16x256xf32>
    %23 = arith.select %21, %17, %22 : vector<16x256xi1>, vector<16x256xf32>
    %cst_7 = arith.constant dense<0.000000e+00> : vector<16xf32>
    %24 = vector.multi_reduction <add>, %23, %cst_7 [1] : vector<16x256xf32> to vector<16xf32>
    %25 = vector.shape_cast %24 : vector<16xf32> to vector<16x1xf32>
    %26 = arith.mulf %23, %23 : vector<16x256xf32>
    %cst_8 = arith.constant dense<0.000000e+00> : vector<16xf32>
    %27 = vector.multi_reduction <add>, %26, %cst_8 [1] : vector<16x256xf32> to vector<16xf32>
    %28 = vector.shape_cast %27 : vector<16xf32> to vector<16x1xf32>
    %cst_9 = arith.constant 0.00806451589 : f32
    %29 = vector.broadcast %cst_9 : f32 to vector<16x1xf32>
    %30 = arith.mulf %25, %29 : vector<16x1xf32>
    %cst_10 = arith.constant 0.00806451589 : f32
    %31 = vector.broadcast %cst_10 : f32 to vector<16x1xf32>
    %32 = arith.mulf %28, %31 : vector<16x1xf32>
    %33 = arith.mulf %30, %30 : vector<16x1xf32>
    %34 = arith.subf %32, %33 : vector<16x1xf32>
    %cst_11 = arith.constant 0.000000e+00 : f32
    %35 = vector.broadcast %cst_11 : f32 to vector<16x1xf32>
    %36 = arith.maximumf %34, %35 : vector<16x1xf32>
    %c224 = arith.constant 224 : index
    %c0_12 = arith.constant 0 : index
    %37 = vector.load %arg3[%c224, %c0_12] : memref<928x1xf32, #tpu.memory_space<vmem>>, vector<16x1xf32>
    %c240 = arith.constant 240 : index
    %c0_13 = arith.constant 0 : index
    %38 = vector.load %arg3[%c240, %c0_13] : memref<928x1xf32, #tpu.memory_space<vmem>>, vector<16x1xf32>
    %39 = vector.broadcast %30 : vector<16x1xf32> to vector<16x256xf32>
    %40 = arith.subf %17, %39 : vector<16x256xf32>
    %cst_14 = arith.constant 9.99999974E-6 : f32
    %41 = vector.broadcast %cst_14 : f32 to vector<16x1xf32>
    %42 = arith.addf %36, %41 : vector<16x1xf32>
    %43 = math.rsqrt %42 : vector<16x1xf32>
    %44 = arith.mulf %37, %43 : vector<16x1xf32>
    %45 = vector.broadcast %44 : vector<16x1xf32> to vector<16x256xf32>
    %46 = arith.mulf %40, %45 : vector<16x256xf32>
    %47 = vector.broadcast %38 : vector<16x1xf32> to vector<16x256xf32>
    %48 = arith.addf %46, %47 : vector<16x256xf32>
    %cst_15 = arith.constant 5.000000e-01 : f32
    %49 = vector.broadcast %cst_15 : f32 to vector<16x256xf32>
    %50 = arith.mulf %49, %48 : vector<16x256xf32>
    %51 = math.tanh %50 : vector<16x256xf32>
    %cst_16 = arith.constant 1.000000e+00 : f32
    %52 = vector.broadcast %cst_16 : f32 to vector<16x256xf32>
    %53 = arith.addf %51, %52 : vector<16x256xf32>
    %cst_17 = arith.constant 5.000000e-01 : f32
    %54 = vector.broadcast %cst_17 : f32 to vector<16x256xf32>
    %55 = arith.mulf %54, %53 : vector<16x256xf32>
    %56 = arith.mulf %48, %55 : vector<16x256xf32>
    %c62_i32_18 = arith.constant 62 : i32
    %57 = vector.broadcast %c62_i32_18 : i32 to vector<1x256xi32>
    %58 = arith.cmpi slt, %2, %57 : vector<1x256xi32>
    %cst_19 = arith.constant 0.000000e+00 : f32
    %59 = vector.shape_cast %58 : vector<1x256xi1> to vector<1x256xi1>
    %60 = vector.broadcast %59 : vector<1x256xi1> to vector<16x256xi1>
    %61 = vector.broadcast %cst_19 : f32 to vector<16x256xf32>
    %62 = arith.select %60, %56, %61 : vector<16x256xi1>, vector<16x256xf32>
    %c1_i32_20 = arith.constant 1 : i32
    %63 = tpu.dynamic_rotate %62 by %c1_i32_20 dim 1 : vector<16x256xf32>, i32 -> vector<16x256xf32>
    %c255_i32_21 = arith.constant 255 : i32
    %64 = tpu.dynamic_rotate %62 by %c255_i32_21 dim 1 : vector<16x256xf32>, i32 -> vector<16x256xf32>
    %c254_i32_22 = arith.constant 254 : i32
    %65 = tpu.dynamic_rotate %62 by %c254_i32_22 dim 1 : vector<16x256xf32>, i32 -> vector<16x256xf32>
    %c253_i32_23 = arith.constant 253 : i32
    %66 = tpu.dynamic_rotate %62 by %c253_i32_23 dim 1 : vector<16x256xf32>, i32 -> vector<16x256xf32>
    %67 = tpu.concatenate %63, %62, %64, %65, %66 in 0 : vector<16x256xf32>, vector<16x256xf32>, vector<16x256xf32>, vector<16x256xf32>, vector<16x256xf32> -> vector<80x256xf32>
    %c16 = arith.constant 16 : index
    %c0_24 = arith.constant 0 : index
    %68 = vector.load %arg1[%c16, %c0_24] : memref<224x192xf32, #tpu.memory_space<vmem>>, vector<16x80xf32>
    %cst_25 = arith.constant dense<0.000000e+00> : vector<16x256xf32>
    %69 = tpu.matmul %68, %67, %cst_25 {dimension_numbers = #tpu.dot_dimension_numbers<[1], [0], [0], [1], [0, 0, 1, 1], [], []>} : vector<16x80xf32>, vector<80x256xf32>, vector<16x256xf32> -> vector<16x256xf32>
    %c16_26 = arith.constant 16 : index
    %c0_27 = arith.constant 0 : index
    %70 = vector.load %arg3[%c16_26, %c0_27] : memref<928x1xf32, #tpu.memory_space<vmem>>, vector<16x1xf32>
    %71 = vector.broadcast %70 : vector<16x1xf32> to vector<16x256xf32>
    %72 = arith.addf %69, %71 : vector<16x256xf32>
    %c60_i32 = arith.constant 60 : i32
    %73 = vector.broadcast %c60_i32 : i32 to vector<1x256xi32>
    %74 = arith.cmpi slt, %2, %73 : vector<1x256xi32>
    %cst_28 = arith.constant 9.99999997E-7 : f32
    %75 = vector.shape_cast %74 : vector<1x256xi1> to vector<1x256xi1>
    %76 = vector.broadcast %75 : vector<1x256xi1> to vector<16x256xi1>
    %77 = vector.broadcast %cst_28 : f32 to vector<16x256xf32>
    %78 = arith.select %76, %72, %77 : vector<16x256xi1>, vector<16x256xf32>
    %cst_29 = arith.constant 9.99999997E-7 : f32
    %79 = vector.broadcast %cst_29 : f32 to vector<16x256xf32>
    %80 = arith.maximumf %78, %79 : vector<16x256xf32>
    %81 = arith.mulf %80, %80 : vector<16x256xf32>
    %82 = arith.mulf %81, %80 : vector<16x256xf32>
    %c0_30 = arith.constant 0 : index
    %c0_31 = arith.constant 0 : index
    %83 = vector.load %arg4[%c0_30, %c0_31] : memref<256x256xf32, #tpu.memory_space<vmem>>, vector<256x256xf32>
    %cst_32 = arith.constant dense<0.000000e+00> : vector<16x256xf32>
    %84 = tpu.matmul %82, %83, %cst_32 {dimension_numbers = #tpu.dot_dimension_numbers<[1], [0], [0], [1], [0, 0, 1, 1], [], []>} : vector<16x256xf32>, vector<256x256xf32>, vector<16x256xf32> -> vector<16x256xf32>
    %cst_33 = arith.constant 1.000000e-30 : f32
    %85 = vector.broadcast %cst_33 : f32 to vector<16x256xf32>
    %86 = arith.maximumf %84, %85 : vector<16x256xf32>
    %87 = math.log %86 : vector<16x256xf32>
    %cst_34 = arith.constant 0.333333343 : f32
    %88 = vector.broadcast %cst_34 : f32 to vector<16x256xf32>
    %89 = arith.mulf %87, %88 : vector<16x256xf32>
    %90 = math.exp %89 : vector<16x256xf32>
    %c30_i32 = arith.constant 30 : i32
    %91 = vector.broadcast %c30_i32 : i32 to vector<1x256xi32>
    %92 = arith.cmpi slt, %2, %91 : vector<1x256xi32>
    %cst_35 = arith.constant 0.000000e+00 : f32
    %93 = vector.shape_cast %92 : vector<1x256xi1> to vector<1x256xi1>
    %94 = vector.broadcast %93 : vector<1x256xi1> to vector<16x256xi1>
    %95 = vector.broadcast %cst_35 : f32 to vector<16x256xf32>
    %96 = arith.select %94, %90, %95 : vector<16x256xi1>, vector<16x256xf32>
    %cst_36 = arith.constant dense<0.000000e+00> : vector<16xf32>
    %97 = vector.multi_reduction <add>, %96, %cst_36 [1] : vector<16x256xf32> to vector<16xf32>
    %98 = vector.shape_cast %97 : vector<16xf32> to vector<16x1xf32>
    %99 = arith.mulf %96, %96 : vector<16x256xf32>
    %cst_37 = arith.constant dense<0.000000e+00> : vector<16xf32>
    %100 = vector.multi_reduction <add>, %99, %cst_37 [1] : vector<16x256xf32> to vector<16xf32>
    %101 = vector.shape_cast %100 : vector<16xf32> to vector<16x1xf32>
    %cst_38 = arith.constant 0.0166666675 : f32
    %102 = vector.broadcast %cst_38 : f32 to vector<16x1xf32>
    %103 = arith.mulf %98, %102 : vector<16x1xf32>
    %cst_39 = arith.constant 0.0166666675 : f32
    %104 = vector.broadcast %cst_39 : f32 to vector<16x1xf32>
    %105 = arith.mulf %101, %104 : vector<16x1xf32>
    %106 = arith.mulf %103, %103 : vector<16x1xf32>
    %107 = arith.subf %105, %106 : vector<16x1xf32>
    %cst_40 = arith.constant 0.000000e+00 : f32
    %108 = vector.broadcast %cst_40 : f32 to vector<16x1xf32>
    %109 = arith.maximumf %107, %108 : vector<16x1xf32>
    %c256 = arith.constant 256 : index
    %c0_41 = arith.constant 0 : index
    %110 = vector.load %arg3[%c256, %c0_41] : memref<928x1xf32, #tpu.memory_space<vmem>>, vector<16x1xf32>
    %c272 = arith.constant 272 : index
    %c0_42 = arith.constant 0 : index
    %111 = vector.load %arg3[%c272, %c0_42] : memref<928x1xf32, #tpu.memory_space<vmem>>, vector<16x1xf32>
    %112 = vector.broadcast %103 : vector<16x1xf32> to vector<16x256xf32>
    %113 = arith.subf %90, %112 : vector<16x256xf32>
    %cst_43 = arith.constant 9.99999974E-6 : f32
    %114 = vector.broadcast %cst_43 : f32 to vector<16x1xf32>
    %115 = arith.addf %109, %114 : vector<16x1xf32>
    %116 = math.rsqrt %115 : vector<16x1xf32>
    %117 = arith.mulf %110, %116 : vector<16x1xf32>
    %118 = vector.broadcast %117 : vector<16x1xf32> to vector<16x256xf32>
    %119 = arith.mulf %113, %118 : vector<16x256xf32>
    %120 = vector.broadcast %111 : vector<16x1xf32> to vector<16x256xf32>
    %121 = arith.addf %119, %120 : vector<16x256xf32>
    %cst_44 = arith.constant 5.000000e-01 : f32
    %122 = vector.broadcast %cst_44 : f32 to vector<16x256xf32>
    %123 = arith.mulf %122, %121 : vector<16x256xf32>
    %124 = math.tanh %123 : vector<16x256xf32>
    %cst_45 = arith.constant 1.000000e+00 : f32
    %125 = vector.broadcast %cst_45 : f32 to vector<16x256xf32>
    %126 = arith.addf %124, %125 : vector<16x256xf32>
    %cst_46 = arith.constant 5.000000e-01 : f32
    %127 = vector.broadcast %cst_46 : f32 to vector<16x256xf32>
    %128 = arith.mulf %127, %126 : vector<16x256xf32>
    %129 = arith.mulf %121, %128 : vector<16x256xf32>
    %c30_i32_47 = arith.constant 30 : i32
    %130 = vector.broadcast %c30_i32_47 : i32 to vector<1x256xi32>
    %131 = arith.cmpi slt, %2, %130 : vector<1x256xi32>
    %cst_48 = arith.constant 0.000000e+00 : f32
    %132 = vector.shape_cast %131 : vector<1x256xi1> to vector<1x256xi1>
    %133 = vector.broadcast %132 : vector<1x256xi1> to vector<16x256xi1>
    %134 = vector.broadcast %cst_48 : f32 to vector<16x256xf32>
    %135 = arith.select %133, %129, %134 : vector<16x256xi1>, vector<16x256xf32>
    %c1_i32_49 = arith.constant 1 : i32
    %136 = tpu.dynamic_rotate %135 by %c1_i32_49 dim 1 : vector<16x256xf32>, i32 -> vector<16x256xf32>
    %c255_i32_50 = arith.constant 255 : i32
    %137 = tpu.dynamic_rotate %135 by %c255_i32_50 dim 1 : vector<16x256xf32>, i32 -> vector<16x256xf32>
    %138 = tpu.concatenate %136, %135, %137 in 0 : vector<16x256xf32>, vector<16x256xf32>, vector<16x256xf32> -> vector<48x256xf32>
    %c32 = arith.constant 32 : index
    %c0_51 = arith.constant 0 : index
    %139 = vector.load %arg1[%c32, %c0_51] : memref<224x192xf32, #tpu.memory_space<vmem>>, vector<32x48xf32>
    %cst_52 = arith.constant dense<0.000000e+00> : vector<32x256xf32>
    %140 = tpu.matmul %139, %138, %cst_52 {dimension_numbers = #tpu.dot_dimension_numbers<[1], [0], [0], [1], [0, 0, 1, 1], [], []>} : vector<32x48xf32>, vector<48x256xf32>, vector<32x256xf32> -> vector<32x256xf32>
    %c32_53 = arith.constant 32 : index
    %c0_54 = arith.constant 0 : index
    %141 = vector.load %arg3[%c32_53, %c0_54] : memref<928x1xf32, #tpu.memory_space<vmem>>, vector<32x1xf32>
    %142 = vector.broadcast %141 : vector<32x1xf32> to vector<32x256xf32>
    %143 = arith.addf %140, %142 : vector<32x256xf32>
    %c30_i32_55 = arith.constant 30 : i32
    %144 = vector.broadcast %c30_i32_55 : i32 to vector<1x256xi32>
    %145 = arith.cmpi slt, %2, %144 : vector<1x256xi32>
    %cst_56 = arith.constant 0.000000e+00 : f32
    %146 = vector.shape_cast %145 : vector<1x256xi1> to vector<1x256xi1>
    %147 = vector.broadcast %146 : vector<1x256xi1> to vector<32x256xi1>
    %148 = vector.broadcast %cst_56 : f32 to vector<32x256xf32>
    %149 = arith.select %147, %143, %148 : vector<32x256xi1>, vector<32x256xf32>
    %cst_57 = arith.constant dense<0.000000e+00> : vector<32xf32>
    %150 = vector.multi_reduction <add>, %149, %cst_57 [1] : vector<32x256xf32> to vector<32xf32>
    %151 = vector.shape_cast %150 : vector<32xf32> to vector<32x1xf32>
    %152 = arith.mulf %149, %149 : vector<32x256xf32>
    %cst_58 = arith.constant dense<0.000000e+00> : vector<32xf32>
    %153 = vector.multi_reduction <add>, %152, %cst_58 [1] : vector<32x256xf32> to vector<32xf32>
    %154 = vector.shape_cast %153 : vector<32xf32> to vector<32x1xf32>
    %cst_59 = arith.constant 0.0166666675 : f32
    %155 = vector.broadcast %cst_59 : f32 to vector<32x1xf32>
    %156 = arith.mulf %151, %155 : vector<32x1xf32>
    %cst_60 = arith.constant 0.0166666675 : f32
    %157 = vector.broadcast %cst_60 : f32 to vector<32x1xf32>
    %158 = arith.mulf %154, %157 : vector<32x1xf32>
    %159 = arith.mulf %156, %156 : vector<32x1xf32>
    %160 = arith.subf %158, %159 : vector<32x1xf32>
    %cst_61 = arith.constant 0.000000e+00 : f32
    %161 = vector.broadcast %cst_61 : f32 to vector<32x1xf32>
    %162 = arith.maximumf %160, %161 : vector<32x1xf32>
    %c288 = arith.constant 288 : index
    %c0_62 = arith.constant 0 : index
    %163 = vector.load %arg3[%c288, %c0_62] : memref<928x1xf32, #tpu.memory_space<vmem>>, vector<32x1xf32>
    %c320 = arith.constant 320 : index
    %c0_63 = arith.constant 0 : index
    %164 = vector.load %arg3[%c320, %c0_63] : memref<928x1xf32, #tpu.memory_space<vmem>>, vector<32x1xf32>
    %165 = vector.broadcast %156 : vector<32x1xf32> to vector<32x256xf32>
    %166 = arith.subf %143, %165 : vector<32x256xf32>
    %cst_64 = arith.constant 9.99999974E-6 : f32
    %167 = vector.broadcast %cst_64 : f32 to vector<32x1xf32>
    %168 = arith.addf %162, %167 : vector<32x1xf32>
    %169 = math.rsqrt %168 : vector<32x1xf32>
    %170 = arith.mulf %163, %169 : vector<32x1xf32>
    %171 = vector.broadcast %170 : vector<32x1xf32> to vector<32x256xf32>
    %172 = arith.mulf %166, %171 : vector<32x256xf32>
    %173 = vector.broadcast %164 : vector<32x1xf32> to vector<32x256xf32>
    %174 = arith.addf %172, %173 : vector<32x256xf32>
    %cst_65 = arith.constant 5.000000e-01 : f32
    %175 = vector.broadcast %cst_65 : f32 to vector<32x256xf32>
    %176 = arith.mulf %175, %174 : vector<32x256xf32>
    %177 = math.tanh %176 : vector<32x256xf32>
    %cst_66 = arith.constant 1.000000e+00 : f32
    %178 = vector.broadcast %cst_66 : f32 to vector<32x256xf32>
    %179 = arith.addf %177, %178 : vector<32x256xf32>
    %cst_67 = arith.constant 5.000000e-01 : f32
    %180 = vector.broadcast %cst_67 : f32 to vector<32x256xf32>
    %181 = arith.mulf %180, %179 : vector<32x256xf32>
    %182 = arith.mulf %174, %181 : vector<32x256xf32>
    %c30_i32_68 = arith.constant 30 : i32
    %183 = vector.broadcast %c30_i32_68 : i32 to vector<1x256xi32>
    %184 = arith.cmpi slt, %2, %183 : vector<1x256xi32>
    %cst_69 = arith.constant 0.000000e+00 : f32
    %185 = vector.shape_cast %184 : vector<1x256xi1> to vector<1x256xi1>
    %186 = vector.broadcast %185 : vector<1x256xi1> to vector<32x256xi1>
    %187 = vector.broadcast %cst_69 : f32 to vector<32x256xf32>
    %188 = arith.select %186, %182, %187 : vector<32x256xi1>, vector<32x256xf32>
    %c1_i32_70 = arith.constant 1 : i32
    %189 = tpu.dynamic_rotate %188 by %c1_i32_70 dim 1 : vector<32x256xf32>, i32 -> vector<32x256xf32>
    %c255_i32_71 = arith.constant 255 : i32
    %190 = tpu.dynamic_rotate %188 by %c255_i32_71 dim 1 : vector<32x256xf32>, i32 -> vector<32x256xf32>
    %191 = tpu.concatenate %189, %188, %190 in 0 : vector<32x256xf32>, vector<32x256xf32>, vector<32x256xf32> -> vector<96x256xf32>
    %c64 = arith.constant 64 : index
    %c0_72 = arith.constant 0 : index
    %192 = vector.load %arg1[%c64, %c0_72] : memref<224x192xf32, #tpu.memory_space<vmem>>, vector<32x96xf32>
    %cst_73 = arith.constant dense<0.000000e+00> : vector<32x256xf32>
    %193 = tpu.matmul %192, %191, %cst_73 {dimension_numbers = #tpu.dot_dimension_numbers<[1], [0], [0], [1], [0, 0, 1, 1], [], []>} : vector<32x96xf32>, vector<96x256xf32>, vector<32x256xf32> -> vector<32x256xf32>
    %c64_74 = arith.constant 64 : index
    %c0_75 = arith.constant 0 : index
    %194 = vector.load %arg3[%c64_74, %c0_75] : memref<928x1xf32, #tpu.memory_space<vmem>>, vector<32x1xf32>
    %195 = vector.broadcast %194 : vector<32x1xf32> to vector<32x256xf32>
    %196 = arith.addf %193, %195 : vector<32x256xf32>
    %c30_i32_76 = arith.constant 30 : i32
    %197 = vector.broadcast %c30_i32_76 : i32 to vector<1x256xi32>
    %198 = arith.cmpi slt, %2, %197 : vector<1x256xi32>
    %cst_77 = arith.constant 9.99999997E-7 : f32
    %199 = vector.shape_cast %198 : vector<1x256xi1> to vector<1x256xi1>
    %200 = vector.broadcast %199 : vector<1x256xi1> to vector<32x256xi1>
    %201 = vector.broadcast %cst_77 : f32 to vector<32x256xf32>
    %202 = arith.select %200, %196, %201 : vector<32x256xi1>, vector<32x256xf32>
    %cst_78 = arith.constant 9.99999997E-7 : f32
    %203 = vector.broadcast %cst_78 : f32 to vector<32x256xf32>
    %204 = arith.maximumf %202, %203 : vector<32x256xf32>
    %205 = arith.mulf %204, %204 : vector<32x256xf32>
    %206 = arith.mulf %205, %204 : vector<32x256xf32>
    %c0_79 = arith.constant 0 : index
    %c0_80 = arith.constant 0 : index
    %207 = vector.load %arg4[%c0_79, %c0_80] : memref<256x256xf32, #tpu.memory_space<vmem>>, vector<256x256xf32>
    %cst_81 = arith.constant dense<0.000000e+00> : vector<32x256xf32>
    %208 = tpu.matmul %206, %207, %cst_81 {dimension_numbers = #tpu.dot_dimension_numbers<[1], [0], [0], [1], [0, 0, 1, 1], [], []>} : vector<32x256xf32>, vector<256x256xf32>, vector<32x256xf32> -> vector<32x256xf32>
    %cst_82 = arith.constant 1.000000e-30 : f32
    %209 = vector.broadcast %cst_82 : f32 to vector<32x256xf32>
    %210 = arith.maximumf %208, %209 : vector<32x256xf32>
    %211 = math.log %210 : vector<32x256xf32>
    %cst_83 = arith.constant 0.333333343 : f32
    %212 = vector.broadcast %cst_83 : f32 to vector<32x256xf32>
    %213 = arith.mulf %211, %212 : vector<32x256xf32>
    %214 = math.exp %213 : vector<32x256xf32>
    %c15_i32 = arith.constant 15 : i32
    %215 = vector.broadcast %c15_i32 : i32 to vector<1x256xi32>
    %216 = arith.cmpi slt, %2, %215 : vector<1x256xi32>
    %cst_84 = arith.constant 0.000000e+00 : f32
    %217 = vector.shape_cast %216 : vector<1x256xi1> to vector<1x256xi1>
    %218 = vector.broadcast %217 : vector<1x256xi1> to vector<32x256xi1>
    %219 = vector.broadcast %cst_84 : f32 to vector<32x256xf32>
    %220 = arith.select %218, %214, %219 : vector<32x256xi1>, vector<32x256xf32>
    %cst_85 = arith.constant dense<0.000000e+00> : vector<32xf32>
    %221 = vector.multi_reduction <add>, %220, %cst_85 [1] : vector<32x256xf32> to vector<32xf32>
    %222 = vector.shape_cast %221 : vector<32xf32> to vector<32x1xf32>
    %223 = arith.mulf %220, %220 : vector<32x256xf32>
    %cst_86 = arith.constant dense<0.000000e+00> : vector<32xf32>
    %224 = vector.multi_reduction <add>, %223, %cst_86 [1] : vector<32x256xf32> to vector<32xf32>
    %225 = vector.shape_cast %224 : vector<32xf32> to vector<32x1xf32>
    %cst_87 = arith.constant 0.0333333351 : f32
    %226 = vector.broadcast %cst_87 : f32 to vector<32x1xf32>
    %227 = arith.mulf %222, %226 : vector<32x1xf32>
    %cst_88 = arith.constant 0.0333333351 : f32
    %228 = vector.broadcast %cst_88 : f32 to vector<32x1xf32>
    %229 = arith.mulf %225, %228 : vector<32x1xf32>
    %230 = arith.mulf %227, %227 : vector<32x1xf32>
    %231 = arith.subf %229, %230 : vector<32x1xf32>
    %cst_89 = arith.constant 0.000000e+00 : f32
    %232 = vector.broadcast %cst_89 : f32 to vector<32x1xf32>
    %233 = arith.maximumf %231, %232 : vector<32x1xf32>
    %c352 = arith.constant 352 : index
    %c0_90 = arith.constant 0 : index
    %234 = vector.load %arg3[%c352, %c0_90] : memref<928x1xf32, #tpu.memory_space<vmem>>, vector<32x1xf32>
    %c384 = arith.constant 384 : index
    %c0_91 = arith.constant 0 : index
    %235 = vector.load %arg3[%c384, %c0_91] : memref<928x1xf32, #tpu.memory_space<vmem>>, vector<32x1xf32>
    %236 = vector.broadcast %227 : vector<32x1xf32> to vector<32x256xf32>
    %237 = arith.subf %214, %236 : vector<32x256xf32>
    %cst_92 = arith.constant 9.99999974E-6 : f32
    %238 = vector.broadcast %cst_92 : f32 to vector<32x1xf32>
    %239 = arith.addf %233, %238 : vector<32x1xf32>
    %240 = math.rsqrt %239 : vector<32x1xf32>
    %241 = arith.mulf %234, %240 : vector<32x1xf32>
    %242 = vector.broadcast %241 : vector<32x1xf32> to vector<32x256xf32>
    %243 = arith.mulf %237, %242 : vector<32x256xf32>
    %244 = vector.broadcast %235 : vector<32x1xf32> to vector<32x256xf32>
    %245 = arith.addf %243, %244 : vector<32x256xf32>
    %cst_93 = arith.constant 5.000000e-01 : f32
    %246 = vector.broadcast %cst_93 : f32 to vector<32x256xf32>
    %247 = arith.mulf %246, %245 : vector<32x256xf32>
    %248 = math.tanh %247 : vector<32x256xf32>
    %cst_94 = arith.constant 1.000000e+00 : f32
    %249 = vector.broadcast %cst_94 : f32 to vector<32x256xf32>
    %250 = arith.addf %248, %249 : vector<32x256xf32>
    %cst_95 = arith.constant 5.000000e-01 : f32
    %251 = vector.broadcast %cst_95 : f32 to vector<32x256xf32>
    %252 = arith.mulf %251, %250 : vector<32x256xf32>
    %253 = arith.mulf %245, %252 : vector<32x256xf32>
    %c15_i32_96 = arith.constant 15 : i32
    %254 = vector.broadcast %c15_i32_96 : i32 to vector<1x256xi32>
    %255 = arith.cmpi slt, %2, %254 : vector<1x256xi32>
    %cst_97 = arith.constant 0.000000e+00 : f32
    %256 = vector.shape_cast %255 : vector<1x256xi1> to vector<1x256xi1>
    %257 = vector.broadcast %256 : vector<1x256xi1> to vector<32x256xi1>
    %258 = vector.broadcast %cst_97 : f32 to vector<32x256xf32>
    %259 = arith.select %257, %253, %258 : vector<32x256xi1>, vector<32x256xf32>
    %c1_i32_98 = arith.constant 1 : i32
    %260 = tpu.dynamic_rotate %259 by %c1_i32_98 dim 1 : vector<32x256xf32>, i32 -> vector<32x256xf32>
    %c255_i32_99 = arith.constant 255 : i32
    %261 = tpu.dynamic_rotate %259 by %c255_i32_99 dim 1 : vector<32x256xf32>, i32 -> vector<32x256xf32>
    %262 = tpu.concatenate %260, %259, %261 in 0 : vector<32x256xf32>, vector<32x256xf32>, vector<32x256xf32> -> vector<96x256xf32>
    %c96 = arith.constant 96 : index
    %c0_100 = arith.constant 0 : index
    %263 = vector.load %arg1[%c96, %c0_100] : memref<224x192xf32, #tpu.memory_space<vmem>>, vector<64x96xf32>
    %cst_101 = arith.constant dense<0.000000e+00> : vector<64x256xf32>
    %264 = tpu.matmul %263, %262, %cst_101 {dimension_numbers = #tpu.dot_dimension_numbers<[1], [0], [0], [1], [0, 0, 1, 1], [], []>} : vector<64x96xf32>, vector<96x256xf32>, vector<64x256xf32> -> vector<64x256xf32>
    %c96_102 = arith.constant 96 : index
    %c0_103 = arith.constant 0 : index
    %265 = vector.load %arg3[%c96_102, %c0_103] : memref<928x1xf32, #tpu.memory_space<vmem>>, vector<64x1xf32>
    %266 = vector.broadcast %265 : vector<64x1xf32> to vector<64x256xf32>
    %267 = arith.addf %264, %266 : vector<64x256xf32>
    %c15_i32_104 = arith.constant 15 : i32
    %268 = vector.broadcast %c15_i32_104 : i32 to vector<1x256xi32>
    %269 = arith.cmpi slt, %2, %268 : vector<1x256xi32>
    %cst_105 = arith.constant 0.000000e+00 : f32
    %270 = vector.shape_cast %269 : vector<1x256xi1> to vector<1x256xi1>
    %271 = vector.broadcast %270 : vector<1x256xi1> to vector<64x256xi1>
    %272 = vector.broadcast %cst_105 : f32 to vector<64x256xf32>
    %273 = arith.select %271, %267, %272 : vector<64x256xi1>, vector<64x256xf32>
    %cst_106 = arith.constant dense<0.000000e+00> : vector<64xf32>
    %274 = vector.multi_reduction <add>, %273, %cst_106 [1] : vector<64x256xf32> to vector<64xf32>
    %275 = vector.shape_cast %274 : vector<64xf32> to vector<64x1xf32>
    %276 = arith.mulf %273, %273 : vector<64x256xf32>
    %cst_107 = arith.constant dense<0.000000e+00> : vector<64xf32>
    %277 = vector.multi_reduction <add>, %276, %cst_107 [1] : vector<64x256xf32> to vector<64xf32>
    %278 = vector.shape_cast %277 : vector<64xf32> to vector<64x1xf32>
    %cst_108 = arith.constant 0.0333333351 : f32
    %279 = vector.broadcast %cst_108 : f32 to vector<64x1xf32>
    %280 = arith.mulf %275, %279 : vector<64x1xf32>
    %cst_109 = arith.constant 0.0333333351 : f32
    %281 = vector.broadcast %cst_109 : f32 to vector<64x1xf32>
    %282 = arith.mulf %278, %281 : vector<64x1xf32>
    %283 = arith.mulf %280, %280 : vector<64x1xf32>
    %284 = arith.subf %282, %283 : vector<64x1xf32>
    %cst_110 = arith.constant 0.000000e+00 : f32
    %285 = vector.broadcast %cst_110 : f32 to vector<64x1xf32>
    %286 = arith.maximumf %284, %285 : vector<64x1xf32>
    %c416 = arith.constant 416 : index
    %c0_111 = arith.constant 0 : index
    %287 = vector.load %arg3[%c416, %c0_111] : memref<928x1xf32, #tpu.memory_space<vmem>>, vector<64x1xf32>
    %c480 = arith.constant 480 : index
    %c0_112 = arith.constant 0 : index
    %288 = vector.load %arg3[%c480, %c0_112] : memref<928x1xf32, #tpu.memory_space<vmem>>, vector<64x1xf32>
    %289 = vector.broadcast %280 : vector<64x1xf32> to vector<64x256xf32>
    %290 = arith.subf %267, %289 : vector<64x256xf32>
    %cst_113 = arith.constant 9.99999974E-6 : f32
    %291 = vector.broadcast %cst_113 : f32 to vector<64x1xf32>
    %292 = arith.addf %286, %291 : vector<64x1xf32>
    %293 = math.rsqrt %292 : vector<64x1xf32>
    %294 = arith.mulf %287, %293 : vector<64x1xf32>
    %295 = vector.broadcast %294 : vector<64x1xf32> to vector<64x256xf32>
    %296 = arith.mulf %290, %295 : vector<64x256xf32>
    %297 = vector.broadcast %288 : vector<64x1xf32> to vector<64x256xf32>
    %298 = arith.addf %296, %297 : vector<64x256xf32>
    %cst_114 = arith.constant 5.000000e-01 : f32
    %299 = vector.broadcast %cst_114 : f32 to vector<64x256xf32>
    %300 = arith.mulf %299, %298 : vector<64x256xf32>
    %301 = math.tanh %300 : vector<64x256xf32>
    %cst_115 = arith.constant 1.000000e+00 : f32
    %302 = vector.broadcast %cst_115 : f32 to vector<64x256xf32>
    %303 = arith.addf %301, %302 : vector<64x256xf32>
    %cst_116 = arith.constant 5.000000e-01 : f32
    %304 = vector.broadcast %cst_116 : f32 to vector<64x256xf32>
    %305 = arith.mulf %304, %303 : vector<64x256xf32>
    %306 = arith.mulf %298, %305 : vector<64x256xf32>
    %c15_i32_117 = arith.constant 15 : i32
    %307 = vector.broadcast %c15_i32_117 : i32 to vector<1x256xi32>
    %308 = arith.cmpi slt, %2, %307 : vector<1x256xi32>
    %cst_118 = arith.constant 0.000000e+00 : f32
    %309 = vector.shape_cast %308 : vector<1x256xi1> to vector<1x256xi1>
    %310 = vector.broadcast %309 : vector<1x256xi1> to vector<64x256xi1>
    %311 = vector.broadcast %cst_118 : f32 to vector<64x256xf32>
    %312 = arith.select %310, %306, %311 : vector<64x256xi1>, vector<64x256xf32>
    %c255_i32_119 = arith.constant 255 : i32
    %313 = tpu.dynamic_rotate %312 by %c255_i32_119 dim 1 : vector<64x256xf32>, i32 -> vector<64x256xf32>
    %c254_i32_120 = arith.constant 254 : i32
    %314 = tpu.dynamic_rotate %312 by %c254_i32_120 dim 1 : vector<64x256xf32>, i32 -> vector<64x256xf32>
    %315 = tpu.concatenate %312, %313, %314 in 0 : vector<64x256xf32>, vector<64x256xf32>, vector<64x256xf32> -> vector<192x256xf32>
    %c160 = arith.constant 160 : index
    %c0_121 = arith.constant 0 : index
    %316 = vector.load %arg1[%c160, %c0_121] : memref<224x192xf32, #tpu.memory_space<vmem>>, vector<64x192xf32>
    %cst_122 = arith.constant dense<0.000000e+00> : vector<64x256xf32>
    %317 = tpu.matmul %316, %315, %cst_122 {dimension_numbers = #tpu.dot_dimension_numbers<[1], [0], [0], [1], [0, 0, 1, 1], [], []>} : vector<64x192xf32>, vector<192x256xf32>, vector<64x256xf32> -> vector<64x256xf32>
    %c160_123 = arith.constant 160 : index
    %c0_124 = arith.constant 0 : index
    %318 = vector.load %arg3[%c160_123, %c0_124] : memref<928x1xf32, #tpu.memory_space<vmem>>, vector<64x1xf32>
    %319 = vector.broadcast %318 : vector<64x1xf32> to vector<64x256xf32>
    %320 = arith.addf %317, %319 : vector<64x256xf32>
    %c13_i32 = arith.constant 13 : i32
    %321 = vector.broadcast %c13_i32 : i32 to vector<1x256xi32>
    %322 = arith.cmpi slt, %2, %321 : vector<1x256xi32>
    %cst_125 = arith.constant 0.000000e+00 : f32
    %323 = vector.shape_cast %322 : vector<1x256xi1> to vector<1x256xi1>
    %324 = vector.broadcast %323 : vector<1x256xi1> to vector<64x256xi1>
    %325 = vector.broadcast %cst_125 : f32 to vector<64x256xf32>
    %326 = arith.select %324, %320, %325 : vector<64x256xi1>, vector<64x256xf32>
    %cst_126 = arith.constant dense<0.000000e+00> : vector<64xf32>
    %327 = vector.multi_reduction <add>, %326, %cst_126 [1] : vector<64x256xf32> to vector<64xf32>
    %328 = vector.shape_cast %327 : vector<64xf32> to vector<64x1xf32>
    %329 = arith.mulf %326, %326 : vector<64x256xf32>
    %cst_127 = arith.constant dense<0.000000e+00> : vector<64xf32>
    %330 = vector.multi_reduction <add>, %329, %cst_127 [1] : vector<64x256xf32> to vector<64xf32>
    %331 = vector.shape_cast %330 : vector<64xf32> to vector<64x1xf32>
    %cst_128 = arith.constant 0.0384615399 : f32
    %332 = vector.broadcast %cst_128 : f32 to vector<64x1xf32>
    %333 = arith.mulf %328, %332 : vector<64x1xf32>
    %cst_129 = arith.constant 0.0384615399 : f32
    %334 = vector.broadcast %cst_129 : f32 to vector<64x1xf32>
    %335 = arith.mulf %331, %334 : vector<64x1xf32>
    %336 = arith.mulf %333, %333 : vector<64x1xf32>
    %337 = arith.subf %335, %336 : vector<64x1xf32>
    %cst_130 = arith.constant 0.000000e+00 : f32
    %338 = vector.broadcast %cst_130 : f32 to vector<64x1xf32>
    %339 = arith.maximumf %337, %338 : vector<64x1xf32>
    %c544 = arith.constant 544 : index
    %c0_131 = arith.constant 0 : index
    %340 = vector.load %arg3[%c544, %c0_131] : memref<928x1xf32, #tpu.memory_space<vmem>>, vector<64x1xf32>
    %c608 = arith.constant 608 : index
    %c0_132 = arith.constant 0 : index
    %341 = vector.load %arg3[%c608, %c0_132] : memref<928x1xf32, #tpu.memory_space<vmem>>, vector<64x1xf32>
    %342 = vector.broadcast %333 : vector<64x1xf32> to vector<64x256xf32>
    %343 = arith.subf %320, %342 : vector<64x256xf32>
    %cst_133 = arith.constant 9.99999974E-6 : f32
    %344 = vector.broadcast %cst_133 : f32 to vector<64x1xf32>
    %345 = arith.addf %339, %344 : vector<64x1xf32>
    %346 = math.rsqrt %345 : vector<64x1xf32>
    %347 = arith.mulf %340, %346 : vector<64x1xf32>
    %348 = vector.broadcast %347 : vector<64x1xf32> to vector<64x256xf32>
    %349 = arith.mulf %343, %348 : vector<64x256xf32>
    %350 = vector.broadcast %341 : vector<64x1xf32> to vector<64x256xf32>
    %351 = arith.addf %349, %350 : vector<64x256xf32>
    %cst_134 = arith.constant 5.000000e-01 : f32
    %352 = vector.broadcast %cst_134 : f32 to vector<64x256xf32>
    %353 = arith.mulf %352, %351 : vector<64x256xf32>
    %354 = math.tanh %353 : vector<64x256xf32>
    %cst_135 = arith.constant 1.000000e+00 : f32
    %355 = vector.broadcast %cst_135 : f32 to vector<64x256xf32>
    %356 = arith.addf %354, %355 : vector<64x256xf32>
    %cst_136 = arith.constant 5.000000e-01 : f32
    %357 = vector.broadcast %cst_136 : f32 to vector<64x256xf32>
    %358 = arith.mulf %357, %356 : vector<64x256xf32>
    %359 = arith.mulf %351, %358 : vector<64x256xf32>
    %c13_i32_137 = arith.constant 13 : i32
    %360 = vector.broadcast %c13_i32_137 : i32 to vector<1x256xi32>
    %361 = arith.cmpi slt, %2, %360 : vector<1x256xi32>
    %cst_138 = arith.constant 0.000000e+00 : f32
    %362 = vector.shape_cast %361 : vector<1x256xi1> to vector<1x256xi1>
    %363 = vector.broadcast %362 : vector<1x256xi1> to vector<64x256xi1>
    %364 = vector.broadcast %cst_138 : f32 to vector<64x256xf32>
    %365 = arith.select %363, %359, %364 : vector<64x256xi1>, vector<64x256xf32>
    %c0_139 = arith.constant 0 : index
    %c0_140 = arith.constant 0 : index
    %366 = vector.load %arg2[%c0_139, %c0_140] : memref<256x64xf32, #tpu.memory_space<vmem>>, vector<192x64xf32>
    %cst_141 = arith.constant dense<0.000000e+00> : vector<192x256xf32>
    %367 = tpu.matmul %366, %365, %cst_141 {dimension_numbers = #tpu.dot_dimension_numbers<[1], [0], [0], [1], [0, 0, 1, 1], [], []>} : vector<192x64xf32>, vector<64x256xf32>, vector<192x256xf32> -> vector<192x256xf32>
    %c672 = arith.constant 672 : index
    %c0_142 = arith.constant 0 : index
    %368 = vector.load %arg3[%c672, %c0_142] : memref<928x1xf32, #tpu.memory_space<vmem>>, vector<192x1xf32>
    %369 = vector.broadcast %368 : vector<192x1xf32> to vector<192x256xf32>
    %370 = arith.addf %367, %369 : vector<192x256xf32>
    %371 = vector.extract_strided_slice %370 {offsets = [0, 0], sizes = [64, 256], strides = [1, 1]} : vector<192x256xf32> to vector<64x256xf32>
    %372 = vector.extract_strided_slice %370 {offsets = [64, 0], sizes = [64, 256], strides = [1, 1]} : vector<192x256xf32> to vector<64x256xf32>
    %373 = vector.extract_strided_slice %370 {offsets = [128, 0], sizes = [64, 256], strides = [1, 1]} : vector<192x256xf32> to vector<64x256xf32>
    %374 = tpu.iota {dimensions = array<i32: 1>} : vector<1x128xi32>
    %c13_i32_143 = arith.constant 13 : i32
    %375 = vector.broadcast %c13_i32_143 : i32 to vector<1x128xi32>
    %376 = arith.cmpi slt, %374, %375 : vector<1x128xi32>
    %377 = vector.extract_strided_slice %371 {offsets = [0, 0], sizes = [64, 128], strides = [1, 1]} : vector<64x256xf32> to vector<64x128xf32>
    %378 = vector.extract_strided_slice %372 {offsets = [0, 0], sizes = [64, 128], strides = [1, 1]} : vector<64x256xf32> to vector<64x128xf32>
    %379 = vector.extract_strided_slice %373 {offsets = [0, 0], sizes = [64, 128], strides = [1, 1]} : vector<64x256xf32> to vector<64x128xf32>
    %cst_144 = arith.constant dense<0.000000e+00> : vector<128x128xf32>
    %380 = tpu.matmul %377, %378, %cst_144 {dimension_numbers = #tpu.dot_dimension_numbers<[0], [0], [1], [1], [0, 1, 1, 1], [], []>} : vector<64x128xf32>, vector<64x128xf32>, vector<128x128xf32> -> vector<128x128xf32>
    %cst_145 = arith.constant -1.000000e+30 : f32
    %381 = vector.shape_cast %376 : vector<1x128xi1> to vector<1x128xi1>
    %382 = vector.broadcast %381 : vector<1x128xi1> to vector<128x128xi1>
    %383 = vector.broadcast %cst_145 : f32 to vector<128x128xf32>
    %384 = arith.select %382, %380, %383 : vector<128x128xi1>, vector<128x128xf32>
    %cst_146 = arith.constant dense<0xFF800000> : vector<128xf32>
    %385 = vector.multi_reduction <maximumf>, %384, %cst_146 [1] : vector<128x128xf32> to vector<128xf32>
    %386 = vector.shape_cast %385 : vector<128xf32> to vector<128x1xf32>
    %387 = vector.broadcast %386 : vector<128x1xf32> to vector<128x128xf32>
    %388 = arith.subf %384, %387 : vector<128x128xf32>
    %389 = math.exp %388 : vector<128x128xf32>
    %cst_147 = arith.constant dense<0.000000e+00> : vector<128xf32>
    %390 = vector.multi_reduction <add>, %389, %cst_147 [1] : vector<128x128xf32> to vector<128xf32>
    %391 = vector.shape_cast %390 : vector<128xf32> to vector<128x1xf32>
    %392 = vector.broadcast %391 : vector<128x1xf32> to vector<128x128xf32>
    %393 = arith.divf %389, %392 : vector<128x128xf32>
    %cst_148 = arith.constant dense<0.000000e+00> : vector<64x128xf32>
    %394 = tpu.matmul %379, %393, %cst_148 {dimension_numbers = #tpu.dot_dimension_numbers<[1], [1], [0], [0], [0, 0, 1, 0], [], []>} : vector<64x128xf32>, vector<128x128xf32>, vector<64x128xf32> -> vector<64x128xf32>
    %395 = vector.extract_strided_slice %371 {offsets = [0, 128], sizes = [64, 128], strides = [1, 1]} : vector<64x256xf32> to vector<64x128xf32>
    %396 = vector.extract_strided_slice %372 {offsets = [0, 128], sizes = [64, 128], strides = [1, 1]} : vector<64x256xf32> to vector<64x128xf32>
    %397 = vector.extract_strided_slice %373 {offsets = [0, 128], sizes = [64, 128], strides = [1, 1]} : vector<64x256xf32> to vector<64x128xf32>
    %cst_149 = arith.constant dense<0.000000e+00> : vector<128x128xf32>
    %398 = tpu.matmul %395, %396, %cst_149 {dimension_numbers = #tpu.dot_dimension_numbers<[0], [0], [1], [1], [0, 1, 1, 1], [], []>} : vector<64x128xf32>, vector<64x128xf32>, vector<128x128xf32> -> vector<128x128xf32>
    %cst_150 = arith.constant -1.000000e+30 : f32
    %399 = vector.shape_cast %376 : vector<1x128xi1> to vector<1x128xi1>
    %400 = vector.broadcast %399 : vector<1x128xi1> to vector<128x128xi1>
    %401 = vector.broadcast %cst_150 : f32 to vector<128x128xf32>
    %402 = arith.select %400, %398, %401 : vector<128x128xi1>, vector<128x128xf32>
    %cst_151 = arith.constant dense<0xFF800000> : vector<128xf32>
    %403 = vector.multi_reduction <maximumf>, %402, %cst_151 [1] : vector<128x128xf32> to vector<128xf32>
    %404 = vector.shape_cast %403 : vector<128xf32> to vector<128x1xf32>
    %405 = vector.broadcast %404 : vector<128x1xf32> to vector<128x128xf32>
    %406 = arith.subf %402, %405 : vector<128x128xf32>
    %407 = math.exp %406 : vector<128x128xf32>
    %cst_152 = arith.constant dense<0.000000e+00> : vector<128xf32>
    %408 = vector.multi_reduction <add>, %407, %cst_152 [1] : vector<128x128xf32> to vector<128xf32>
    %409 = vector.shape_cast %408 : vector<128xf32> to vector<128x1xf32>
    %410 = vector.broadcast %409 : vector<128x1xf32> to vector<128x128xf32>
    %411 = arith.divf %407, %410 : vector<128x128xf32>
    %cst_153 = arith.constant dense<0.000000e+00> : vector<64x128xf32>
    %412 = tpu.matmul %397, %411, %cst_153 {dimension_numbers = #tpu.dot_dimension_numbers<[1], [1], [0], [0], [0, 0, 1, 0], [], []>} : vector<64x128xf32>, vector<128x128xf32>, vector<64x128xf32> -> vector<64x128xf32>
    %413 = tpu.concatenate %394, %412 in 1 : vector<64x128xf32>, vector<64x128xf32> -> vector<64x256xf32>
    %c192 = arith.constant 192 : index
    %c0_154 = arith.constant 0 : index
    %414 = vector.load %arg2[%c192, %c0_154] : memref<256x64xf32, #tpu.memory_space<vmem>>, vector<64x64xf32>
    %cst_155 = arith.constant dense<0.000000e+00> : vector<64x256xf32>
    %415 = tpu.matmul %414, %413, %cst_155 {dimension_numbers = #tpu.dot_dimension_numbers<[1], [0], [0], [1], [0, 0, 1, 1], [], []>} : vector<64x64xf32>, vector<64x256xf32>, vector<64x256xf32> -> vector<64x256xf32>
    %c864 = arith.constant 864 : index
    %c0_156 = arith.constant 0 : index
    %416 = vector.load %arg3[%c864, %c0_156] : memref<928x1xf32, #tpu.memory_space<vmem>>, vector<64x1xf32>
    %417 = vector.broadcast %416 : vector<64x1xf32> to vector<64x256xf32>
    %418 = arith.addf %415, %417 : vector<64x256xf32>
    %419 = arith.addf %418, %359 : vector<64x256xf32>
    %c0_157 = arith.constant 0 : index
    %c0_158 = arith.constant 0 : index
    %420 = vector.load %arg5[%c0_157, %c0_158] : memref<64x256xf32, #tpu.memory_space<vmem>>, vector<64x256xf32>
    tpu.vector_store %arg5[%c0_157, %c0_158], %419 {strides = array<i32>} : memref<64x256xf32, #tpu.memory_space<vmem>>, vector<64x256xf32>,
    return
  }
}

</mosaic_0001>

<bundles_post_ra>
// kernel: cnn1d_middle.1
= control target key start
LH: loop header
LB: loop body
LE: loop exit
PB: predicated region body
PF: predicated region fallthrough
CT: control target
= control target key end

     0   :  { %v20_v0 = vlaneseq  ;;  %s6010_s20 = smov 1   ;;  %s6011_s21 = smov 127   ;;  %v8689_v12 = vmov 0.0   ;;  %v6014_v13 = vmov 0   ;;  %vm93_vm5 = vcmask 1040384   ;;  %s8683_s0 = inlined_call_operand.vmem [shape: f32[1,256], index: 0, kind: input, shape index: {}]   ;;  %s8684_s3 = inlined_call_operand.vmem [shape: f32[928,1], index: 3, kind: input, shape index: {}]   ;;  %s8685_s1 = inlined_call_operand.vmem [shape: f32[224,192], index: 1, kind: input, shape index: {}]   ;;  %s8686_s4 = inlined_call_operand.vmem [shape: f32[256,256], index: 4, kind: input, shape index: {}]   ;;  %s8687_s2 = inlined_call_operand.vmem [shape: f32[256,64], index: 2, kind: input, shape index: {}]   ;;  %s8688_s5 = inlined_call_operand.vmem [shape: f32[64,256], index: 5, kind: output, shape index: {}]  }
   0x1   :  { %v25_v3 = vld [vmem:[%s8683_s0] sm:$0x3]  ;;  %s6012_s0 = smov 126   ;;  %197 = vmatprep.mubr.f32.mxu0 %v8689_v12  ;;  %445 = vmatprep.mubr.f32.mxu1 %v8689_v12  ;;  %s6015_s22 = smov 125   ;;  %v108_v15 = vld [vmem:[%s8684_s3 + $0x8] sm:$0xff]  ;;  %vm96_vm6 = vcmask 1041408  }
   0x2   :  { %v6046_v1 = vand.u32 127, %v20_v0  ;;  %v30_v2 = vshrl.u32 %v20_v0, 7  ;;  %5444 = vset.pattern.permute.xlu0 %v6014_v13  ;;  %5445 = vset.pattern.permute.xlu1 %v6014_v13  ;;  %v107_v14 = vld [vmem:[%s8684_s3] sm:$0xff]  ;;  %vm99_vm8 = vcmask 1042432   ;;  %vm102_vm9 = vcmask 1043456   ;;  %v106_v49 = vld [vmem:[%s8685_s1 + $0x10] sm:$0xff] }
   0x3   :  { %vm126_vm10 = vcmask 1044480   ;;  %v105_v48 = vld [vmem:[%s8685_s1] sm:$0xff]  ;;  %vm119_vm11 = vcmask 39936  }
   0x4   :  { %v31_v4 = vsub.s32 0, %v30_v2  ;;  %vm26_vm0 = vcmp.lt.s32.totalorder %v6046_v1, 64  ;;  %v22_v5 = vadd.s32 128, %v6046_v1  ;;  %v35_v7 = vsub.s32 1, %v30_v2 }
   0x5   :  { %vm45_vm2 = vcmp.lt.s32.totalorder %v6046_v1, 1  ;;  %vm52_vm3 = vcmp.lt.s32.totalorder %v6046_v1, 127  ;;  %vm59_vm4 = vcmp.lt.s32.totalorder %v6046_v1, 126  ;;  %vm66_vm7 = vcmp.lt.s32.totalorder %v6046_v1, 125 }
   0x6   :  { %v32_v6 = vrot.slane %v25_v3, %v31_v4  ;;  %v6053_v8 = vand.u32 127, %v22_v5  ;;  %v36_v10 = vrot.slane %v25_v3, %v35_v7  ;;  %vm210_vm12 = vcmp.lt.s32.totalorder %v6046_v1, 62 }
   0x7   :  { %vm5034_vm15 = vmpackc.low %vm210_vm12, %vm210_vm12 }
   0x8   :  { %v39_v9 = vsel %vm26_vm0, %v32_v6, 0.0  ;;  %vm27_vm1 = vcmp.lt.s32.totalorder %v6053_v8, 64  ;;  %vm211_vm13 = vcmp.lt.s32.totalorder %v6053_v8, 62  ;;  %vm374_vm0 = vcmask 654336  }
   0x9   :  { %41 = vrot.lane.b32.xlu1 %v39_v9, %s6010_s20  ;;  %48 = vrot.lane.b32.xlu0 %v39_v9, %s6011_s21  ;;  %v40_v11 = vsel %vm27_vm1, %v36_v10, 0.0  ;;  %v71_v21 = vrot.slane %v39_v9, 7  ;;  %vm5031_vm14 = vmpackc.low %vm211_vm13, %vm211_vm13  ;;  %vm458_vm1 = vcmp.lt.s32.totalorder %v6046_v1, 60 }
   0xa   :  { %v72_v20 = vrot.slane %v40_v11, 7 }
   0xd   :  { %43 = vrot.lane.b32.xlu1 %v40_v11, %s6010_s20  ;;  %55 = vrot.lane.b32.xlu0 %v39_v9, %s6012_s0 }
  0x11   :  { %57 = vrot.lane.b32.xlu1 %v40_v11, %s6012_s0  ;;  %50 = vrot.lane.b32.xlu0 %v40_v11, %s6011_s21 }
  0x15   :  { %64 = vrot.lane.b32.xlu1 %v40_v11, %s6015_s22  ;;  %62 = vrot.lane.b32.xlu0 %v39_v9, %s6015_s22 }
  0x19   :  { %111 = vperm.xlu0 %5444, %v107_v14   ;;  %116 = vperm.xlu1 %5445, %v108_v15  }
  0x7b   :  { %v42_v16 = vpop.permute.xlu1 %41  ;;  %v49_v17 = vpop.permute.xlu0 %48 }
  0x7f   :  { %v44_v18 = vpop.permute.xlu1 %43  ;;  %v56_v19 = vpop.permute.xlu0 %55 }
  0x80   :  { %v46_v22 = vsel %vm45_vm2, %v42_v16, %v44_v18  ;;  %v47_v23 = vsel %vm45_vm2, %v44_v18, %v42_v16 }
  0x81   :  { %v94_v32 = vsel %vm93_vm5, %v47_v23, %v71_v21  ;;  %v95_v33 = vsel %vm93_vm5, %v46_v22, %v72_v20  ;;  %vm459_vm5 = vcmp.lt.s32.totalorder %v6053_v8, 60 }
  0x83   :  { %v58_v24 = vpop.permute.xlu1 %57  ;;  %v51_v25 = vpop.permute.xlu0 %50 }
  0x84   :  { %v60_v26 = vsel %vm59_vm4, %v56_v19, %v58_v24  ;;  %v61_v27 = vsel %vm59_vm4, %v58_v24, %v56_v19  ;;  %v53_v28 = vsel %vm52_vm3, %v49_v17, %v51_v25  ;;  %v54_v29 = vsel %vm52_vm3, %v51_v25, %v49_v17 }
  0x85   :  { %v77_v30 = vrot.slane %v53_v28, 6  ;;  %v78_v31 = vrot.slane %v54_v29, 6  ;;  %v83_v34 = vrot.slane %v60_v26, 5  ;;  %v84_v35 = vrot.slane %v61_v27, 5  ;;  %v247_v27 = vld [vmem:[%s8684_s3 + $0xe8] sm:$0xff]  ;;  %v246_v29 = vld [vmem:[%s8684_s3 + $0xe0] sm:$0xff] }
  0x87   :  { %v65_v36 = vpop.permute.xlu1 %64  ;;  %v63_v37 = vpop.permute.xlu0 %62  ;;  %v98_v38 = vsel %vm96_vm6, %v95_v33, %v78_v31  ;;  %v97_v39 = vsel %vm96_vm6, %v94_v32, %v77_v30  ;;  %v248_v33 = vld [vmem:[%s8684_s3 + $0xf0] sm:$0xff]  ;;  %vm645_vm6 = vcmp.lt.s32.totalorder %v6046_v1, 30 }
  0x88   :  { %v67_v40 = vsel %vm66_vm7, %v63_v37, %v65_v36  ;;  %v68_v41 = vsel %vm66_vm7, %v65_v36, %v63_v37  ;;  %v101_v44 = vsel %vm99_vm8, %v98_v38, %v84_v35  ;;  %v100_v45 = vsel %vm99_vm8, %v97_v39, %v83_v34  ;;  %v249_v34 = vld [vmem:[%s8684_s3 + $0xf8] sm:$0xff] }
  0x89   :  { %v89_v42 = vrot.slane %v67_v40, 4  ;;  %v90_v43 = vrot.slane %v68_v41, 4 }
  0x8b   :  { %v104_v46 = vsel %vm102_vm9, %v101_v44, %v90_v43  ;;  %v103_v47 = vsel %vm102_vm9, %v100_v45, %v89_v42  ;;  %vm6578_vm9 = vmpackc.low %vm645_vm6, %vm645_vm6 }
  0x8c   :  { %4612 = vmatprep.subr.msk.mxu0 %vm126_vm10, %v104_v46 }
  0x8d   :  { %4613 = vmatpush1.msk.msra.mxu0 %vm126_vm10, %v103_v47  ;;  %vm799_vm10 = vcmask 392192  }
  0x8e   :  { %4614 = vmatmul.mubr.msk.f32.vlgmr.msra.gmra.mrb[0].mxu0 %vm119_vm11, %v105_v48 }
  0x8f   :  { %203 = vmatprep.mubr.f32.mxu0 %v8689_v12 }
  0x92   :  { %4615 = vmatmul.mubr.msk.f32.gmra.mrb[2].mxu0 %vm119_vm11, %v106_v49  ;;  %vm1169_vm11 = vcmask 785408  }
  0x98   :  { %v112_v50 = vpop.permute.xlu0 %111  ;;  %v117_v55 = vpop.permute.xlu1 %116 }
 0x161   :  { %v199_v51 = vpop.f32.mrb[0].mxu0 }
 0x162   :  { %v200_v52 = vadd.f32 %v199_v51, %v112_v50  ;;  %v201_v53 = vpop.f32.mrb[1].mxu0 }
 0x163   :  { %v202_v54 = vadd.f32 %v201_v53, %v112_v50 }
 0x164   :  { %v216_v56 = vsel %vm210_vm12, %v200_v52, 0.0 }
 0x165   :  { %v205_v57 = vpop.f32.mrb[2].mxu0  ;;  %v217_v58 = vsel %vm211_vm13, %v202_v54, 0.0  ;;  %v226_v5 = vmul.f32 %v216_v56, %v216_v56 }
 0x166   :  { %v206_v59 = vadd.f32 %v205_v57, %v117_v55  ;;  %v207_v60 = vpop.f32.mrb[3].mxu0  ;;  %v220_v61 = vadd.f32 %v217_v58, %v216_v56  ;;  %v227_v6 = vmul.f32 %v217_v58, %v217_v58 }
 0x167   :  { %v208_v62 = vadd.f32 %v207_v60, %v117_v55 }
 0x168   :  { %221 = vadd.xlane.f32.xlu1 %v220_v61  ;;  %v218_v63 = vsel %vm210_vm12, %v206_v59, 0.0  ;;  %v230_v9 = vadd.f32 %v227_v6, %v226_v5 }
 0x169   :  { %v219_v0 = vsel %vm211_vm13, %v208_v62, 0.0  ;;  %v228_v2 = vmul.f32 %v218_v63, %v218_v63 }
 0x16a   :  { %v223_v3 = vadd.f32 %v219_v0, %v218_v63  ;;  %v229_v4 = vmul.f32 %v219_v0, %v219_v0 }
 0x16c   :  { %224 = vadd.xlane.f32.xlu0 %v223_v3  ;;  %v233_v7 = vadd.f32 %v229_v4, %v228_v2 }
 0x16e   :  { %234 = vadd.xlane.f32.xlu1 %v233_v7 }
 0x170   :  { %231 = vadd.xlane.f32.xlu0 %v230_v9 }
 0x1f5   :  { %v222_v10 = vpop.xlane.xlu1 %221 }
 0x1f6   :  { %v236_v13 = vmul.f32 0.008064516, %v222_v10 }
 0x1f8   :  { %v240_v21 = vmul.f32 %v236_v13, %v236_v13  ;;  %v250_v36 = vsub.f32 %v200_v52, %v236_v13  ;;  %v251_v37 = vsub.f32 %v202_v54, %v236_v13 }
 0x1f9   :  { %v225_v11 = vpop.xlane.xlu0 %224 }
 0x1fa   :  { %v237_v14 = vmul.f32 0.008064516, %v225_v11 }
 0x1fb   :  { %v235_v15 = vpop.xlane.xlu1 %234 }
 0x1fc   :  { %v241_v16 = vmul.f32 %v237_v14, %v237_v14  ;;  %v239_v17 = vmul.f32 0.008064516, %v235_v15  ;;  %v252_v39 = vsub.f32 %v206_v59, %v237_v14  ;;  %v253_v40 = vsub.f32 %v208_v62, %v237_v14 }
 0x1fd   :  { %v232_v18 = vpop.xlane.xlu0 %231 }
 0x1fe   :  { %v243_v19 = vsub.f32 %v239_v17, %v241_v16  ;;  %v238_v20 = vmul.f32 0.008064516, %v232_v18  ;;  %v362_v18 = vld [vmem:[%s8684_s3 + $0x10] sm:$0xff] }
 0x200   :  { %v245_v22 = vmax.f32 %v243_v19, 0.0  ;;  %v242_v23 = vsub.f32 %v238_v20, %v240_v21  ;;  %v363_v19 = vld [vmem:[%s8684_s3 + $0x18] sm:$0xff]  ;;  %v481_v20 = vld [vmem:[%s8686_s4 + $0x8] sm:$0xff] }
 0x201   :  { %v483_v21 = vld [vmem:[%s8686_s4 + $0x18] sm:$0xff] }
 0x202   :  { %v255_v24 = vadd.f32 1e-05, %v245_v22  ;;  %v244_v25 = vmax.f32 %v242_v23, 0.0  ;;  %v480_v22 = vld [vmem:[%s8686_s4] sm:$0xff]  ;;  %v6170_v23 = vpack.c.bf16 %v483_v21, %v481_v20 }
 0x204   :  { %5666 = vrsqrt.f32 %v255_v24  ;;  %v254_v26 = vadd.f32 1e-05, %v244_v25  ;;  %v482_v24 = vld [vmem:[%s8686_s4 + $0x10] sm:$0xff]  ;;  %v485_v25 = vld [vmem:[%s8686_s4 + $0x28] sm:$0xff]  ;;  %5049 = vmatprep.subr.bf16.mxu0 %v6170_v23 }
 0x206   :  { %5668 = vrsqrt.f32 %v254_v26  ;;  %v487_v26 = vld [vmem:[%s8686_s4 + $0x38] sm:$0xff] }
 0x20e   :  { %v5667_v28 = vpop.eup %5666 }
 0x20f   :  { %v259_v30 = vmul.f32 %v5667_v28, %v247_v27  ;;  %v6181_v27 = vpack.c.bf16 %v482_v24, %v480_v22  ;;  %v6183_v28 = vpack.c.bf16 %v487_v26, %v485_v25  ;;  %v516_v22 = vld [vmem:[%s8686_s4 + $0x120] sm:$0xff]  ;;  %v518_v24 = vld [vmem:[%s8686_s4 + $0x130] sm:$0xff]  ;;  %v521_v25 = vld [vmem:[%s8686_s4 + $0x148] sm:$0xff] }
 0x210   :  { %v5669_v31 = vpop.eup %5668  ;;  %v523_v26 = vld [vmem:[%s8686_s4 + $0x158] sm:$0xff] }
 0x211   :  { %267 = vperm.xlu1 %5445, %v259_v30   ;;  %v258_v32 = vmul.f32 %v5669_v31, %v246_v29  ;;  %v484_v29 = vld [vmem:[%s8686_s4 + $0x20] sm:$0xff]  ;;  %v486_v30 = vld [vmem:[%s8686_s4 + $0x30] sm:$0xff]  ;;  %v489_v31 = vld [vmem:[%s8686_s4 + $0x48] sm:$0xff]  ;;  %5051 = vmatpush1.bf16.msra.mxu0 %v6181_v27 }
 0x212   :  { %5053 = vmatprep.subr.bf16.mxu0 %v6183_v28 }
 0x213   :  { %262 = vperm.xlu0 %5444, %v258_v32   ;;  %v491_v32 = vld [vmem:[%s8686_s4 + $0x58] sm:$0xff] }
 0x215   :  { %276 = vperm.xlu1 %5445, %v248_v33   ;;  %v6199_v33 = vpack.c.bf16 %v486_v30, %v484_v29  ;;  %v6343_v29 = vpack.c.bf16 %v518_v24, %v516_v22  ;;  %v6346_v30 = vpack.c.bf16 %v523_v26, %v521_v25 }
 0x217   :  { %281 = vperm.xlu0 %5444, %v249_v34   ;;  %v6202_v34 = vpack.c.bf16 %v491_v32, %v489_v31  ;;  %5055 = vmatpush1.bf16.msra.mxu0 %v6199_v33  ;;  %v520_v31 = vld [vmem:[%s8686_s4 + $0x140] sm:$0xff]  ;;  %v522_v32 = vld [vmem:[%s8686_s4 + $0x150] sm:$0xff] }
 0x219   :  { %5057 = vmatprep.subr.bf16.mxu0 %v6202_v34 }
 0x290   :  { %v268_v35 = vpop.permute.xlu1 %267 }
 0x291   :  { %v272_v44 = vmul.f32 %v268_v35, %v252_v39  ;;  %v273_v45 = vmul.f32 %v268_v35, %v253_v40  ;;  %v488_v35 = vld [vmem:[%s8686_s4 + $0x40] sm:$0xff] }
 0x292   :  { %v263_v38 = vpop.permute.xlu0 %262 }
 0x293   :  { %v270_v41 = vmul.f32 %v263_v38, %v250_v36  ;;  %v271_v42 = vmul.f32 %v263_v38, %v251_v37  ;;  %v490_v36 = vld [vmem:[%s8686_s4 + $0x50] sm:$0xff]  ;;  %v493_v37 = vld [vmem:[%s8686_s4 + $0x68] sm:$0xff]  ;;  %v495_v38 = vld [vmem:[%s8686_s4 + $0x78] sm:$0xff] }
 0x294   :  { %v277_v43 = vpop.permute.xlu1 %276  ;;  %v6217_v39 = vpack.c.bf16 %v490_v36, %v488_v35  ;;  %v6220_v40 = vpack.c.bf16 %v495_v38, %v493_v37  ;;  %v525_v35 = vld [vmem:[%s8686_s4 + $0x168] sm:$0xff]  ;;  %v527_v36 = vld [vmem:[%s8686_s4 + $0x178] sm:$0xff]  ;;  %v6361_v37 = vpack.c.bf16 %v522_v32, %v520_v31 }
 0x295   :  { %v284_v46 = vadd.f32 %v277_v43, %v270_v41  ;;  %v285_v47 = vadd.f32 %v277_v43, %v271_v42  ;;  %v492_v41 = vld [vmem:[%s8686_s4 + $0x60] sm:$0xff]  ;;  %v494_v42 = vld [vmem:[%s8686_s4 + $0x70] sm:$0xff]  ;;  %v497_v43 = vld [vmem:[%s8686_s4 + $0x88] sm:$0xff]  ;;  %v6364_v38 = vpack.c.bf16 %v527_v36, %v525_v35 }
 0x296   :  { %v282_v48 = vpop.permute.xlu0 %281  ;;  %5059 = vmatpush1.bf16.msra.mxu0 %v6217_v39 }
 0x297   :  { %v288_v49 = vmul.f32 0.5, %v284_v46  ;;  %v289_v50 = vmul.f32 0.5, %v285_v47  ;;  %v286_v51 = vadd.f32 %v282_v48, %v272_v44  ;;  %v287_v53 = vadd.f32 %v282_v48, %v273_v45  ;;  %v499_v44 = vld [vmem:[%s8686_s4 + $0x98] sm:$0xff]  ;;  %5061 = vmatprep.subr.bf16.mxu0 %v6220_v40  ;;  %v498_v48 = vld [vmem:[%s8686_s4 + $0x90] sm:$0xff] }
 0x298   :  { %v6235_v45 = vpack.c.bf16 %v494_v42, %v492_v41  ;;  %v524_v41 = vld [vmem:[%s8686_s4 + $0x160] sm:$0xff]  ;;  %v526_v42 = vld [vmem:[%s8686_s4 + $0x170] sm:$0xff] }
 0x299   :  { %5670 = vtanh.f32 %v288_v49  ;;  %v290_v55 = vmul.f32 0.5, %v286_v51  ;;  %v291_v56 = vmul.f32 0.5, %v287_v53  ;;  %v501_v49 = vld [vmem:[%s8686_s4 + $0xa8] sm:$0xff] }
 0x29a   :  { %5672 = vtanh.f32 %v289_v50  ;;  %v503_v50 = vld [vmem:[%s8686_s4 + $0xb8] sm:$0xff]  ;;  %5063 = vmatpush1.bf16.msra.mxu0 %v6235_v45 }
 0x29b   :  { %5674 = vtanh.f32 %v290_v55  ;;  %v500_v55 = vld [vmem:[%s8686_s4 + $0xa0] sm:$0xff] }
 0x29c   :  { %5676 = vtanh.f32 %v291_v56  ;;  %v502_v56 = vld [vmem:[%s8686_s4 + $0xb0] sm:$0xff] }
 0x2a3   :  { %v5671_v52 = vpop.eup %5670 }
 0x2a4   :  { %v5673_v54 = vpop.eup %5672  ;;  %v296_v57 = vadd.f32 1.0, %v5671_v52  ;;  %v505_v52 = vld [vmem:[%s8686_s4 + $0xc8] sm:$0xff] }
 0x2a5   :  { %v5675_v58 = vpop.eup %5674  ;;  %v297_v59 = vadd.f32 1.0, %v5673_v54  ;;  %v507_v54 = vld [vmem:[%s8686_s4 + $0xd8] sm:$0xff] }
 0x2a6   :  { %v5677_v60 = vpop.eup %5676  ;;  %v300_v61 = vmul.f32 0.5, %v296_v57  ;;  %v298_v62 = vadd.f32 1.0, %v5675_v58  ;;  %v6271_v57 = vpack.c.bf16 %v502_v56, %v500_v55  ;;  %v6274_v58 = vpack.c.bf16 %v507_v54, %v505_v52 }
 0x2a7   :  { %v301_v63 = vmul.f32 0.5, %v297_v59  ;;  %v299_v0 = vadd.f32 1.0, %v5677_v60  ;;  %v504_v59 = vld [vmem:[%s8686_s4 + $0xc0] sm:$0xff]  ;;  %v506_v60 = vld [vmem:[%s8686_s4 + $0xd0] sm:$0xff] }
 0x2a8   :  { %v6123_v2 = vmul.f32 %v300_v61, %v284_v46  ;;  %v302_v3 = vmul.f32 0.5, %v298_v62  ;;  %v6238_v46 = vpack.c.bf16 %v499_v44, %v497_v43  ;;  %v509_v61 = vld [vmem:[%s8686_s4 + $0xe8] sm:$0xff]  ;;  %v511_v62 = vld [vmem:[%s8686_s4 + $0xf8] sm:$0xff] }
 0x2a9   :  { %v6125_v4 = vmul.f32 %v301_v63, %v285_v47  ;;  %v303_v5 = vmul.f32 0.5, %v299_v0  ;;  %v496_v47 = vld [vmem:[%s8686_s4 + $0x80] sm:$0xff]  ;;  %v6289_v63 = vpack.c.bf16 %v506_v60, %v504_v59  ;;  %v6292_v0 = vpack.c.bf16 %v511_v62, %v509_v61  ;;  %v529_v43 = vld [vmem:[%s8686_s4 + $0x188] sm:$0xff]  ;;  %v531_v44 = vld [vmem:[%s8686_s4 + $0x198] sm:$0xff] }
 0x2aa   :  { %v6127_v6 = vmul.f32 %v302_v3, %v286_v51  ;;  %v308_v9 = vsel %vm210_vm12, %v6123_v2, 0.0  ;;  %v6253_v51 = vpack.c.bf16 %v498_v48, %v496_v47  ;;  %5065 = vmatprep.subr.bf16.mxu0 %v6238_v46  ;;  %v508_v3 = vld [vmem:[%s8686_s4 + $0xe0] sm:$0xff]  ;;  %v6379_v47 = vpack.c.bf16 %v526_v42, %v524_v41 }
 0x2ab   :  { %v6129_v7 = vmul.f32 %v303_v5, %v287_v53  ;;  %v309_v10 = vsel %vm211_vm13, %v6125_v4, 0.0  ;;  %v6256_v53 = vpack.c.bf16 %v503_v50, %v501_v49  ;;  %v510_v5 = vld [vmem:[%s8686_s4 + $0xf0] sm:$0xff]  ;;  %v6382_v48 = vpack.c.bf16 %v531_v44, %v529_v43  ;;  %v528_v49 = vld [vmem:[%s8686_s4 + $0x180] sm:$0xff] }
 0x2ac   :  { %v310_v11 = vsel %vm210_vm12, %v6127_v6, 0.0  ;;  %v5033_v13 = vpack.c.bf16 %v6127_v6, %v6123_v2  ;;  %5067 = vmatpush1.bf16.msra.mxu0 %v6253_v51  ;;  %v530_v50 = vld [vmem:[%s8686_s4 + $0x190] sm:$0xff]  ;;  %vm1440_vm12 = vcmp.lt.s32.totalorder %v6046_v1, 15 }
 0x2ad   :  { %v311_v14 = vsel %vm211_vm13, %v6129_v7, 0.0  ;;  %v5446_v15 = vpack.i.bf16 %v310_v11, %v308_v9  ;;  %v5030_v17 = vpack.c.bf16 %v6129_v7, %v6125_v4  ;;  %5069 = vmatprep.subr.bf16.mxu0 %v6256_v53  ;;  %v513_v9 = vld [vmem:[%s8686_s4 + $0x108] sm:$0xff]  ;;  %v6307_v11 = vpack.c.bf16 %v510_v5, %v508_v3 }
 0x2ae   :  { %v5451_v16 = vpack.i.bf16 %v311_v14, %v309_v10  ;;  %v515_v10 = vld [vmem:[%s8686_s4 + $0x118] sm:$0xff]  ;;  %v6391_v55 = vpack.c.bf16 %v530_v50, %v528_v49  ;;  %vm1441_vm13 = vcmp.lt.s32.totalorder %v6053_v8, 15 }
 0x2af   :  { %5447 = vrot.lane.b32.xlu1 %v5446_v15, %s6010_s20  ;;  %v6310_v14 = vpack.c.bf16 %v515_v10, %v513_v9 }
 0x2b0   :  { %5452 = vrot.lane.b32.xlu0 %v5451_v16, %s6010_s20  ;;  %5071 = vmatpush1.bf16.msra.mxu0 %v6271_v57 }
 0x2b1   :  { %5073 = vmatprep.subr.bf16.mxu0 %v6274_v58 }
 0x2b3   :  { %5457 = vrot.lane.b32.xlu1 %v5446_v15, %s6011_s21 }
 0x2b4   :  { %5462 = vrot.lane.b32.xlu0 %v5451_v16, %s6011_s21  ;;  %5075 = vmatpush1.bf16.msra.mxu0 %v6289_v63 }
 0x2b5   :  { %5077 = vmatprep.subr.bf16.mxu0 %v6292_v0 }
 0x2b7   :  { %5467 = vrot.lane.b32.xlu1 %v5446_v15, %s6012_s0 }
 0x2b8   :  { %5472 = vrot.lane.b32.xlu0 %v5451_v16, %s6012_s0  ;;  %5079 = vmatpush1.bf16.msra.mxu0 %v6307_v11 }
 0x2b9   :  { %5081 = vmatprep.subr.bf16.mxu0 %v6310_v14 }
 0x2bb   :  { %5477 = vrot.lane.b32.xlu1 %v5446_v15, %s6015_s22  ;;  %v512_v15 = vld [vmem:[%s8686_s4 + $0x100] sm:$0xff] }
 0x2bc   :  { %5482 = vrot.lane.b32.xlu0 %v5451_v16, %s6015_s22  ;;  %v514_v16 = vld [vmem:[%s8686_s4 + $0x110] sm:$0xff] }
 0x2bd   :  { %v6325_v20 = vpack.c.bf16 %v514_v16, %v512_v15 }
 0x2bf   :  { %366 = vperm.xlu1 %5445, %v362_v18   ;;  %v517_v18 = vld [vmem:[%s8686_s4 + $0x128] sm:$0xff]  ;;  %5083 = vmatpush1.bf16.msra.mxu0 %v6325_v20 }
 0x2c0   :  { %371 = vperm.xlu0 %5444, %v363_v19   ;;  %v519_v19 = vld [vmem:[%s8686_s4 + $0x138] sm:$0xff] }
 0x2c1   :  { %v6328_v21 = vpack.c.bf16 %v519_v19, %v517_v18 }
 0x2c3   :  { %5085 = vmatprep.subr.bf16.mxu0 %v6328_v21 }
 0x2c4   :  { %5087 = vmatpush1.bf16.msra.mxu0 %v6343_v29 }
 0x2c5   :  { %5089 = vmatprep.subr.bf16.mxu0 %v6346_v30 }
 0x2c8   :  { %5091 = vmatpush1.bf16.msra.mxu0 %v6361_v37 }
 0x2c9   :  { %5093 = vmatprep.subr.bf16.mxu0 %v6364_v38 }
 0x2cc   :  { %5095 = vmatpush1.bf16.msra.mxu0 %v6379_v47 }
 0x2cd   :  { %5097 = vmatprep.subr.bf16.mxu0 %v6382_v48 }
 0x2d0   :  { %5099 = vmatpush1.bf16.msra.mxu0 %v6391_v55 }
 0x321   :  { %v5448_v56 = vpop.permute.xlu1 %5447 }
 0x322   :  { %v5453_v52 = vpop.permute.xlu0 %5452  ;;  %v5450_v54 = vunpack.i.h.bf16 %v5448_v56  ;;  %v5449_v59 = vunpack.i.l.bf16 %v5448_v56 }
 0x323   :  { %v5455_v60 = vunpack.i.h.bf16 %v5453_v52  ;;  %v5454_v61 = vunpack.i.l.bf16 %v5453_v52 }
 0x325   :  { %v5458_v62 = vpop.permute.xlu1 %5457  ;;  %v320_v3 = vsel %vm45_vm2, %v5449_v59, %v5454_v61  ;;  %v321_v5 = vsel %vm45_vm2, %v5450_v54, %v5455_v60  ;;  %v322_v9 = vsel %vm45_vm2, %v5454_v61, %v5449_v59  ;;  %v323_v10 = vsel %vm45_vm2, %v5455_v60, %v5450_v54 }
 0x326   :  { %v5463_v15 = vpop.permute.xlu0 %5462  ;;  %v5460_v16 = vunpack.i.h.bf16 %v5458_v62  ;;  %v5459_v18 = vunpack.i.l.bf16 %v5458_v62  ;;  %v5026_v19 = vpack.c.bf16 %v321_v5, %v320_v3  ;;  %v5028_v22 = vpack.c.bf16 %v323_v10, %v322_v9 }
 0x327   :  { %v5465_v24 = vunpack.i.h.bf16 %v5463_v15  ;;  %v5464_v25 = vunpack.i.l.bf16 %v5463_v15 }
 0x328   :  { %5027 = vmatprep.subr.bf16.mxu1 %v5026_v19  ;;  %v361_v19 = vld [vmem:[%s8685_s1 + $0x30] sm:$0xff] }
 0x329   :  { %5029 = vmatpush1.bf16.msra.mxu1 %v5028_v22  ;;  %v5468_v26 = vpop.permute.xlu1 %5467  ;;  %v334_v31 = vsel %vm52_vm3, %v5464_v25, %v5459_v18  ;;  %v335_v32 = vsel %vm52_vm3, %v5465_v24, %v5460_v16  ;;  %v332_v49 = vsel %vm52_vm3, %v5459_v18, %v5464_v25  ;;  %v333_v50 = vsel %vm52_vm3, %v5460_v16, %v5465_v24  ;;  %v360_v18 = vld [vmem:[%s8685_s1 + $0x20] sm:$0xff]  ;;  %v533_v22 = vld [vmem:[%s8686_s4 + $0x1a8] sm:$0xff]  ;;  %v535_v24 = vld [vmem:[%s8686_s4 + $0x1b8] sm:$0xff] }
 0x32a   :  { %v5473_v35 = vpop.permute.xlu0 %5472  ;;  %v5470_v36 = vunpack.i.h.bf16 %v5468_v26  ;;  %v5469_v41 = vunpack.i.l.bf16 %v5468_v26  ;;  %5032 = vmatprep.subr.msk.bf16.mxu1 %vm5031_vm14, %v5030_v17  ;;  %v5036_v44 = vpack.c.bf16 %v335_v32, %v334_v31  ;;  %v5038_v61 = vpack.c.bf16 %v333_v50, %v332_v49  ;;  %v532_v26 = vld [vmem:[%s8686_s4 + $0x1a0] sm:$0xff]  ;;  %v534_v31 = vld [vmem:[%s8686_s4 + $0x1b0] sm:$0xff]  ;;  %v541_v49 = vld [vmem:[%s8686_s4 + $0x1e8] sm:$0xff] }
 0x32b   :  { %v5475_v42 = vunpack.i.h.bf16 %v5473_v35  ;;  %v5474_v43 = vunpack.i.l.bf16 %v5473_v35  ;;  %v6453_v25 = vpack.c.bf16 %v535_v24, %v533_v22  ;;  %v6461_v32 = vpack.c.bf16 %v534_v31, %v532_v26  ;;  %v537_v35 = vld [vmem:[%s8686_s4 + $0x1c8] sm:$0xff]  ;;  %v543_v50 = vld [vmem:[%s8686_s4 + $0x1f8] sm:$0xff]  ;;  %vm7070_vm14 = vmpackc.low %vm1441_vm13, %vm1441_vm13 }
 0x32d   :  { %5035 = vmatpush1.bf16.msk.msra.mxu1 %vm5034_vm15, %v5033_v13  ;;  %v5478_v56 = vpop.permute.xlu1 %5477  ;;  %v346_v4 = vsel %vm59_vm4, %v5474_v43, %v5469_v41  ;;  %v347_v7 = vsel %vm59_vm4, %v5475_v42, %v5470_v36  ;;  %v344_v3 = vsel %vm59_vm4, %v5469_v41, %v5474_v43  ;;  %v345_v2 = vsel %vm59_vm4, %v5470_v36, %v5475_v42  ;;  %v539_v36 = vld [vmem:[%s8686_s4 + $0x1d8] sm:$0xff]  ;;  %v536_v42 = vld [vmem:[%s8686_s4 + $0x1c0] sm:$0xff]  ;;  %v538_v43 = vld [vmem:[%s8686_s4 + $0x1d0] sm:$0xff] }
 0x32e   :  { %v5483_v17 = vpop.permute.xlu0 %5482  ;;  %v5480_v52 = vunpack.i.h.bf16 %v5478_v56  ;;  %v5479_v54 = vunpack.i.l.bf16 %v5478_v56  ;;  %5037 = vmatprep.subr.bf16.mxu1 %v5036_v44  ;;  %v5040_v62 = vpack.c.bf16 %v347_v7, %v346_v4  ;;  %v5042_v5 = vpack.c.bf16 %v345_v2, %v344_v3  ;;  %5101 = vmatprep.subr.bf16.mxu0 %v6453_v25  ;;  %v540_v4 = vld [vmem:[%s8686_s4 + $0x1e0] sm:$0xff]  ;;  %v542_v7 = vld [vmem:[%s8686_s4 + $0x1f0] sm:$0xff] }
 0x32f   :  { %v5485_v59 = vunpack.i.h.bf16 %v5483_v17  ;;  %v5484_v60 = vunpack.i.l.bf16 %v5483_v17  ;;  %5103 = vmatpush1.bf16.msra.mxu0 %v6461_v32  ;;  %v6471_v41 = vpack.c.bf16 %v539_v36, %v537_v35  ;;  %v6479_v44 = vpack.c.bf16 %v538_v43, %v536_v42 }
 0x330   :  { %v6489_v56 = vpack.c.bf16 %v543_v50, %v541_v49  ;;  %v6497_v17 = vpack.c.bf16 %v542_v7, %v540_v4  ;;  %vm2423_vm15 = vcmask 523264  }
 0x331   :  { %5039 = vmatpush1.bf16.msra.mxu1 %v5038_v61  ;;  %v358_v6 = vsel %vm66_vm7, %v5484_v60, %v5479_v54  ;;  %v359_v13 = vsel %vm66_vm7, %v5485_v59, %v5480_v52  ;;  %v356_v10 = vsel %vm66_vm7, %v5479_v54, %v5484_v60  ;;  %v357_v15 = vsel %vm66_vm7, %v5480_v52, %v5485_v59 }
 0x332   :  { %5041 = vmatprep.subr.bf16.mxu1 %v5040_v62  ;;  %v5044_v9 = vpack.c.bf16 %v359_v13, %v358_v6  ;;  %v5046_v16 = vpack.c.bf16 %v357_v15, %v356_v10  ;;  %5105 = vmatprep.subr.bf16.mxu0 %v6471_v41  ;;  %vm646_vm7 = vcmp.lt.s32.totalorder %v6053_v8, 30 }
 0x333   :  { %5107 = vmatpush1.bf16.msra.mxu0 %v6479_v44  ;;  %vm6565_vm8 = vmpackc.low %vm646_vm7, %vm646_vm7 }
 0x334   :  { %5109 = vmatprep.subr.bf16.mxu0 %v6489_v56 }
 0x335   :  { %5043 = vmatpush1.bf16.msra.mxu1 %v5042_v5 }
 0x336   :  { %5045 = vmatprep.subr.bf16.mxu1 %v5044_v9 }
 0x337   :  { %5111 = vmatpush1.bf16.msra.mxu0 %v6497_v17 }
 0x339   :  { %5047 = vmatpush1.bf16.msra.mxu1 %v5046_v16 }
 0x33c   :  { %4620 = vmatmul.mubr.msk.f32.vlgmr.msra.gmra.mrb[0].mxu1 %vm374_vm0, %v360_v18 }
 0x33d   :  { %451 = vmatprep.mubr.f32.mxu1 %v8689_v12 }
 0x33e   :  { %v367_v52 = vpop.permute.xlu1 %366 }
 0x33f   :  { %v372_v3 = vpop.permute.xlu0 %371 }
 0x340   :  { %4621 = vmatmul.mubr.msk.f32.gmra.mrb[2].mxu1 %vm374_vm0, %v361_v19 }
 0x341   :  { %876 = vmatprep.mubr.f32.mxu1 %v8689_v12 }
 0x40f   :  { %v447_v54 = vpop.f32.mrb[0].mxu1 }
 0x410   :  { %v448_v59 = vadd.f32 %v447_v54, %v367_v52  ;;  %v449_v60 = vpop.f32.mrb[1].mxu1 }
 0x411   :  { %v450_v61 = vadd.f32 %v449_v60, %v367_v52 }
 0x412   :  { %v464_v62 = vsel %vm458_vm1, %v448_v59, 1e-06 }
 0x413   :  { %v468_v2 = vmax.f32 %v464_v62, 1e-06  ;;  %v465_v6 = vsel %vm459_vm5, %v450_v61, 1e-06  ;;  %v453_v13 = vpop.f32.mrb[2].mxu1 }
 0x414   :  { %v469_v5 = vmax.f32 %v465_v6, 1e-06  ;;  %v454_v9 = vadd.f32 %v453_v13, %v372_v3  ;;  %v455_v10 = vpop.f32.mrb[3].mxu1 }
 0x415   :  { %v472_v15 = vmul.f32 %v468_v2, %v468_v2  ;;  %v456_v16 = vadd.f32 %v455_v10, %v372_v3 }
 0x416   :  { %v473_v18 = vmul.f32 %v469_v5, %v469_v5  ;;  %v466_v19 = vsel %vm458_vm1, %v454_v9, 1e-06 }
 0x417   :  { %v470_v22 = vmax.f32 %v466_v19, 1e-06  ;;  %v467_v24 = vsel %vm459_vm5, %v456_v16, 1e-06  ;;  %v476_v35 = vmul.f32 %v472_v15, %v468_v2 }
 0x418   :  { %v471_v26 = vmax.f32 %v467_v24, 1e-06  ;;  %v477_v31 = vmul.f32 %v473_v18, %v469_v5 }
 0x419   :  { %v474_v36 = vmul.f32 %v470_v22, %v470_v22 }
 0x41a   :  { %v475_v42 = vmul.f32 %v471_v26, %v471_v26  ;;  %608 = vmatprep.mubr.f32.mxu0 %v477_v31 }
 0x41b   :  { %609 = vmatmul.mubr.f32.vlgmr.msra.gmra.mrb[4].mxu0 %v476_v35  ;;  %v478_v49 = vmul.f32 %v474_v36, %v470_v22 }
 0x41c   :  { %v479_v43 = vmul.f32 %v475_v42, %v471_v26 }
 0x41e   :  { %614 = vmatprep.mubr.f32.mxu0 %v479_v43 }
 0x41f   :  { %615 = vmatmul.mubr.f32.gmra.mrb[6].mxu0 %v478_v49 }
 0x420   :  { %1830 = vmatprep.mubr.f32.mxu0 %v8689_v12 }
 0x4ee   :  { %v610_v50 = vpop.f32.mrb[4].mxu0 }
 0x4ef   :  { %v621_v4 = vmax.f32 %v610_v50, 1e-30  ;;  %v612_v7 = vpop.f32.mrb[5].mxu0 }
 0x4f0   :  { %v622_v52 = vmax.f32 %v612_v7, 1e-30 }
 0x4f1   :  { %5678 = vlog2.f32 %v621_v4 }
 0x4f2   :  { %5680 = vlog2.f32 %v622_v52  ;;  %v616_v54 = vpop.f32.mrb[6].mxu0 }
 0x4f3   :  { %v623_v59 = vmax.f32 %v616_v54, 1e-30  ;;  %v618_v60 = vpop.f32.mrb[7].mxu0 }
 0x4f4   :  { %v624_v61 = vmax.f32 %v618_v60, 1e-30 }
 0x4f5   :  { %5682 = vlog2.f32 %v623_v59 }
 0x4f6   :  { %5684 = vlog2.f32 %v624_v61 }
 0x4fb   :  { %v5679_v62 = vpop.eup %5678 }
 0x4fc   :  { %v5681_v3 = vpop.eup %5680  ;;  %v626_v2 = vmul.f32 0.6931472, %v5679_v62 }
 0x4fd   :  { %v628_v6 = vmul.f32 0.6931472, %v5681_v3 }
 0x4fe   :  { %v633_v13 = vmul.f32 0.33333334, %v626_v2 }
 0x4ff   :  { %v5683_v5 = vpop.eup %5682  ;;  %v634_v9 = vmul.f32 0.33333334, %v628_v6 }
 0x500   :  { %v5685_v10 = vpop.eup %5684  ;;  %v637_v15 = vmul.f32 1.442695, %v633_v13  ;;  %v630_v16 = vmul.f32 0.6931472, %v5683_v5 }
 0x501   :  { %v639_v18 = vmul.f32 1.442695, %v634_v9  ;;  %v632_v19 = vmul.f32 0.6931472, %v5685_v10 }
 0x502   :  { %5686 = vpow2.f32 %v637_v15  ;;  %v635_v22 = vmul.f32 0.33333334, %v630_v16 }
 0x503   :  { %5688 = vpow2.f32 %v639_v18  ;;  %v636_v24 = vmul.f32 0.33333334, %v632_v19 }
 0x504   :  { %v641_v26 = vmul.f32 1.442695, %v635_v22 }
 0x505   :  { %v643_v31 = vmul.f32 1.442695, %v636_v24 }
 0x506   :  { %5690 = vpow2.f32 %v641_v26 }
 0x507   :  { %5692 = vpow2.f32 %v643_v31 }
 0x50c   :  { %v5687_v35 = vpop.eup %5686 }
 0x50d   :  { %v5689_v36 = vpop.eup %5688  ;;  %v651_v42 = vsel %vm645_vm6, %v5687_v35, 0.0 }
 0x50e   :  { %v652_v43 = vsel %vm646_vm7, %v5689_v36, 0.0  ;;  %v661_v61 = vmul.f32 %v651_v42, %v651_v42 }
 0x50f   :  { %v655_v49 = vadd.f32 %v652_v43, %v651_v42  ;;  %v662_v62 = vmul.f32 %v652_v43, %v652_v43 }
 0x510   :  { %v5691_v50 = vpop.eup %5690 }
 0x511   :  { %v5693_v4 = vpop.eup %5692  ;;  %656 = vadd.xlane.f32.xlu1 %v655_v49  ;;  %v653_v7 = vsel %vm645_vm6, %v5691_v50, 0.0  ;;  %v665_v2 = vadd.f32 %v662_v62, %v661_v61  ;;  %v683_v62 = vld [vmem:[%s8684_s3 + $0x110] sm:$0xff] }
 0x512   :  { %v654_v52 = vsel %vm646_vm7, %v5693_v4, 0.0  ;;  %v663_v54 = vmul.f32 %v653_v7, %v653_v7 }
 0x513   :  { %v658_v59 = vadd.f32 %v654_v52, %v653_v7  ;;  %v664_v60 = vmul.f32 %v654_v52, %v654_v52  ;;  %v682_v7 = vld [vmem:[%s8684_s3 + $0x108] sm:$0xff] }
 0x515   :  { %659 = vadd.xlane.f32.xlu0 %v658_v59  ;;  %v668_v3 = vadd.f32 %v664_v60, %v663_v54  ;;  %v681_v54 = vld [vmem:[%s8684_s3 + $0x100] sm:$0xff] }
 0x517   :  { %669 = vadd.xlane.f32.xlu1 %v668_v3  ;;  %v684_v3 = vld [vmem:[%s8684_s3 + $0x118] sm:$0xff] }
 0x519   :  { %666 = vadd.xlane.f32.xlu0 %v665_v2 }
 0x59e   :  { %v657_v6 = vpop.xlane.xlu1 %656 }
 0x59f   :  { %v671_v5 = vmul.f32 0.016666668, %v657_v6 }
 0x5a1   :  { %v675_v22 = vmul.f32 %v671_v5, %v671_v5  ;;  %v685_v6 = vsub.f32 %v5687_v35, %v671_v5 }
 0x5a2   :  { %v660_v13 = vpop.xlane.xlu0 %659 }
 0x5a3   :  { %v672_v9 = vmul.f32 0.016666668, %v660_v13  ;;  %v686_v13 = vsub.f32 %v5689_v36, %v671_v5 }
 0x5a4   :  { %v670_v10 = vpop.xlane.xlu1 %669 }
 0x5a5   :  { %v674_v15 = vmul.f32 0.016666668, %v670_v10  ;;  %v676_v16 = vmul.f32 %v672_v9, %v672_v9 }
 0x5a6   :  { %v667_v18 = vpop.xlane.xlu0 %666 }
 0x5a7   :  { %v678_v19 = vsub.f32 %v674_v15, %v676_v16  ;;  %v673_v24 = vmul.f32 0.016666668, %v667_v18  ;;  %v687_v15 = vsub.f32 %v5691_v50, %v672_v9  ;;  %v688_v16 = vsub.f32 %v5693_v4, %v672_v9 }
 0x5a9   :  { %v680_v26 = vmax.f32 %v678_v19, 0.0  ;;  %v677_v31 = vsub.f32 %v673_v24, %v675_v22 }
 0x5ab   :  { %v690_v42 = vadd.f32 1e-05, %v680_v26  ;;  %v679_v43 = vmax.f32 %v677_v31, 0.0 }
 0x5ad   :  { %5694 = vrsqrt.f32 %v690_v42  ;;  %v689_v49 = vadd.f32 1e-05, %v679_v43 }
 0x5af   :  { %5696 = vrsqrt.f32 %v689_v49 }
 0x5b7   :  { %v5695_v52 = vpop.eup %5694 }
 0x5b8   :  { %v694_v59 = vmul.f32 %v5695_v52, %v682_v7 }
 0x5b9   :  { %v5697_v60 = vpop.eup %5696 }
 0x5ba   :  { %702 = vperm.xlu1 %5445, %v694_v59   ;;  %v693_v61 = vmul.f32 %v5697_v60, %v681_v54 }
 0x5bc   :  { %697 = vperm.xlu0 %5444, %v693_v61  }
 0x5be   :  { %711 = vperm.xlu1 %5445, %v683_v62  }
 0x5c0   :  { %716 = vperm.xlu0 %5444, %v684_v3  }
 0x639   :  { %v703_v2 = vpop.permute.xlu1 %702 }
 0x63a   :  { %v707_v24 = vmul.f32 %v703_v2, %v687_v15  ;;  %v708_v26 = vmul.f32 %v703_v2, %v688_v16 }
 0x63b   :  { %v698_v10 = vpop.permute.xlu0 %697 }
 0x63c   :  { %v705_v18 = vmul.f32 %v698_v10, %v685_v6  ;;  %v706_v19 = vmul.f32 %v698_v10, %v686_v13 }
 0x63d   :  { %v712_v22 = vpop.permute.xlu1 %711 }
 0x63e   :  { %v719_v31 = vadd.f32 %v712_v22, %v705_v18  ;;  %v720_v42 = vadd.f32 %v712_v22, %v706_v19 }
 0x63f   :  { %v717_v43 = vpop.permute.xlu0 %716 }
 0x640   :  { %v723_v49 = vmul.f32 0.5, %v719_v31  ;;  %v724_v7 = vmul.f32 0.5, %v720_v42  ;;  %v721_v52 = vadd.f32 %v717_v43, %v707_v24  ;;  %v722_v54 = vadd.f32 %v717_v43, %v708_v26 }
 0x642   :  { %5698 = vtanh.f32 %v723_v49  ;;  %v725_v59 = vmul.f32 0.5, %v721_v52  ;;  %v726_v60 = vmul.f32 0.5, %v722_v54 }
 0x643   :  { %5700 = vtanh.f32 %v724_v7 }
 0x644   :  { %5702 = vtanh.f32 %v725_v59  ;;  %v778_v59 = vld [vmem:[%s8684_s3 + $0x38] sm:$0xff] }
 0x645   :  { %5704 = vtanh.f32 %v726_v60 }
 0x64c   :  { %v5699_v35 = vpop.eup %5698 }
 0x64d   :  { %v5701_v36 = vpop.eup %5700  ;;  %v731_v50 = vadd.f32 1.0, %v5699_v35 }
 0x64e   :  { %v5703_v4 = vpop.eup %5702  ;;  %v732_v5 = vadd.f32 1.0, %v5701_v36 }
 0x64f   :  { %v5705_v9 = vpop.eup %5704  ;;  %v735_v61 = vmul.f32 0.5, %v731_v50  ;;  %v733_v62 = vadd.f32 1.0, %v5703_v4 }
 0x650   :  { %v736_v3 = vmul.f32 0.5, %v732_v5  ;;  %v734_v2 = vadd.f32 1.0, %v5705_v9 }
 0x651   :  { %v739_v6 = vmul.f32 %v735_v61, %v719_v31  ;;  %v737_v13 = vmul.f32 0.5, %v733_v62 }
 0x652   :  { %v740_v10 = vmul.f32 %v736_v3, %v720_v42  ;;  %v738_v15 = vmul.f32 0.5, %v734_v2  ;;  %v775_v42 = vld [vmem:[%s8684_s3 + $0x20] sm:$0xff] }
 0x653   :  { %v741_v16 = vmul.f32 %v737_v13, %v721_v52  ;;  %v743_v24 = vsel %vm645_vm6, %v739_v6, 0.0  ;;  %v776_v52 = vld [vmem:[%s8684_s3 + $0x28] sm:$0xff] }
 0x654   :  { %v742_v18 = vmul.f32 %v738_v15, %v722_v54  ;;  %v744_v22 = vsel %vm646_vm7, %v740_v10, 0.0  ;;  %v777_v54 = vld [vmem:[%s8684_s3 + $0x30] sm:$0xff] }
 0x655   :  { %v5119_v19 = vpack.c.bf16 %v741_v16, %v739_v6  ;;  %v745_v26 = vsel %vm645_vm6, %v741_v16, 0.0 }
 0x656   :  { %v746_v43 = vsel %vm646_vm7, %v742_v18, 0.0  ;;  %v5486_v49 = vpack.i.bf16 %v745_v26, %v743_v24  ;;  %v5116_v31 = vpack.c.bf16 %v742_v18, %v740_v10 }
 0x657   :  { %v5491_v7 = vpack.i.bf16 %v746_v43, %v744_v22 }
 0x658   :  { %5487 = vrot.lane.b32.xlu1 %v5486_v49, %s6010_s20 }
 0x659   :  { %5492 = vrot.lane.b32.xlu0 %v5491_v7, %s6010_s20 }
 0x65c   :  { %5497 = vrot.lane.b32.xlu1 %v5486_v49, %s6011_s21  ;;  %v1141_v49 = vld [vmem:[%s8685_s1 + $0x80] sm:$0xff] }
 0x65d   :  { %5502 = vrot.lane.b32.xlu0 %v5491_v7, %s6011_s21 }
 0x660   :  { %781 = vperm.xlu1 %5445, %v775_v42  }
 0x661   :  { %786 = vperm.xlu0 %5444, %v776_v52  }
 0x664   :  { %791 = vperm.xlu1 %5445, %v777_v54  }
 0x665   :  { %796 = vperm.xlu0 %5444, %v778_v59   ;;  %v772_v59 = vld [vmem:[%s8685_s1 + $0x50] sm:$0xff] }
 0x6ca   :  { %v5488_v60 = vpop.permute.xlu1 %5487 }
 0x6cb   :  { %v5493_v35 = vpop.permute.xlu0 %5492  ;;  %v5490_v36 = vunpack.i.h.bf16 %v5488_v60  ;;  %v5489_v50 = vunpack.i.l.bf16 %v5488_v60  ;;  %v774_v60 = vld [vmem:[%s8685_s1 + $0x70] sm:$0xff] }
 0x6cc   :  { %v5495_v4 = vunpack.i.h.bf16 %v5493_v35  ;;  %v5494_v5 = vunpack.i.l.bf16 %v5493_v35 }
 0x6ce   :  { %v758_v9 = vsel %vm45_vm2, %v5495_v4, %v5490_v36  ;;  %v757_v61 = vsel %vm45_vm2, %v5494_v5, %v5489_v50  ;;  %v5498_v62 = vpop.permute.xlu1 %5497  ;;  %v755_v3 = vsel %vm45_vm2, %v5489_v50, %v5494_v5  ;;  %v756_v2 = vsel %vm45_vm2, %v5490_v36, %v5495_v4 }
 0x6cf   :  { %v5503_v6 = vpop.permute.xlu0 %5502  ;;  %v5500_v13 = vunpack.i.h.bf16 %v5498_v62  ;;  %v5499_v10 = vunpack.i.l.bf16 %v5498_v62  ;;  %v5112_v15 = vpack.c.bf16 %v756_v2, %v755_v3  ;;  %v5114_v16 = vpack.c.bf16 %v758_v9, %v757_v61 }
 0x6d0   :  { %v5505_v18 = vunpack.i.h.bf16 %v5503_v6  ;;  %v5504_v22 = vunpack.i.l.bf16 %v5503_v6 }
 0x6d1   :  { %5113 = vmatprep.subr.bf16.mxu1 %v5112_v15 }
 0x6d2   :  { %5115 = vmatpush1.bf16.msra.mxu1 %v5114_v16  ;;  %v769_v26 = vsel %vm52_vm3, %v5504_v22, %v5499_v10  ;;  %v770_v43 = vsel %vm52_vm3, %v5505_v18, %v5500_v13  ;;  %v768_v7 = vsel %vm52_vm3, %v5500_v13, %v5505_v18  ;;  %v767_v42 = vsel %vm52_vm3, %v5499_v10, %v5504_v22 }
 0x6d3   :  { %5118 = vmatprep.subr.msk.bf16.mxu1 %vm6565_vm8, %v5116_v31  ;;  %v5122_v52 = vpack.c.bf16 %v770_v43, %v769_v26  ;;  %v5124_v54 = vpack.c.bf16 %v768_v7, %v767_v42  ;;  %v771_v31 = vld [vmem:[%s8685_s1 + $0x40] sm:$0xff] }
 0x6d6   :  { %5121 = vmatpush1.bf16.msk.msra.mxu1 %vm6578_vm9, %v5119_v19  ;;  %v773_v19 = vld [vmem:[%s8685_s1 + $0x60] sm:$0xff] }
 0x6d7   :  { %5123 = vmatprep.subr.bf16.mxu1 %v5122_v52 }
 0x6da   :  { %5125 = vmatpush1.bf16.msra.mxu1 %v5124_v54 }
 0x6dd   :  { %4626 = vmatmul.mubr.msk.f32.vlgmr.msra.gmra.mrb[4].mxu1 %vm799_vm10, %v771_v31 }
 0x6de   :  { %882 = vmatprep.mubr.f32.mxu1 %v8689_v12 }
 0x6df   :  { %v782_v35 = vpop.permute.xlu1 %781 }
 0x6e0   :  { %v787_v61 = vpop.permute.xlu0 %786 }
 0x6e1   :  { %4627 = vmatmul.mubr.msk.f32.gmra.mrb[6].mxu1 %vm799_vm10, %v772_v59 }
 0x6e2   :  { %888 = vmatprep.mubr.f32.mxu1 %v8689_v12 }
 0x6e3   :  { %v792_v26 = vpop.permute.xlu1 %791 }
 0x6e5   :  { %4628 = vmatmul.mubr.msk.f32.gmra.mrb[8].mxu1 %vm799_vm10, %v773_v19 }
 0x6e6   :  { %894 = vmatprep.mubr.f32.mxu1 %v8689_v12 }
 0x6e9   :  { %4629 = vmatmul.mubr.msk.f32.gmra.mrb[10].mxu1 %vm799_vm10, %v774_v60 }
 0x6ea   :  { %1246 = vmatprep.mubr.f32.mxu1 %v8689_v12 }
 0x7b0   :  { %v878_v36 = vpop.f32.mrb[4].mxu1 }
 0x7b1   :  { %v6604_v50 = vadd.f32 %v878_v36, %v782_v35  ;;  %v880_v4 = vpop.f32.mrb[5].mxu1 }
 0x7b2   :  { %v6606_v5 = vadd.f32 %v880_v4, %v782_v35  ;;  %v797_v35 = vpop.permute.xlu0 %796 }
 0x7b3   :  { %v901_v9 = vsel %vm645_vm6, %v6604_v50, 0.0 }
 0x7b4   :  { %v884_v62 = vpop.f32.mrb[6].mxu1  ;;  %v902_v3 = vsel %vm646_vm7, %v6606_v5, 0.0  ;;  %v921_v2 = vmul.f32 %v901_v9, %v901_v9 }
 0x7b5   :  { %v6614_v6 = vadd.f32 %v884_v62, %v787_v61  ;;  %v886_v13 = vpop.f32.mrb[7].mxu1  ;;  %v909_v10 = vadd.f32 %v902_v3, %v901_v9  ;;  %v922_v15 = vmul.f32 %v902_v3, %v902_v3 }
 0x7b6   :  { %v6616_v16 = vadd.f32 %v886_v13, %v787_v61 }
 0x7b7   :  { %910 = vadd.xlane.f32.xlu1 %v909_v10  ;;  %v929_v18 = vadd.f32 %v922_v15, %v921_v2  ;;  %v903_v22 = vsel %vm645_vm6, %v6614_v6, 0.0 }
 0x7b8   :  { %v890_v43 = vpop.f32.mrb[8].mxu1  ;;  %v904_v7 = vsel %vm646_vm7, %v6616_v16, 0.0  ;;  %v923_v42 = vmul.f32 %v903_v22, %v903_v22 }
 0x7b9   :  { %v6624_v52 = vadd.f32 %v890_v43, %v792_v26  ;;  %v892_v54 = vpop.f32.mrb[9].mxu1  ;;  %930 = vadd.xlane.f32.xlu0 %v929_v18  ;;  %v924_v31 = vmul.f32 %v904_v7, %v904_v7  ;;  %v912_v19 = vadd.f32 %v904_v7, %v903_v22 }
 0x7ba   :  { %v6626_v59 = vadd.f32 %v892_v54, %v792_v26  ;;  %v965_v54 = vld [vmem:[%s8684_s3 + $0x140] sm:$0xff] }
 0x7bb   :  { %v932_v60 = vadd.f32 %v924_v31, %v923_v42  ;;  %v905_v4 = vsel %vm645_vm6, %v6624_v52, 0.0  ;;  %v966_v31 = vld [vmem:[%s8684_s3 + $0x148] sm:$0xff] }
 0x7bc   :  { %v896_v36 = vpop.f32.mrb[10].mxu1  ;;  %v906_v9 = vsel %vm646_vm7, %v6626_v59, 0.0  ;;  %v925_v10 = vmul.f32 %v905_v4, %v905_v4 }
 0x7bd   :  { %v6634_v61 = vadd.f32 %v896_v36, %v797_v35  ;;  %v898_v62 = vpop.f32.mrb[11].mxu1  ;;  %913 = vadd.xlane.f32.xlu0 %v912_v19  ;;  %933 = vadd.xlane.f32.xlu1 %v932_v60  ;;  %v915_v2 = vadd.f32 %v906_v9, %v905_v4  ;;  %v926_v15 = vmul.f32 %v906_v9, %v906_v9 }
 0x7be   :  { %v6636_v3 = vadd.f32 %v898_v62, %v797_v35 }
 0x7bf   :  { %v907_v13 = vsel %vm645_vm6, %v6634_v61, 0.0  ;;  %v935_v7 = vadd.f32 %v926_v15, %v925_v10 }
 0x7c0   :  { %v908_v18 = vsel %vm646_vm7, %v6636_v3, 0.0  ;;  %v927_v26 = vmul.f32 %v907_v13, %v907_v13 }
 0x7c1   :  { %916 = vadd.xlane.f32.xlu0 %v915_v2  ;;  %v918_v22 = vadd.f32 %v908_v18, %v907_v13  ;;  %v928_v43 = vmul.f32 %v908_v18, %v908_v18 }
 0x7c3   :  { %919 = vadd.xlane.f32.xlu1 %v918_v22  ;;  %v938_v42 = vadd.f32 %v928_v43, %v927_v26 }
 0x7c5   :  { %936 = vadd.xlane.f32.xlu0 %v935_v7 }
 0x7c7   :  { %939 = vadd.xlane.f32.xlu1 %v938_v42 }
 0x7d8   :  { %1019 = vperm.xlu1 %5445, %v965_v54  }
 0x7db   :  { %1024 = vperm.xlu0 %5444, %v966_v31  }
 0x844   :  { %v911_v19 = vpop.xlane.xlu1 %910 }
 0x845   :  { %v941_v60 = vmul.f32 0.016666668, %v911_v19 }
 0x846   :  { %v931_v35 = vpop.xlane.xlu0 %930 }
 0x847   :  { %v945_v36 = vmul.f32 0.016666668, %v931_v35  ;;  %v949_v4 = vmul.f32 %v941_v60, %v941_v60 }
 0x849   :  { %v953_v9 = vsub.f32 %v945_v36, %v949_v4 }
 0x84a   :  { %v914_v62 = vpop.xlane.xlu0 %913  ;;  %v934_v2 = vpop.xlane.xlu1 %933 }
 0x84b   :  { %v957_v13 = vmax.f32 %v953_v9, 0.0  ;;  %v6650_v10 = vmul.f32 0.016666668, %v914_v62  ;;  %v946_v22 = vmul.f32 0.016666668, %v934_v2 }
 0x84d   :  { %v977_v15 = vadd.f32 1e-05, %v957_v13  ;;  %v950_v18 = vmul.f32 %v6650_v10, %v6650_v10 }
 0x84e   :  { %v917_v26 = vpop.xlane.xlu0 %916 }
 0x84f   :  { %5706 = vrsqrt.f32 %v977_v15  ;;  %v954_v43 = vsub.f32 %v946_v22, %v950_v18  ;;  %v6654_v7 = vmul.f32 0.016666668, %v917_v26  ;;  %v961_v22 = vld [vmem:[%s8684_s3 + $0x120] sm:$0xff] }
 0x850   :  { %v920_v42 = vpop.xlane.xlu1 %919 }
 0x851   :  { %v958_v54 = vmax.f32 %v954_v43, 0.0  ;;  %v6656_v31 = vmul.f32 0.016666668, %v920_v42  ;;  %v951_v36 = vmul.f32 %v6654_v7, %v6654_v7 }
 0x852   :  { %v937_v19 = vpop.xlane.xlu0 %936 }
 0x853   :  { %v978_v35 = vadd.f32 1e-05, %v958_v54  ;;  %v947_v4 = vmul.f32 0.016666668, %v937_v19  ;;  %v952_v2 = vmul.f32 %v6656_v31, %v6656_v31  ;;  %v962_v19 = vld [vmem:[%s8684_s3 + $0x128] sm:$0xff] }
 0x854   :  { %v940_v9 = vpop.xlane.xlu1 %939 }
 0x855   :  { %5708 = vrsqrt.f32 %v978_v35  ;;  %v955_v62 = vsub.f32 %v947_v4, %v951_v36  ;;  %v948_v13 = vmul.f32 0.016666668, %v940_v9  ;;  %v963_v4 = vld [vmem:[%s8684_s3 + $0x130] sm:$0xff] }
 0x857   :  { %v959_v15 = vmax.f32 %v955_v62, 0.0  ;;  %v956_v18 = vsub.f32 %v948_v13, %v952_v2  ;;  %v964_v62 = vld [vmem:[%s8684_s3 + $0x138] sm:$0xff] }
 0x859   :  { %v5707_v26 = vpop.eup %5706  ;;  %v979_v43 = vadd.f32 1e-05, %v959_v15  ;;  %v960_v42 = vmax.f32 %v956_v18, 0.0  ;;  %v967_v15 = vld [vmem:[%s8684_s3 + $0x150] sm:$0xff]  ;;  %v968_v18 = vld [vmem:[%s8684_s3 + $0x158] sm:$0xff] }
 0x85a   :  { %v985_v54 = vmul.f32 %v5707_v26, %v961_v22  ;;  %v1025_v22 = vpop.permute.xlu0 %1024  ;;  %v969_v26 = vsub.f32 %v6604_v50, %v941_v60 }
 0x85b   :  { %5710 = vrsqrt.f32 %v979_v43  ;;  %v980_v12 = vadd.f32 1e-05, %v960_v42  ;;  %v970_v43 = vsub.f32 %v6606_v5, %v941_v60 }
 0x85c   :  { %991 = vperm.xlu0 %5444, %v985_v54  }
 0x85d   :  { %5712 = vrsqrt.f32 %v980_v12 }
 0x85f   :  { %v5709_v35 = vpop.eup %5708 }
 0x860   :  { %v986_v36 = vmul.f32 %v5709_v35, %v962_v19  ;;  %v1020_v35 = vpop.permute.xlu1 %1019 }
 0x862   :  { %996 = vperm.xlu1 %5445, %v986_v36  }
 0x865   :  { %v5711_v9 = vpop.eup %5710 }
 0x866   :  { %v987_v2 = vmul.f32 %v5711_v9, %v963_v4 }
 0x867   :  { %v5713_v13 = vpop.eup %5712 }
 0x868   :  { %1001 = vperm.xlu1 %5445, %v987_v2   ;;  %v988_v12 = vmul.f32 %v5713_v13, %v964_v62  ;;  %v971_v2 = vsub.f32 %v6614_v6, %v6650_v10  ;;  %v972_v13 = vsub.f32 %v6616_v16, %v6650_v10  ;;  %v974_v6 = vsub.f32 %v6626_v59, %v6654_v7 }
 0x86a   :  { %1006 = vperm.xlu0 %5444, %v988_v12  }
 0x86c   :  { %1029 = vperm.xlu1 %5445, %v967_v15  }
 0x86e   :  { %1034 = vperm.xlu0 %5444, %v968_v18  }
 0x8db   :  { %v992_v42 = vpop.permute.xlu0 %991 }
 0x8dc   :  { %v1009_v54 = vmul.f32 %v992_v42, %v969_v26  ;;  %v1010_v19 = vmul.f32 %v992_v42, %v970_v43  ;;  %v973_v42 = vsub.f32 %v6624_v52, %v6654_v7 }
 0x8de   :  { %v1037_v36 = vadd.f32 %v1020_v35, %v1009_v54  ;;  %v1038_v4 = vadd.f32 %v1020_v35, %v1010_v19  ;;  %v975_v19 = vsub.f32 %v6634_v61, %v6656_v31 }
 0x8e0   :  { %v1045_v9 = vmul.f32 0.5, %v1037_v36  ;;  %v1046_v62 = vmul.f32 0.5, %v1038_v4 }
 0x8e1   :  { %v997_v12 = vpop.permute.xlu1 %996 }
 0x8e2   :  { %5714 = vtanh.f32 %v1045_v9  ;;  %v1011_v15 = vmul.f32 %v997_v12, %v971_v2  ;;  %v1012_v50 = vmul.f32 %v997_v12, %v972_v13 }
 0x8e3   :  { %5716 = vtanh.f32 %v1046_v62 }
 0x8e4   :  { %v1039_v5 = vadd.f32 %v1025_v22, %v1011_v15  ;;  %v1040_v60 = vadd.f32 %v1025_v22, %v1012_v50  ;;  %v976_v22 = vsub.f32 %v6636_v3, %v6656_v31 }
 0x8e6   :  { %v1047_v18 = vmul.f32 0.5, %v1039_v5  ;;  %v1048_v26 = vmul.f32 0.5, %v1040_v60 }
 0x8e7   :  { %v1002_v43 = vpop.permute.xlu1 %1001 }
 0x8e8   :  { %5718 = vtanh.f32 %v1047_v18  ;;  %v1013_v16 = vmul.f32 %v1002_v43, %v973_v42  ;;  %v1014_v10 = vmul.f32 %v1002_v43, %v974_v6 }
 0x8e9   :  { %5720 = vtanh.f32 %v1048_v26  ;;  %v1007_v54 = vpop.permute.xlu0 %1006 }
 0x8ea   :  { %v1015_v62 = vmul.f32 %v1007_v54, %v975_v19  ;;  %v1016_v2 = vmul.f32 %v1007_v54, %v976_v22 }
 0x8eb   :  { %v1030_v35 = vpop.permute.xlu1 %1029 }
 0x8ec   :  { %v5715_v9 = vpop.eup %5714  ;;  %v1041_v13 = vadd.f32 %v1030_v35, %v1013_v16  ;;  %v1042_v12 = vadd.f32 %v1030_v35, %v1014_v10 }
 0x8ed   :  { %v5717_v52 = vpop.eup %5716  ;;  %v1035_v15 = vpop.permute.xlu0 %1034  ;;  %v1061_v50 = vadd.f32 1.0, %v5715_v9 }
 0x8ee   :  { %v1049_v59 = vmul.f32 0.5, %v1041_v13  ;;  %v1050_v7 = vmul.f32 0.5, %v1042_v12  ;;  %v1043_v18 = vadd.f32 %v1035_v15, %v1015_v62  ;;  %v1044_v26 = vadd.f32 %v1035_v15, %v1016_v2 }
 0x8ef   :  { %v1062_v43 = vadd.f32 1.0, %v5717_v52  ;;  %v1069_v3 = vmul.f32 0.5, %v1061_v50 }
 0x8f0   :  { %5722 = vtanh.f32 %v1049_v59  ;;  %v1051_v42 = vmul.f32 0.5, %v1043_v18  ;;  %v1052_v61 = vmul.f32 0.5, %v1044_v26 }
 0x8f1   :  { %5724 = vtanh.f32 %v1050_v7  ;;  %v1070_v6 = vmul.f32 0.5, %v1062_v43  ;;  %v6696_v35 = vmul.f32 %v1069_v3, %v1037_v36 }
 0x8f2   :  { %v5719_v31 = vpop.eup %5718  ;;  %5726 = vtanh.f32 %v1051_v42 }
 0x8f3   :  { %v5721_v19 = vpop.eup %5720  ;;  %5728 = vtanh.f32 %v1052_v61  ;;  %v1063_v54 = vadd.f32 1.0, %v5719_v31  ;;  %v6694_v10 = vmul.f32 %v1070_v6, %v1038_v4  ;;  %v1085_v15 = vsel %vm645_vm6, %v6696_v35, 0.0 }
 0x8f4   :  { %v1064_v16 = vadd.f32 1.0, %v5721_v19 }
 0x8f5   :  { %v1071_v22 = vmul.f32 0.5, %v1063_v54  ;;  %v1086_v52 = vsel %vm646_vm7, %v6694_v10, 0.0 }
 0x8f6   :  { %v1072_v9 = vmul.f32 0.5, %v1064_v16 }
 0x8f7   :  { %v6698_v62 = vmul.f32 %v1071_v22, %v1039_v5 }
 0x8f8   :  { %v6700_v2 = vmul.f32 %v1072_v9, %v1040_v60 }
 0x8f9   :  { %v1087_v4 = vsel %vm645_vm6, %v6698_v62, 0.0 }
 0x8fa   :  { %v5723_v50 = vpop.eup %5722  ;;  %v1088_v5 = vsel %vm646_vm7, %v6700_v2, 0.0  ;;  %v5506_v60 = vpack.i.bf16 %v1087_v4, %v1085_v15  ;;  %v5134_v59 = vpack.c.bf16 %v6700_v2, %v6694_v10 }
 0x8fb   :  { %v5725_v7 = vpop.eup %5724  ;;  %v1065_v43 = vadd.f32 1.0, %v5723_v50  ;;  %v5511_v42 = vpack.i.bf16 %v1088_v5, %v1086_v52 }
 0x8fc   :  { %v5727_v61 = vpop.eup %5726  ;;  %v1066_v6 = vadd.f32 1.0, %v5725_v7  ;;  %5507 = vrot.lane.b32.xlu1 %v5506_v60, %s6010_s20 }
 0x8fd   :  { %v5729_v3 = vpop.eup %5728  ;;  %v1073_v31 = vmul.f32 0.5, %v1065_v43  ;;  %v1067_v19 = vadd.f32 1.0, %v5727_v61  ;;  %5512 = vrot.lane.b32.xlu0 %v5511_v42, %s6010_s20  ;;  %v1145_v61 = vld [vmem:[%s8684_s3 + $0x40] sm:$0xff] }
 0x8fe   :  { %v1074_v54 = vmul.f32 0.5, %v1066_v6  ;;  %v1068_v16 = vadd.f32 1.0, %v5729_v3  ;;  %v1146_v6 = vld [vmem:[%s8684_s3 + $0x48] sm:$0xff] }
 0x8ff   :  { %v6720_v22 = vmul.f32 %v1073_v31, %v1041_v13  ;;  %v1075_v9 = vmul.f32 0.5, %v1067_v19 }
 0x900   :  { %v6722_v15 = vmul.f32 %v1074_v54, %v1042_v12  ;;  %v1076_v4 = vmul.f32 0.5, %v1068_v16 }
 0x901   :  { %v6724_v36 = vmul.f32 %v1075_v9, %v1043_v18  ;;  %v1089_v13 = vsel %vm645_vm6, %v6720_v22, 0.0 }
 0x902   :  { %v6726_v52 = vmul.f32 %v1076_v4, %v1044_v26  ;;  %v1090_v5 = vsel %vm646_vm7, %v6722_v15, 0.0 }
 0x903   :  { %v5143_v50 = vpack.c.bf16 %v6724_v36, %v6720_v22  ;;  %v1091_v12 = vsel %vm645_vm6, %v6724_v36, 0.0  ;;  %v8711_v22 = vmov 0.0  }
 0x904   :  { %v1092_v18 = vsel %vm646_vm7, %v6726_v52, 0.0  ;;  %v5516_v26 = vpack.i.bf16 %v1091_v12, %v1089_v13  ;;  %v5140_v7 = vpack.c.bf16 %v6726_v52, %v6722_v15 }
 0x905   :  { %v5521_v43 = vpack.i.bf16 %v1092_v18, %v1090_v5 }
 0x906   :  { %5517 = vrot.lane.b32.xlu1 %v5516_v26, %s6010_s20 }
 0x907   :  { %5522 = vrot.lane.b32.xlu0 %v5521_v43, %s6010_s20 }
 0x90a   :  { %5527 = vrot.lane.b32.xlu1 %v5506_v60, %s6011_s21  ;;  %v1147_v60 = vld [vmem:[%s8684_s3 + $0x50] sm:$0xff] }
 0x90b   :  { %5532 = vrot.lane.b32.xlu0 %v5511_v42, %s6011_s21  ;;  %v1148_v42 = vld [vmem:[%s8684_s3 + $0x58] sm:$0xff] }
 0x90e   :  { %5537 = vrot.lane.b32.xlu1 %v5516_v26, %s6011_s21 }
 0x90f   :  { %5542 = vrot.lane.b32.xlu0 %v5521_v43, %s6011_s21 }
 0x912   :  { %1151 = vperm.xlu1 %5445, %v1145_v61  }
 0x913   :  { %1156 = vperm.xlu0 %5444, %v1146_v6  }
 0x916   :  { %1161 = vperm.xlu1 %5445, %v1147_v60  }
 0x917   :  { %1166 = vperm.xlu0 %5444, %v1148_v42  }
 0x96e   :  { %v5508_v3 = vpop.permute.xlu1 %5507 }
 0x96f   :  { %v5513_v31 = vpop.permute.xlu0 %5512  ;;  %v5510_v19 = vunpack.i.h.bf16 %v5508_v3  ;;  %v5509_v54 = vunpack.i.l.bf16 %v5508_v3 }
 0x970   :  { %v5515_v16 = vunpack.i.h.bf16 %v5513_v31  ;;  %v5514_v9 = vunpack.i.l.bf16 %v5513_v31 }
 0x972   :  { %v1114_v15 = vsel %vm45_vm2, %v5515_v16, %v5510_v19  ;;  %v1113_v4 = vsel %vm45_vm2, %v5514_v9, %v5509_v54  ;;  %v1109_v52 = vsel %vm45_vm2, %v5509_v54, %v5514_v9  ;;  %v1110_v5 = vsel %vm45_vm2, %v5510_v19, %v5515_v16 }
 0x973   :  { %v5126_v13 = vpack.c.bf16 %v1110_v5, %v1109_v52  ;;  %v5128_v12 = vpack.c.bf16 %v1114_v15, %v1113_v4 }
 0x975   :  { %5127 = vmatprep.subr.bf16.mxu1 %v5126_v13 }
 0x976   :  { %5129 = vmatpush1.bf16.msra.mxu1 %v5128_v12 }
 0x978   :  { %v5518_v18 = vpop.permute.xlu1 %5517 }
 0x979   :  { %v5523_v26 = vpop.permute.xlu0 %5522  ;;  %v5520_v43 = vunpack.i.h.bf16 %v5518_v18  ;;  %v5519_v61 = vunpack.i.l.bf16 %v5518_v18 }
 0x97a   :  { %v5525_v6 = vunpack.i.h.bf16 %v5523_v26  ;;  %v5524_v60 = vunpack.i.l.bf16 %v5523_v26 }
 0x97c   :  { %v1116_v42 = vsel %vm45_vm2, %v5525_v6, %v5520_v43  ;;  %v1115_v3 = vsel %vm45_vm2, %v5524_v60, %v5519_v61  ;;  %v5528_v31 = vpop.permute.xlu1 %5527  ;;  %v1111_v19 = vsel %vm45_vm2, %v5519_v61, %v5524_v60  ;;  %v1112_v54 = vsel %vm45_vm2, %v5520_v43, %v5525_v6 }
 0x97d   :  { %v5533_v16 = vpop.permute.xlu0 %5532  ;;  %v5130_v9 = vpack.c.bf16 %v1112_v54, %v1111_v19  ;;  %v5132_v15 = vpack.c.bf16 %v1116_v42, %v1115_v3  ;;  %v5530_v5 = vunpack.i.h.bf16 %v5528_v31  ;;  %v5529_v13 = vunpack.i.l.bf16 %v5528_v31 }
 0x97e   :  { %v5535_v4 = vunpack.i.h.bf16 %v5533_v16  ;;  %v5534_v52 = vunpack.i.l.bf16 %v5533_v16  ;;  %v8710_v3 = vpack.c.bf16 %v6698_v62, %v6696_v35 }
 0x97f   :  { %5131 = vmatprep.subr.bf16.mxu1 %v5130_v9 }
 0x980   :  { %5133 = vmatpush1.bf16.msra.mxu1 %v5132_v15  ;;  %v5538_v18 = vpop.permute.xlu1 %5537  ;;  %v1137_v26 = vsel %vm52_vm3, %v5534_v52, %v5529_v13  ;;  %v1138_v43 = vsel %vm52_vm3, %v5535_v4, %v5530_v5  ;;  %v1134_v10 = vsel %vm52_vm3, %v5530_v5, %v5535_v4  ;;  %v1133_v2 = vsel %vm52_vm3, %v5529_v13, %v5534_v52 }
 0x981   :  { %v5543_v12 = vpop.permute.xlu0 %5542  ;;  %5136 = vmatprep.subr.msk.bf16.mxu1 %vm6565_vm8, %v5134_v59  ;;  %v5540_v60 = vunpack.i.h.bf16 %v5538_v18  ;;  %v5539_v42 = vunpack.i.l.bf16 %v5538_v18  ;;  %v5146_v59 = vpack.c.bf16 %v1138_v43, %v1137_v26  ;;  %v5148_v62 = vpack.c.bf16 %v1134_v10, %v1133_v2 }
 0x982   :  { %v5545_v61 = vunpack.i.h.bf16 %v5543_v12  ;;  %v5544_v6 = vunpack.i.l.bf16 %v5543_v12 }
 0x984   :  { %5139 = vmatpush1.bf16.msk.msra.mxu1 %vm6578_vm9, %v8710_v3  ;;  %v1139_v35 = vsel %vm52_vm3, %v5544_v6, %v5539_v42  ;;  %v1140_v24 = vsel %vm52_vm3, %v5545_v61, %v5540_v60  ;;  %v1135_v31 = vsel %vm52_vm3, %v5539_v42, %v5544_v6 }
 0x985   :  { %5142 = vmatprep.subr.msk.bf16.mxu1 %vm6565_vm8, %v5140_v7  ;;  %v1136_v7 = vsel %vm52_vm3, %v5540_v60, %v5545_v61  ;;  %v5150_v19 = vpack.c.bf16 %v1140_v24, %v1139_v35 }
 0x986   :  { %v5152_v36 = vpack.c.bf16 %v1136_v7, %v1135_v31 }
 0x988   :  { %5145 = vmatpush1.bf16.msk.msra.mxu1 %vm6578_vm9, %v5143_v50  ;;  %v1142_v50 = vld [vmem:[%s8685_s1 + $0x90] sm:$0xff] }
 0x989   :  { %5147 = vmatprep.subr.bf16.mxu1 %v5146_v59 }
 0x98c   :  { %5149 = vmatpush1.bf16.msra.mxu1 %v5148_v62 }
 0x98d   :  { %5151 = vmatprep.subr.bf16.mxu1 %v5150_v19 }
 0x990   :  { %5153 = vmatpush1.bf16.msra.mxu1 %v5152_v36 }
 0x991   :  { %5155 = vmatprep.subr.bf16.mxu1 %v6170_v23  ;;  %v1143_v23 = vld [vmem:[%s8685_s1 + $0xa0] sm:$0xff] }
 0x993   :  { %4638 = vmatmul.mubr.msk.f32.vlgmr.msra.gmra.mrb[12].mxu1 %vm1169_vm11, %v1141_v49 }
 0x994   :  { %1252 = vmatprep.mubr.f32.mxu1 %v8711_v22  ;;  %5157 = vmatpush1.bf16.msra.mxu1 %v6181_v27  ;;  %v1144_v27 = vld [vmem:[%s8685_s1 + $0xb0] sm:$0xff] }
 0x995   :  { %5159 = vmatprep.subr.bf16.mxu1 %v6183_v28  ;;  %v1152_v28 = vpop.permute.xlu1 %1151 }
 0x997   :  { %4639 = vmatmul.mubr.msk.f32.gmra.mrb[14].mxu1 %vm1169_vm11, %v1142_v50 }
 0x998   :  { %1258 = vmatprep.mubr.f32.mxu1 %v8711_v22  ;;  %5161 = vmatpush1.bf16.msra.mxu1 %v6199_v33 }
 0x999   :  { %5163 = vmatprep.subr.bf16.mxu1 %v6202_v34 }
 0x99b   :  { %4640 = vmatmul.mubr.msk.f32.gmra.mrb[16].mxu1 %vm1169_vm11, %v1143_v23 }
 0x99c   :  { %1264 = vmatprep.mubr.f32.mxu1 %v8711_v22  ;;  %5165 = vmatpush1.bf16.msra.mxu1 %v6217_v39 }
 0x99d   :  { %5167 = vmatprep.subr.bf16.mxu1 %v6220_v40 }
 0x99f   :  { %4641 = vmatmul.mubr.msk.f32.gmra.mrb[18].mxu1 %vm1169_vm11, %v1144_v27 }
 0x9a0   :  { %5169 = vmatpush1.bf16.msra.mxu1 %v6235_v45 }
 0x9a1   :  { %5171 = vmatprep.subr.bf16.mxu1 %v6238_v46  ;;  %v1157_v46 = vpop.permute.xlu0 %1156 }
 0x9a4   :  { %5173 = vmatpush1.bf16.msra.mxu1 %v6253_v51 }
 0x9a5   :  { %5175 = vmatprep.subr.bf16.mxu1 %v6256_v53  ;;  %v1167_v54 = vpop.permute.xlu0 %1166 }
 0x9a8   :  { %5177 = vmatpush1.bf16.msra.mxu1 %v6271_v57 }
 0x9a9   :  { %5179 = vmatprep.subr.bf16.mxu1 %v6274_v58 }
 0x9ac   :  { %5181 = vmatpush1.bf16.msra.mxu1 %v6289_v63 }
 0x9ad   :  { %5183 = vmatprep.subr.bf16.mxu1 %v6292_v0 }
 0x9b0   :  { %5185 = vmatpush1.bf16.msra.mxu1 %v6307_v11 }
 0x9b1   :  { %5187 = vmatprep.subr.bf16.mxu1 %v6310_v14 }
 0x9b4   :  { %5189 = vmatpush1.bf16.msra.mxu1 %v6325_v20 }
 0x9b5   :  { %5191 = vmatprep.subr.bf16.mxu1 %v6328_v21 }
 0x9b8   :  { %5193 = vmatpush1.bf16.msra.mxu1 %v6343_v29  ;;  %v1162_v29 = vpop.permute.xlu1 %1161 }
 0x9b9   :  { %5195 = vmatprep.subr.bf16.mxu1 %v6346_v30 }
 0x9bc   :  { %5197 = vmatpush1.bf16.msra.mxu1 %v6361_v37 }
 0x9bd   :  { %5199 = vmatprep.subr.bf16.mxu1 %v6364_v38 }
 0x9c0   :  { %5201 = vmatpush1.bf16.msra.mxu1 %v6379_v47 }
 0x9c1   :  { %5203 = vmatprep.subr.bf16.mxu1 %v6382_v48 }
 0x9c4   :  { %5205 = vmatpush1.bf16.msra.mxu1 %v6391_v55 }
 0x9c5   :  { %5207 = vmatprep.subr.bf16.mxu1 %v6453_v25 }
 0x9c8   :  { %5209 = vmatpush1.bf16.msra.mxu1 %v6461_v32 }
 0x9c9   :  { %5211 = vmatprep.subr.bf16.mxu1 %v6471_v41 }
 0x9cc   :  { %5213 = vmatpush1.bf16.msra.mxu1 %v6479_v44 }
 0x9cd   :  { %5215 = vmatprep.subr.bf16.mxu1 %v6489_v56 }
 0x9d0   :  { %5217 = vmatpush1.bf16.msra.mxu1 %v6497_v17 }
 0xa66   :  { %v1248_v33 = vpop.f32.mrb[12].mxu1 }
 0xa67   :  { %v1249_v34 = vadd.f32 %v1248_v33, %v1152_v28  ;;  %v1250_v39 = vpop.f32.mrb[13].mxu1 }
 0xa68   :  { %v1251_v40 = vadd.f32 %v1250_v39, %v1152_v28 }
 0xa69   :  { %v1271_v45 = vsel %vm645_vm6, %v1249_v34, 1e-06 }
 0xa6a   :  { %v1279_v51 = vmax.f32 %v1271_v45, 1e-06  ;;  %v1272_v53 = vsel %vm646_vm7, %v1251_v40, 1e-06  ;;  %v1254_v57 = vpop.f32.mrb[14].mxu1 }
 0xa6b   :  { %v1280_v58 = vmax.f32 %v1272_v53, 1e-06  ;;  %v1255_v63 = vadd.f32 %v1254_v57, %v1157_v46  ;;  %v1256_v0 = vpop.f32.mrb[15].mxu1 }
 0xa6c   :  { %v1287_v11 = vmul.f32 %v1279_v51, %v1279_v51  ;;  %v1257_v14 = vadd.f32 %v1256_v0, %v1157_v46 }
 0xa6d   :  { %v1288_v20 = vmul.f32 %v1280_v58, %v1280_v58  ;;  %v1273_v21 = vsel %vm645_vm6, %v1255_v63, 1e-06 }
 0xa6e   :  { %v1281_v30 = vmax.f32 %v1273_v21, 1e-06  ;;  %v1274_v37 = vsel %vm646_vm7, %v1257_v14, 1e-06  ;;  %v1260_v38 = vpop.f32.mrb[16].mxu1  ;;  %v1295_v32 = vmul.f32 %v1287_v11, %v1279_v51 }
 0xa6f   :  { %v1282_v47 = vmax.f32 %v1274_v37, 1e-06  ;;  %v1261_v48 = vadd.f32 %v1260_v38, %v1162_v29  ;;  %v1262_v55 = vpop.f32.mrb[17].mxu1  ;;  %v1296_v25 = vmul.f32 %v1288_v20, %v1280_v58 }
 0xa70   :  { %v1289_v41 = vmul.f32 %v1281_v30, %v1281_v30  ;;  %v1263_v44 = vadd.f32 %v1262_v55, %v1162_v29 }
 0xa71   :  { %v1290_v56 = vmul.f32 %v1282_v47, %v1282_v47  ;;  %v1275_v17 = vsel %vm645_vm6, %v1261_v48, 1e-06  ;;  %1367 = vmatprep.mubr.f32.mxu1 %v1296_v25 }
 0xa72   :  { %v1283_v16 = vmax.f32 %v1275_v17, 1e-06  ;;  %v1276_v9 = vsel %vm646_vm7, %v1263_v44, 1e-06  ;;  %v1266_v15 = vpop.f32.mrb[18].mxu1  ;;  %1368 = vmatmul.mubr.f32.vlgmr.msra.gmra.mrb[20].mxu1 %v1295_v32  ;;  %v1297_v26 = vmul.f32 %v1289_v41, %v1281_v30 }
 0xa73   :  { %v1284_v4 = vmax.f32 %v1276_v9, 1e-06  ;;  %v1267_v52 = vadd.f32 %v1266_v15, %v1167_v54  ;;  %v1268_v5 = vpop.f32.mrb[19].mxu1  ;;  %v1298_v13 = vmul.f32 %v1290_v56, %v1282_v47 }
 0xa74   :  { %v1291_v12 = vmul.f32 %v1283_v16, %v1283_v16  ;;  %v1269_v18 = vadd.f32 %v1268_v5, %v1167_v54 }
 0xa75   :  { %v1292_v43 = vmul.f32 %v1284_v4, %v1284_v4  ;;  %v1277_v61 = vsel %vm645_vm6, %v1267_v52, 1e-06  ;;  %1373 = vmatprep.mubr.f32.mxu1 %v1298_v13 }
 0xa76   :  { %v1285_v6 = vmax.f32 %v1277_v61, 1e-06  ;;  %v1278_v60 = vsel %vm646_vm7, %v1269_v18, 1e-06  ;;  %1374 = vmatmul.mubr.f32.gmra.mrb[22].mxu1 %v1297_v26  ;;  %v1299_v2 = vmul.f32 %v1291_v12, %v1283_v16 }
 0xa77   :  { %v1286_v42 = vmax.f32 %v1278_v60, 1e-06  ;;  %v1300_v3 = vmul.f32 %v1292_v43, %v1284_v4 }
 0xa78   :  { %v1293_v10 = vmul.f32 %v1285_v6, %v1285_v6 }
 0xa79   :  { %v1294_v59 = vmul.f32 %v1286_v42, %v1286_v42  ;;  %1379 = vmatprep.mubr.f32.mxu1 %v1300_v3 }
 0xa7a   :  { %1380 = vmatmul.mubr.f32.gmra.mrb[24].mxu1 %v1299_v2  ;;  %v1301_v24 = vmul.f32 %v1293_v10, %v1285_v6 }
 0xa7b   :  { %v1302_v35 = vmul.f32 %v1294_v59, %v1286_v42 }
 0xa7d   :  { %1385 = vmatprep.mubr.f32.mxu1 %v1302_v35 }
 0xa7e   :  { %1386 = vmatmul.mubr.f32.gmra.mrb[26].mxu1 %v1301_v24 }
 0xa7f   :  { %3255 = vmatprep.mubr.f32.mxu1 %v8711_v22 }
 0xb45   :  { %v1369_v62 = vpop.f32.mrb[20].mxu1 }
 0xb46   :  { %v1392_v7 = vmax.f32 %v1369_v62, 1e-30  ;;  %v1371_v31 = vpop.f32.mrb[21].mxu1 }
 0xb47   :  { %v1393_v19 = vmax.f32 %v1371_v31, 1e-30 }
 0xb48   :  { %5730 = vlog2.f32 %v1392_v7 }
 0xb49   :  { %5732 = vlog2.f32 %v1393_v19  ;;  %v1375_v36 = vpop.f32.mrb[22].mxu1 }
 0xb4a   :  { %v1394_v49 = vmax.f32 %v1375_v36, 1e-30  ;;  %v1377_v50 = vpop.f32.mrb[23].mxu1 }
 0xb4b   :  { %v1395_v23 = vmax.f32 %v1377_v50, 1e-30 }
 0xb4c   :  { %5734 = vlog2.f32 %v1394_v49 }
 0xb4d   :  { %5736 = vlog2.f32 %v1395_v23  ;;  %v1381_v27 = vpop.f32.mrb[24].mxu1 }
 0xb4e   :  { %v1396_v28 = vmax.f32 %v1381_v27, 1e-30  ;;  %v1383_v33 = vpop.f32.mrb[25].mxu1 }
 0xb4f   :  { %v1397_v34 = vmax.f32 %v1383_v33, 1e-30 }
 0xb50   :  { %5738 = vlog2.f32 %v1396_v28 }
 0xb51   :  { %5740 = vlog2.f32 %v1397_v34  ;;  %v1387_v39 = vpop.f32.mrb[26].mxu1 }
 0xb52   :  { %v5731_v40 = vpop.eup %5730  ;;  %v1398_v45 = vmax.f32 %v1387_v39, 1e-30  ;;  %v1389_v46 = vpop.f32.mrb[27].mxu1 }
 0xb53   :  { %v5733_v51 = vpop.eup %5732  ;;  %v1401_v53 = vmul.f32 0.6931472, %v5731_v40  ;;  %v1399_v57 = vmax.f32 %v1389_v46, 1e-30 }
 0xb54   :  { %v1403_v58 = vmul.f32 0.6931472, %v5733_v51  ;;  %5742 = vlog2.f32 %v1398_v45 }
 0xb55   :  { %v1416_v63 = vmul.f32 0.33333334, %v1401_v53  ;;  %5744 = vlog2.f32 %v1399_v57 }
 0xb56   :  { %v5735_v0 = vpop.eup %5734  ;;  %v1417_v11 = vmul.f32 0.33333334, %v1403_v58  ;;  %v1510_v58 = vld [vmem:[%s8684_s3 + $0x180] sm:$0xff] }
 0xb57   :  { %v5737_v14 = vpop.eup %5736  ;;  %v1424_v20 = vmul.f32 1.442695, %v1416_v63  ;;  %v1405_v21 = vmul.f32 0.6931472, %v5735_v0  ;;  %v1511_v63 = vld [vmem:[%s8684_s3 + $0x188] sm:$0xff] }
 0xb58   :  { %v1426_v29 = vmul.f32 1.442695, %v1417_v11  ;;  %v1407_v30 = vmul.f32 0.6931472, %v5737_v14 }
 0xb59   :  { %5746 = vpow2.f32 %v1424_v20  ;;  %v1418_v37 = vmul.f32 0.33333334, %v1405_v21 }
 0xb5a   :  { %v5739_v38 = vpop.eup %5738  ;;  %5748 = vpow2.f32 %v1426_v29  ;;  %v1419_v47 = vmul.f32 0.33333334, %v1407_v30 }
 0xb5b   :  { %v5741_v48 = vpop.eup %5740  ;;  %v1428_v55 = vmul.f32 1.442695, %v1418_v37  ;;  %v1409_v25 = vmul.f32 0.6931472, %v5739_v38 }
 0xb5c   :  { %v1430_v32 = vmul.f32 1.442695, %v1419_v47  ;;  %v1411_v41 = vmul.f32 0.6931472, %v5741_v48 }
 0xb5d   :  { %5750 = vpow2.f32 %v1428_v55  ;;  %v1420_v44 = vmul.f32 0.33333334, %v1409_v25 }
 0xb5e   :  { %v5743_v56 = vpop.eup %5742  ;;  %5752 = vpow2.f32 %v1430_v32  ;;  %v1421_v17 = vmul.f32 0.33333334, %v1411_v41 }
 0xb5f   :  { %v5745_v54 = vpop.eup %5744  ;;  %v1432_v16 = vmul.f32 1.442695, %v1420_v44  ;;  %v1413_v9 = vmul.f32 0.6931472, %v5743_v56 }
 0xb60   :  { %v1434_v15 = vmul.f32 1.442695, %v1421_v17  ;;  %v1415_v4 = vmul.f32 0.6931472, %v5745_v54 }
 0xb61   :  { %5754 = vpow2.f32 %v1432_v16  ;;  %v1422_v52 = vmul.f32 0.33333334, %v1413_v9 }
 0xb62   :  { %5756 = vpow2.f32 %v1434_v15  ;;  %v1423_v5 = vmul.f32 0.33333334, %v1415_v4 }
 0xb63   :  { %v6881_v13 = vpop.eup %5746  ;;  %v1436_v12 = vmul.f32 1.442695, %v1422_v52 }
 0xb64   :  { %v6883_v18 = vpop.eup %5748  ;;  %v1438_v26 = vmul.f32 1.442695, %v1423_v5  ;;  %v1446_v43 = vsel %vm1440_vm12, %v6881_v13, 0.0 }
 0xb65   :  { %5758 = vpow2.f32 %v1436_v12  ;;  %v1447_v61 = vsel %vm1441_vm13, %v6883_v18, 0.0  ;;  %v1466_v6 = vmul.f32 %v1446_v43, %v1446_v43 }
 0xb66   :  { %5760 = vpow2.f32 %v1438_v26  ;;  %v1454_v60 = vadd.f32 %v1447_v61, %v1446_v43  ;;  %v1467_v42 = vmul.f32 %v1447_v61, %v1447_v61 }
 0xb67   :  { %v6891_v3 = vpop.eup %5750 }
 0xb68   :  { %v6893_v10 = vpop.eup %5752  ;;  %1455 = vadd.xlane.f32.xlu1 %v1454_v60  ;;  %v1474_v2 = vadd.f32 %v1467_v42, %v1466_v6  ;;  %v1448_v59 = vsel %vm1440_vm12, %v6891_v3, 0.0  ;;  %v1506_v6 = vld [vmem:[%s8684_s3 + $0x160] sm:$0xff] }
 0xb69   :  { %v1449_v35 = vsel %vm1441_vm13, %v6893_v10, 0.0  ;;  %v1468_v24 = vmul.f32 %v1448_v59, %v1448_v59 }
 0xb6a   :  { %1475 = vadd.xlane.f32.xlu0 %v1474_v2  ;;  %v1469_v62 = vmul.f32 %v1449_v35, %v1449_v35  ;;  %v1457_v36 = vadd.f32 %v1449_v35, %v1448_v59 }
 0xb6b   :  { %v6901_v7 = vpop.eup %5754 }
 0xb6c   :  { %v6903_v31 = vpop.eup %5756  ;;  %v1477_v19 = vadd.f32 %v1469_v62, %v1468_v24  ;;  %v1450_v49 = vsel %vm1440_vm12, %v6901_v7, 0.0  ;;  %v1507_v24 = vld [vmem:[%s8684_s3 + $0x168] sm:$0xff] }
 0xb6d   :  { %v1451_v50 = vsel %vm1441_vm13, %v6903_v31, 0.0  ;;  %v1470_v34 = vmul.f32 %v1450_v49, %v1450_v49 }
 0xb6e   :  { %1478 = vadd.xlane.f32.xlu1 %v1477_v19  ;;  %1458 = vadd.xlane.f32.xlu0 %v1457_v36  ;;  %v1460_v28 = vadd.f32 %v1451_v50, %v1450_v49  ;;  %v1471_v39 = vmul.f32 %v1451_v50, %v1451_v50  ;;  %v1508_v36 = vld [vmem:[%s8684_s3 + $0x170] sm:$0xff]  ;;  %v1509_v50 = vld [vmem:[%s8684_s3 + $0x178] sm:$0xff] }
 0xb6f   :  { %v6911_v23 = vpop.eup %5758 }
 0xb70   :  { %v6913_v27 = vpop.eup %5760  ;;  %v1452_v33 = vsel %vm1440_vm12, %v6911_v23, 0.0  ;;  %v1480_v53 = vadd.f32 %v1471_v39, %v1470_v34  ;;  %v1512_v39 = vld [vmem:[%s8684_s3 + $0x190] sm:$0xff] }
 0xb71   :  { %v1453_v40 = vsel %vm1441_vm13, %v6913_v27, 0.0  ;;  %v1472_v46 = vmul.f32 %v1452_v33, %v1452_v33 }
 0xb72   :  { %1461 = vadd.xlane.f32.xlu0 %v1460_v28  ;;  %v1463_v45 = vadd.f32 %v1453_v40, %v1452_v33  ;;  %v1473_v51 = vmul.f32 %v1453_v40, %v1453_v40  ;;  %v1513_v40 = vld [vmem:[%s8684_s3 + $0x198] sm:$0xff] }
 0xb74   :  { %1464 = vadd.xlane.f32.xlu1 %v1463_v45  ;;  %v1483_v57 = vadd.f32 %v1473_v51, %v1472_v46 }
 0xb76   :  { %1481 = vadd.xlane.f32.xlu0 %v1480_v53 }
 0xb78   :  { %1484 = vadd.xlane.f32.xlu1 %v1483_v57 }
 0xb89   :  { %1564 = vperm.xlu1 %5445, %v1510_v58  }
 0xb8c   :  { %1569 = vperm.xlu0 %5444, %v1511_v63  }
 0xbf5   :  { %v1456_v0 = vpop.xlane.xlu1 %1455 }
 0xbf6   :  { %v1486_v11 = vmul.f32 0.033333335, %v1456_v0 }
 0xbf7   :  { %v1476_v14 = vpop.xlane.xlu0 %1475 }
 0xbf8   :  { %v1490_v20 = vmul.f32 0.033333335, %v1476_v14  ;;  %v1494_v21 = vmul.f32 %v1486_v11, %v1486_v11  ;;  %v1514_v46 = vsub.f32 %v6881_v13, %v1486_v11  ;;  %v1515_v51 = vsub.f32 %v6883_v18, %v1486_v11 }
 0xbfa   :  { %v1498_v29 = vsub.f32 %v1490_v20, %v1494_v21 }
 0xbfb   :  { %v1479_v30 = vpop.xlane.xlu1 %1478  ;;  %v1459_v37 = vpop.xlane.xlu0 %1458 }
 0xbfc   :  { %v1502_v38 = vmax.f32 %v1498_v29, 0.0  ;;  %v6927_v47 = vmul.f32 0.033333335, %v1459_v37  ;;  %v1491_v55 = vmul.f32 0.033333335, %v1479_v30 }
 0xbfe   :  { %v1522_v48 = vadd.f32 1e-05, %v1502_v38  ;;  %v1495_v25 = vmul.f32 %v6927_v47, %v6927_v47  ;;  %v1516_v29 = vsub.f32 %v6891_v3, %v6927_v47  ;;  %v1517_v30 = vsub.f32 %v6893_v10, %v6927_v47 }
 0xbff   :  { %v1462_v32 = vpop.xlane.xlu0 %1461 }
 0xc00   :  { %5762 = vrsqrt.f32 %v1522_v48  ;;  %v1499_v41 = vsub.f32 %v1491_v55, %v1495_v25  ;;  %v6931_v44 = vmul.f32 0.033333335, %v1462_v32 }
 0xc01   :  { %v1465_v56 = vpop.xlane.xlu1 %1464 }
 0xc02   :  { %v1503_v17 = vmax.f32 %v1499_v41, 0.0  ;;  %v6933_v54 = vmul.f32 0.033333335, %v1465_v56  ;;  %v1496_v15 = vmul.f32 %v6931_v44, %v6931_v44  ;;  %v1518_v32 = vsub.f32 %v6901_v7, %v6931_v44 }
 0xc03   :  { %v1482_v16 = vpop.xlane.xlu0 %1481  ;;  %v1519_v3 = vsub.f32 %v6903_v31, %v6931_v44 }
 0xc04   :  { %v1523_v9 = vadd.f32 1e-05, %v1503_v17  ;;  %v1492_v4 = vmul.f32 0.033333335, %v1482_v16  ;;  %v1497_v12 = vmul.f32 %v6933_v54, %v6933_v54  ;;  %v1520_v56 = vsub.f32 %v6911_v23, %v6933_v54 }
 0xc05   :  { %v1485_v52 = vpop.xlane.xlu1 %1484  ;;  %v1521_v17 = vsub.f32 %v6913_v27, %v6933_v54 }
 0xc06   :  { %5764 = vrsqrt.f32 %v1523_v9  ;;  %v1500_v5 = vsub.f32 %v1492_v4, %v1496_v15  ;;  %v1493_v26 = vmul.f32 0.033333335, %v1485_v52 }
 0xc08   :  { %v1504_v43 = vmax.f32 %v1500_v5, 0.0  ;;  %v1501_v61 = vsub.f32 %v1493_v26, %v1497_v12 }
 0xc09   :  { %v1565_v63 = vpop.permute.xlu1 %1564 }
 0xc0a   :  { %v5763_v60 = vpop.eup %5762  ;;  %v1524_v42 = vadd.f32 1e-05, %v1504_v43  ;;  %v1505_v2 = vmax.f32 %v1501_v61, 0.0 }
 0xc0b   :  { %v1530_v59 = vmul.f32 %v5763_v60, %v1506_v6  ;;  %v1570_v45 = vpop.permute.xlu0 %1569 }
 0xc0c   :  { %5766 = vrsqrt.f32 %v1524_v42  ;;  %v1525_v35 = vadd.f32 1e-05, %v1505_v2 }
 0xc0d   :  { %1536 = vperm.xlu0 %5444, %v1530_v59  }
 0xc0e   :  { %5768 = vrsqrt.f32 %v1525_v35 }
 0xc10   :  { %v5765_v62 = vpop.eup %5764 }
 0xc11   :  { %v1531_v19 = vmul.f32 %v5765_v62, %v1507_v24 }
 0xc13   :  { %1541 = vperm.xlu1 %5445, %v1531_v19  }
 0xc16   :  { %v5767_v49 = vpop.eup %5766 }
 0xc17   :  { %v1532_v28 = vmul.f32 %v5767_v49, %v1508_v36 }
 0xc18   :  { %v5769_v33 = vpop.eup %5768 }
 0xc19   :  { %1546 = vperm.xlu1 %5445, %v1532_v28   ;;  %v1533_v34 = vmul.f32 %v5769_v33, %v1509_v50 }
 0xc1b   :  { %1551 = vperm.xlu0 %5444, %v1533_v34  }
 0xc1d   :  { %1574 = vperm.xlu1 %5445, %v1512_v39  }
 0xc1f   :  { %1579 = vperm.xlu0 %5444, %v1513_v40  }
 0xc8c   :  { %v1537_v53 = vpop.permute.xlu0 %1536 }
 0xc8d   :  { %v1554_v57 = vmul.f32 %v1537_v53, %v1514_v46  ;;  %v1555_v58 = vmul.f32 %v1537_v53, %v1515_v51 }
 0xc8f   :  { %v1582_v0 = vadd.f32 %v1565_v63, %v1554_v57  ;;  %v1583_v14 = vadd.f32 %v1565_v63, %v1555_v58 }
 0xc91   :  { %v1590_v20 = vmul.f32 0.5, %v1582_v0  ;;  %v1591_v21 = vmul.f32 0.5, %v1583_v14 }
 0xc92   :  { %v1542_v37 = vpop.permute.xlu1 %1541 }
 0xc93   :  { %5770 = vtanh.f32 %v1590_v20  ;;  %v1556_v38 = vmul.f32 %v1542_v37, %v1516_v29  ;;  %v1557_v13 = vmul.f32 %v1542_v37, %v1517_v30 }
 0xc94   :  { %5772 = vtanh.f32 %v1591_v21 }
 0xc95   :  { %v1584_v18 = vadd.f32 %v1570_v45, %v1556_v38  ;;  %v1585_v11 = vadd.f32 %v1570_v45, %v1557_v13 }
 0xc97   :  { %v1592_v48 = vmul.f32 0.5, %v1584_v18  ;;  %v1593_v55 = vmul.f32 0.5, %v1585_v11 }
 0xc98   :  { %v1547_v25 = vpop.permute.xlu1 %1546 }
 0xc99   :  { %5774 = vtanh.f32 %v1592_v48  ;;  %v1558_v10 = vmul.f32 %v1547_v25, %v1518_v32  ;;  %v1559_v47 = vmul.f32 %v1547_v25, %v1519_v3 }
 0xc9a   :  { %5776 = vtanh.f32 %v1593_v55  ;;  %v1552_v41 = vpop.permute.xlu0 %1551 }
 0xc9b   :  { %v1560_v15 = vmul.f32 %v1552_v41, %v1520_v56  ;;  %v1561_v4 = vmul.f32 %v1552_v41, %v1521_v17  ;;  %v1694_v17 = vld [vmem:[%s8684_s3 + $0x60] sm:$0xff] }
 0xc9c   :  { %v1575_v16 = vpop.permute.xlu1 %1574 }
 0xc9d   :  { %v5771_v9 = vpop.eup %5770  ;;  %v1586_v52 = vadd.f32 %v1575_v16, %v1558_v10  ;;  %v1587_v5 = vadd.f32 %v1575_v16, %v1559_v47  ;;  %v1695_v16 = vld [vmem:[%s8684_s3 + $0x68] sm:$0xff] }
 0xc9e   :  { %v5773_v7 = vpop.eup %5772  ;;  %v1580_v12 = vpop.permute.xlu0 %1579  ;;  %v1606_v26 = vadd.f32 1.0, %v5771_v9  ;;  %v1696_v9 = vld [vmem:[%s8684_s3 + $0x70] sm:$0xff] }
 0xc9f   :  { %v1594_v31 = vmul.f32 0.5, %v1586_v52  ;;  %v1595_v44 = vmul.f32 0.5, %v1587_v5  ;;  %v1588_v43 = vadd.f32 %v1580_v12, %v1560_v15  ;;  %v1589_v61 = vadd.f32 %v1580_v12, %v1561_v4  ;;  %v1697_v15 = vld [vmem:[%s8684_s3 + $0x78] sm:$0xff]  ;;  %v1698_v4 = vld [vmem:[%s8684_s3 + $0x80] sm:$0xff] }
 0xca0   :  { %v1607_v6 = vadd.f32 1.0, %v5773_v7  ;;  %v1614_v27 = vmul.f32 0.5, %v1606_v26  ;;  %v1701_v7 = vld [vmem:[%s8684_s3 + $0x98] sm:$0xff] }
 0xca1   :  { %5778 = vtanh.f32 %v1594_v31  ;;  %v1596_v60 = vmul.f32 0.5, %v1588_v43  ;;  %v1597_v23 = vmul.f32 0.5, %v1589_v61 }
 0xca2   :  { %5780 = vtanh.f32 %v1595_v44  ;;  %v1615_v42 = vmul.f32 0.5, %v1607_v6  ;;  %v6973_v19 = vmul.f32 %v1614_v27, %v1582_v0 }
 0xca3   :  { %v5775_v54 = vpop.eup %5774  ;;  %5782 = vtanh.f32 %v1596_v60 }
 0xca4   :  { %v5777_v2 = vpop.eup %5776  ;;  %5784 = vtanh.f32 %v1597_v23  ;;  %v1608_v59 = vadd.f32 1.0, %v5775_v54  ;;  %v6971_v24 = vmul.f32 %v1615_v42, %v1583_v14  ;;  %v1630_v33 = vsel %vm1440_vm12, %v6973_v19, 0.0 }
 0xca5   :  { %v1609_v35 = vadd.f32 1.0, %v5777_v2 }
 0xca6   :  { %v1616_v62 = vmul.f32 0.5, %v1608_v59  ;;  %v1631_v28 = vsel %vm1441_vm13, %v6971_v24, 0.0 }
 0xca7   :  { %v1617_v36 = vmul.f32 0.5, %v1609_v35 }
 0xca8   :  { %v6975_v49 = vmul.f32 %v1616_v62, %v1584_v18 }
 0xca9   :  { %v6977_v50 = vmul.f32 %v1617_v36, %v1585_v11 }
 0xcaa   :  { %v1632_v34 = vsel %vm1440_vm12, %v6975_v49, 0.0  ;;  %v5229_v39 = vpack.c.bf16 %v6975_v49, %v6973_v19 }
 0xcab   :  { %v5779_v40 = vpop.eup %5778  ;;  %v1633_v45 = vsel %vm1441_vm13, %v6977_v50, 0.0  ;;  %v5546_v46 = vpack.i.bf16 %v1632_v34, %v1630_v33  ;;  %v5226_v51 = vpack.c.bf16 %v6977_v50, %v6971_v24 }
 0xcac   :  { %v5781_v53 = vpop.eup %5780  ;;  %v1610_v57 = vadd.f32 1.0, %v5779_v40  ;;  %v5551_v58 = vpack.i.bf16 %v1633_v45, %v1631_v28 }
 0xcad   :  { %v5783_v63 = vpop.eup %5782  ;;  %v1611_v0 = vadd.f32 1.0, %v5781_v53  ;;  %5547 = vrot.lane.b32.xlu1 %v5546_v46, %s6010_s20 }
 0xcae   :  { %v5785_v14 = vpop.eup %5784  ;;  %v1618_v20 = vmul.f32 0.5, %v1610_v57  ;;  %v1612_v21 = vadd.f32 1.0, %v5783_v63  ;;  %5552 = vrot.lane.b32.xlu0 %v5551_v58, %s6010_s20  ;;  %v2360_v63 = vld [vmem:[%s8685_s1 + $0x148] sm:$0xff] }
 0xcaf   :  { %v1619_v29 = vmul.f32 0.5, %v1611_v0  ;;  %v1613_v30 = vadd.f32 1.0, %v5785_v14 }
 0xcb0   :  { %v6997_v37 = vmul.f32 %v1618_v20, %v1586_v52  ;;  %v1620_v38 = vmul.f32 0.5, %v1612_v21  ;;  %v1699_v52 = vld [vmem:[%s8684_s3 + $0x88] sm:$0xff] }
 0xcb1   :  { %v6999_v13 = vmul.f32 %v1619_v29, %v1587_v5  ;;  %v1621_v18 = vmul.f32 0.5, %v1613_v30  ;;  %v1700_v5 = vld [vmem:[%s8684_s3 + $0x90] sm:$0xff] }
 0xcb2   :  { %v7001_v11 = vmul.f32 %v1620_v38, %v1588_v43  ;;  %v1634_v32 = vsel %vm1440_vm12, %v6997_v37, 0.0  ;;  %v2375_v38 = vld [vmem:[%s8684_s3 + $0xa0] sm:$0xff] }
 0xcb3   :  { %v7003_v48 = vmul.f32 %v1621_v18, %v1589_v61  ;;  %v1635_v25 = vsel %vm1441_vm13, %v6999_v13, 0.0 }
 0xcb4   :  { %v5235_v55 = vpack.c.bf16 %v7001_v11, %v6997_v37  ;;  %v1636_v3 = vsel %vm1440_vm12, %v7001_v11, 0.0  ;;  %v1686_v11 = vld [vmem:[%s8685_s1 + $0xc0] sm:$0xff] }
 0xcb5   :  { %v1637_v41 = vsel %vm1441_vm13, %v7003_v48, 0.0  ;;  %v5556_v10 = vpack.i.bf16 %v1636_v3, %v1634_v32  ;;  %v5232_v47 = vpack.c.bf16 %v7003_v48, %v6999_v13 }
 0xcb6   :  { %v5561_v56 = vpack.i.bf16 %v1637_v41, %v1635_v25 }
 0xcb7   :  { %5557 = vrot.lane.b32.xlu1 %v5556_v10, %s6010_s20 }
 0xcb8   :  { %5562 = vrot.lane.b32.xlu0 %v5561_v56, %s6010_s20 }
 0xcbb   :  { %5567 = vrot.lane.b32.xlu1 %v5546_v46, %s6011_s21 }
 0xcbc   :  { %5572 = vrot.lane.b32.xlu0 %v5551_v58, %s6011_s21 }
 0xcbf   :  { %5577 = vrot.lane.b32.xlu1 %v5556_v10, %s6011_s21 }
 0xcc0   :  { %5582 = vrot.lane.b32.xlu0 %v5561_v56, %s6011_s21  ;;  %v1688_v56 = vld [vmem:[%s8685_s1 + $0xe0] sm:$0xff] }
 0xcc3   :  { %1704 = vperm.xlu1 %5445, %v1694_v17   ;;  %v1689_v17 = vld [vmem:[%s8685_s1 + $0xf0] sm:$0xff] }
 0xcc4   :  { %1709 = vperm.xlu0 %5444, %v1695_v16   ;;  %v1690_v16 = vld [vmem:[%s8685_s1 + $0x100] sm:$0xff] }
 0xcc7   :  { %1714 = vperm.xlu1 %5445, %v1696_v9   ;;  %v1691_v9 = vld [vmem:[%s8685_s1 + $0x110] sm:$0xff] }
 0xcc8   :  { %1719 = vperm.xlu0 %5444, %v1697_v15   ;;  %v1692_v15 = vld [vmem:[%s8685_s1 + $0x120] sm:$0xff] }
 0xccb   :  { %1724 = vperm.xlu1 %5445, %v1698_v4   ;;  %v1693_v4 = vld [vmem:[%s8685_s1 + $0x130] sm:$0xff] }
 0xccc   :  { %1729 = vperm.xlu0 %5444, %v1699_v52  }
 0xccf   :  { %1734 = vperm.xlu1 %5445, %v1700_v5  }
 0xcd0   :  { %1739 = vperm.xlu0 %5444, %v1701_v7  }
 0xd1f   :  { %v5548_v12 = vpop.permute.xlu1 %5547 }
 0xd20   :  { %v5553_v26 = vpop.permute.xlu0 %5552  ;;  %v5550_v31 = vunpack.i.h.bf16 %v5548_v12  ;;  %v5549_v44 = vunpack.i.l.bf16 %v5548_v12 }
 0xd21   :  { %v5555_v43 = vunpack.i.h.bf16 %v5553_v26  ;;  %v5554_v61 = vunpack.i.l.bf16 %v5553_v26 }
 0xd23   :  { %v1659_v6 = vsel %vm45_vm2, %v5555_v43, %v5550_v31  ;;  %v1658_v60 = vsel %vm45_vm2, %v5554_v61, %v5549_v44  ;;  %v1654_v23 = vsel %vm45_vm2, %v5549_v44, %v5554_v61  ;;  %v1655_v42 = vsel %vm45_vm2, %v5550_v31, %v5555_v43 }
 0xd24   :  { %v5218_v27 = vpack.c.bf16 %v1655_v42, %v1654_v23  ;;  %v5220_v54 = vpack.c.bf16 %v1659_v6, %v1658_v60 }
 0xd26   :  { %5219 = vmatprep.subr.bf16.mxu0 %v5218_v27 }
 0xd27   :  { %5221 = vmatpush1.bf16.msra.mxu0 %v5220_v54 }
 0xd29   :  { %v5558_v2 = vpop.permute.xlu1 %5557 }
 0xd2a   :  { %v5563_v59 = vpop.permute.xlu0 %5562  ;;  %v5560_v35 = vunpack.i.h.bf16 %v5558_v2  ;;  %v5559_v62 = vunpack.i.l.bf16 %v5558_v2 }
 0xd2b   :  { %v5565_v36 = vunpack.i.h.bf16 %v5563_v59  ;;  %v5564_v28 = vunpack.i.l.bf16 %v5563_v59 }
 0xd2d   :  { %v1661_v33 = vsel %vm45_vm2, %v5565_v36, %v5560_v35  ;;  %v1660_v34 = vsel %vm45_vm2, %v5564_v28, %v5559_v62  ;;  %v5568_v40 = vpop.permute.xlu1 %5567  ;;  %v1656_v45 = vsel %vm45_vm2, %v5559_v62, %v5564_v28  ;;  %v1657_v46 = vsel %vm45_vm2, %v5560_v35, %v5565_v36  ;;  %vm7082_vm2 = vmpackc.low %vm1440_vm12, %vm1440_vm12 }
 0xd2e   :  { %v5573_v53 = vpop.permute.xlu0 %5572  ;;  %v5222_v57 = vpack.c.bf16 %v1657_v46, %v1656_v45  ;;  %v5224_v58 = vpack.c.bf16 %v1661_v33, %v1660_v34  ;;  %v5570_v20 = vunpack.i.h.bf16 %v5568_v40  ;;  %v5569_v21 = vunpack.i.l.bf16 %v5568_v40 }
 0xd2f   :  { %v5575_v0 = vunpack.i.h.bf16 %v5573_v53  ;;  %v5574_v14 = vunpack.i.l.bf16 %v5573_v53 }
 0xd30   :  { %5223 = vmatprep.subr.bf16.mxu0 %v5222_v57 }
 0xd31   :  { %5225 = vmatpush1.bf16.msra.mxu0 %v5224_v58  ;;  %v5578_v30 = vpop.permute.xlu1 %5577  ;;  %v1682_v18 = vsel %vm52_vm3, %v5574_v14, %v5569_v21  ;;  %v1683_v25 = vsel %vm52_vm3, %v5575_v0, %v5570_v20  ;;  %v1679_v50 = vsel %vm52_vm3, %v5570_v20, %v5575_v0 }
 0xd32   :  { %v5583_v29 = vpop.permute.xlu0 %5582  ;;  %5228 = vmatprep.subr.msk.bf16.mxu0 %vm7070_vm14, %v5226_v51  ;;  %v5580_v41 = vunpack.i.h.bf16 %v5578_v30  ;;  %v5579_v24 = vunpack.i.l.bf16 %v5578_v30  ;;  %v1678_v51 = vsel %vm52_vm3, %v5569_v21, %v5574_v14  ;;  %v5238_v10 = vpack.c.bf16 %v1683_v25, %v1682_v18 }
 0xd33   :  { %v5585_v32 = vunpack.i.h.bf16 %v5583_v29  ;;  %v5584_v3 = vunpack.i.l.bf16 %v5583_v29 }
 0xd35   :  { %5231 = vmatpush1.bf16.msk.msra.mxu0 %vm7082_vm2, %v5229_v39  ;;  %v1684_v19 = vsel %vm52_vm3, %v5584_v3, %v5579_v24  ;;  %v1685_v49 = vsel %vm52_vm3, %v5585_v32, %v5580_v41  ;;  %v5240_v39 = vpack.c.bf16 %v1679_v50, %v1678_v51  ;;  %v1681_v13 = vsel %vm52_vm3, %v5580_v41, %v5585_v32 }
 0xd36   :  { %5234 = vmatprep.subr.msk.bf16.mxu0 %vm7070_vm14, %v5232_v47  ;;  %v1680_v48 = vsel %vm52_vm3, %v5579_v24, %v5584_v3  ;;  %v5242_v47 = vpack.c.bf16 %v1685_v49, %v1684_v19 }
 0xd37   :  { %v5244_v37 = vpack.c.bf16 %v1681_v13, %v1680_v48 }
 0xd39   :  { %5237 = vmatpush1.bf16.msk.msra.mxu0 %vm7082_vm2, %v5235_v55  ;;  %v1687_v55 = vld [vmem:[%s8685_s1 + $0xd0] sm:$0xff] }
 0xd3a   :  { %5239 = vmatprep.subr.bf16.mxu0 %v5238_v10 }
 0xd3d   :  { %5241 = vmatpush1.bf16.msra.mxu0 %v5240_v39 }
 0xd3e   :  { %5243 = vmatprep.subr.bf16.mxu0 %v5242_v47 }
 0xd41   :  { %5245 = vmatpush1.bf16.msra.mxu0 %v5244_v37 }
 0xd42   :  { %v1705_v52 = vpop.permute.xlu1 %1704 }
 0xd43   :  { %v1710_v44 = vpop.permute.xlu0 %1709 }
 0xd44   :  { %4650 = vmatmul.mubr.msk.f32.vlgmr.msra.gmra.mrb[8].mxu0 %vm1169_vm11, %v1686_v11 }
 0xd45   :  { %1836 = vmatprep.mubr.f32.mxu0 %v8711_v22 }
 0xd46   :  { %v1715_v35 = vpop.permute.xlu1 %1714 }
 0xd47   :  { %v1720_v57 = vpop.permute.xlu0 %1719 }
 0xd48   :  { %4651 = vmatmul.mubr.msk.f32.gmra.mrb[10].mxu0 %vm1169_vm11, %v1687_v55 }
 0xd49   :  { %1842 = vmatprep.mubr.f32.mxu0 %v8711_v22 }
 0xd4a   :  { %v1725_v3 = vpop.permute.xlu1 %1724 }
 0xd4b   :  { %v1730_v48 = vpop.permute.xlu0 %1729 }
 0xd4c   :  { %4652 = vmatmul.mubr.msk.f32.gmra.mrb[12].mxu0 %vm1169_vm11, %v1688_v56 }
 0xd4d   :  { %1848 = vmatprep.mubr.f32.mxu0 %v8711_v22 }
 0xd50   :  { %4653 = vmatmul.mubr.msk.f32.gmra.mrb[14].mxu0 %vm1169_vm11, %v1689_v17 }
 0xd51   :  { %1854 = vmatprep.mubr.f32.mxu0 %v8711_v22 }
 0xd54   :  { %4654 = vmatmul.mubr.msk.f32.gmra.mrb[16].mxu0 %vm1169_vm11, %v1690_v16 }
 0xd55   :  { %1860 = vmatprep.mubr.f32.mxu0 %v8711_v22 }
 0xd58   :  { %4655 = vmatmul.mubr.msk.f32.gmra.mrb[18].mxu0 %vm1169_vm11, %v1691_v9 }
 0xd59   :  { %1866 = vmatprep.mubr.f32.mxu0 %v8711_v22 }
 0xd5c   :  { %4656 = vmatmul.mubr.msk.f32.gmra.mrb[20].mxu0 %vm1169_vm11, %v1692_v15 }
 0xd5d   :  { %1872 = vmatprep.mubr.f32.mxu0 %v8711_v22 }
 0xd60   :  { %4657 = vmatmul.mubr.msk.f32.gmra.mrb[22].mxu0 %vm1169_vm11, %v1693_v4 }
 0xd61   :  { %4674 = vmatprep.mubr.msk.f32.mxu0 %vm2423_vm15, %v2360_v63 }
 0xe17   :  { %v1832_v5 = vpop.f32.mrb[8].mxu0 }
 0xe18   :  { %v7156_v7 = vadd.f32 %v1832_v5, %v1705_v52  ;;  %v1834_v12 = vpop.f32.mrb[9].mxu0  ;;  %v1735_v5 = vpop.permute.xlu1 %1734 }
 0xe19   :  { %v7158_v26 = vadd.f32 %v1834_v12, %v1705_v52 }
 0xe1a   :  { %v1879_v31 = vsel %vm1440_vm12, %v7156_v7, 0.0 }
 0xe1b   :  { %v1919_v43 = vmul.f32 %v1879_v31, %v1879_v31  ;;  %v1880_v61 = vsel %vm1441_vm13, %v7158_v26, 0.0  ;;  %v1838_v6 = vpop.f32.mrb[10].mxu0 }
 0xe1c   :  { %v1895_v60 = vadd.f32 %v1880_v61, %v1879_v31  ;;  %v1920_v23 = vmul.f32 %v1880_v61, %v1880_v61  ;;  %v7166_v42 = vadd.f32 %v1838_v6, %v1710_v44  ;;  %v1840_v27 = vpop.f32.mrb[11].mxu0 }
 0xe1d   :  { %v7168_v54 = vadd.f32 %v1840_v27, %v1710_v44 }
 0xe1e   :  { %v1881_v2 = vsel %vm1440_vm12, %v7166_v42, 0.0  ;;  %1896 = vadd.xlane.f32.xlu1 %v1895_v60  ;;  %v1935_v59 = vadd.f32 %v1920_v23, %v1919_v43 }
 0xe1f   :  { %v1921_v62 = vmul.f32 %v1881_v2, %v1881_v2  ;;  %v1882_v36 = vsel %vm1441_vm13, %v7168_v54, 0.0  ;;  %v1844_v28 = vpop.f32.mrb[12].mxu0 }
 0xe20   :  { %v1922_v33 = vmul.f32 %v1882_v36, %v1882_v36  ;;  %v7176_v34 = vadd.f32 %v1844_v28, %v1715_v35  ;;  %v1846_v40 = vpop.f32.mrb[13].mxu0  ;;  %1936 = vadd.xlane.f32.xlu0 %v1935_v59  ;;  %v1898_v46 = vadd.f32 %v1882_v36, %v1881_v2  ;;  %v1740_v2 = vpop.permute.xlu0 %1739 }
 0xe21   :  { %v7178_v45 = vadd.f32 %v1846_v40, %v1715_v35 }
 0xe22   :  { %v1938_v53 = vadd.f32 %v1922_v33, %v1921_v62  ;;  %v1883_v58 = vsel %vm1440_vm12, %v7176_v34, 0.0 }
 0xe23   :  { %v1884_v0 = vsel %vm1441_vm13, %v7178_v45, 0.0  ;;  %v1850_v14 = vpop.f32.mrb[14].mxu0  ;;  %v1923_v30 = vmul.f32 %v1883_v58, %v1883_v58 }
 0xe24   :  { %v7186_v20 = vadd.f32 %v1850_v14, %v1720_v57  ;;  %v1852_v21 = vpop.f32.mrb[15].mxu0  ;;  %1899 = vadd.xlane.f32.xlu0 %v1898_v46  ;;  %1939 = vadd.xlane.f32.xlu1 %v1938_v53  ;;  %v1901_v18 = vadd.f32 %v1884_v0, %v1883_v58  ;;  %v1924_v25 = vmul.f32 %v1884_v0, %v1884_v0 }
 0xe25   :  { %v7188_v29 = vadd.f32 %v1852_v21, %v1720_v57 }
 0xe26   :  { %v1885_v32 = vsel %vm1440_vm12, %v7186_v20, 0.0  ;;  %v1941_v13 = vadd.f32 %v1924_v25, %v1923_v30 }
 0xe27   :  { %v1886_v41 = vsel %vm1441_vm13, %v7188_v29, 0.0  ;;  %v1856_v24 = vpop.f32.mrb[16].mxu0  ;;  %v1925_v50 = vmul.f32 %v1885_v32, %v1885_v32 }
 0xe28   :  { %v1904_v51 = vadd.f32 %v1886_v41, %v1885_v32  ;;  %v1926_v10 = vmul.f32 %v1886_v41, %v1886_v41  ;;  %v7196_v19 = vadd.f32 %v1856_v24, %v1725_v3  ;;  %v1858_v49 = vpop.f32.mrb[17].mxu0  ;;  %1902 = vadd.xlane.f32.xlu0 %v1901_v18  ;;  %v2007_v32 = vld [vmem:[%s8684_s3 + $0x1e0] sm:$0xff]  ;;  %v2009_v41 = vld [vmem:[%s8684_s3 + $0x1f0] sm:$0xff]  ;;  %v2010_v24 = vld [vmem:[%s8684_s3 + $0x1f8] sm:$0xff] }
 0xe29   :  { %v7198_v39 = vadd.f32 %v1858_v49, %v1725_v3  ;;  %v2008_v3 = vld [vmem:[%s8684_s3 + $0x1e8] sm:$0xff] }
 0xe2a   :  { %1905 = vadd.xlane.f32.xlu1 %v1904_v51  ;;  %v1887_v47 = vsel %vm1440_vm12, %v7196_v19, 0.0  ;;  %v1944_v17 = vadd.f32 %v1926_v10, %v1925_v50  ;;  %v2011_v50 = vld [vmem:[%s8684_s3 + $0x200] sm:$0xff]  ;;  %v2012_v51 = vld [vmem:[%s8684_s3 + $0x208] sm:$0xff] }
 0xe2b   :  { %v1888_v37 = vsel %vm1441_vm13, %v7198_v39, 0.0  ;;  %v1862_v11 = vpop.f32.mrb[18].mxu0  ;;  %v1927_v9 = vmul.f32 %v1887_v47, %v1887_v47 }
 0xe2c   :  { %v7206_v55 = vadd.f32 %v1862_v11, %v1730_v48  ;;  %v1864_v56 = vpop.f32.mrb[19].mxu0  ;;  %1942 = vadd.xlane.f32.xlu0 %v1941_v13  ;;  %v1907_v15 = vadd.f32 %v1888_v37, %v1887_v47  ;;  %v1928_v4 = vmul.f32 %v1888_v37, %v1888_v37 }
 0xe2d   :  { %v7208_v16 = vadd.f32 %v1864_v56, %v1730_v48 }
 0xe2e   :  { %v1889_v52 = vsel %vm1440_vm12, %v7206_v55, 0.0  ;;  %1945 = vadd.xlane.f32.xlu1 %v1944_v17  ;;  %v1947_v27 = vadd.f32 %v1928_v4, %v1927_v9 }
 0xe2f   :  { %v1890_v12 = vsel %vm1441_vm13, %v7208_v16, 0.0  ;;  %v1868_v31 = vpop.f32.mrb[20].mxu0  ;;  %v1929_v44 = vmul.f32 %v1889_v52, %v1889_v52 }
 0xe30   :  { %v1910_v43 = vadd.f32 %v1890_v12, %v1889_v52  ;;  %v1930_v61 = vmul.f32 %v1890_v12, %v1890_v12  ;;  %v7216_v6 = vadd.f32 %v1868_v31, %v1735_v5  ;;  %v1870_v60 = vpop.f32.mrb[21].mxu0  ;;  %1908 = vadd.xlane.f32.xlu0 %v1907_v15 }
 0xe31   :  { %v7218_v23 = vadd.f32 %v1870_v60, %v1735_v5 }
 0xe32   :  { %1911 = vadd.xlane.f32.xlu1 %v1910_v43  ;;  %v1891_v59 = vsel %vm1440_vm12, %v7216_v6, 0.0  ;;  %v1950_v33 = vadd.f32 %v1930_v61, %v1929_v44 }
 0xe33   :  { %v1892_v35 = vsel %vm1441_vm13, %v7218_v23, 0.0  ;;  %v1874_v62 = vpop.f32.mrb[22].mxu0  ;;  %v1931_v46 = vmul.f32 %v1891_v59, %v1891_v59 }
 0xe34   :  { %v7226_v36 = vadd.f32 %v1874_v62, %v1740_v2  ;;  %v1876_v28 = vpop.f32.mrb[23].mxu0  ;;  %1948 = vadd.xlane.f32.xlu0 %v1947_v27  ;;  %v1913_v53 = vadd.f32 %v1892_v35, %v1891_v59  ;;  %v1932_v57 = vmul.f32 %v1892_v35, %v1892_v35 }
 0xe35   :  { %v7228_v40 = vadd.f32 %v1876_v28, %v1740_v2 }
 0xe36   :  { %v1893_v58 = vsel %vm1440_vm12, %v7226_v36, 0.0  ;;  %1951 = vadd.xlane.f32.xlu1 %v1950_v33  ;;  %v1953_v18 = vadd.f32 %v1932_v57, %v1931_v46 }
 0xe37   :  { %v1894_v0 = vsel %vm1441_vm13, %v7228_v40, 0.0  ;;  %v1933_v14 = vmul.f32 %v1893_v58, %v1893_v58 }
 0xe38   :  { %v1916_v21 = vadd.f32 %v1894_v0, %v1893_v58  ;;  %v1934_v30 = vmul.f32 %v1894_v0, %v1894_v0  ;;  %1914 = vadd.xlane.f32.xlu0 %v1913_v53  ;;  %v1999_v0 = vld [vmem:[%s8684_s3 + $0x1a0] sm:$0xff] }
 0xe3a   :  { %1917 = vadd.xlane.f32.xlu1 %v1916_v21  ;;  %v1956_v25 = vadd.f32 %v1934_v30, %v1933_v14 }
 0xe3c   :  { %1954 = vadd.xlane.f32.xlu0 %v1953_v18 }
 0xe3e   :  { %1957 = vadd.xlane.f32.xlu1 %v1956_v25 }
 0xe4f   :  { %2113 = vperm.xlu1 %5445, %v2007_v32  }
 0xe52   :  { %2118 = vperm.xlu0 %5444, %v2008_v3  }
 0xe53   :  { %2123 = vperm.xlu1 %5445, %v2009_v41  }
 0xe56   :  { %2128 = vperm.xlu0 %5444, %v2010_v24  }
 0xe57   :  { %2133 = vperm.xlu1 %5445, %v2011_v50  }
 0xe5a   :  { %2138 = vperm.xlu0 %5444, %v2012_v51  }
 0xeab   :  { %v1897_v10 = vpop.xlane.xlu1 %1896 }
 0xeac   :  { %v7254_v49 = vmul.f32 0.033333335, %v1897_v10 }
 0xead   :  { %v1937_v13 = vpop.xlane.xlu0 %1936 }
 0xeae   :  { %v1967_v48 = vmul.f32 0.033333335, %v1937_v13  ;;  %v1975_v47 = vmul.f32 %v7254_v49, %v7254_v49 }
 0xeb0   :  { %v1983_v37 = vsub.f32 %v1967_v48, %v1975_v47  ;;  %v2000_v47 = vld [vmem:[%s8684_s3 + $0x1a8] sm:$0xff] }
 0xeb1   :  { %v1900_v11 = vpop.xlane.xlu0 %1899  ;;  %v1940_v56 = vpop.xlane.xlu1 %1939 }
 0xeb2   :  { %v1991_v17 = vmax.f32 %v1983_v37, 0.0  ;;  %v7258_v9 = vmul.f32 0.033333335, %v1900_v11  ;;  %v1968_v52 = vmul.f32 0.033333335, %v1940_v56 }
 0xeb4   :  { %v2031_v15 = vadd.f32 1e-05, %v1991_v17  ;;  %v1976_v4 = vmul.f32 %v7258_v9, %v7258_v9 }
 0xeb5   :  { %v1903_v5 = vpop.xlane.xlu0 %1902 }
 0xeb6   :  { %5786 = vrsqrt.f32 %v2031_v15  ;;  %v1984_v12 = vsub.f32 %v1968_v52, %v1976_v4  ;;  %v7262_v31 = vmul.f32 0.033333335, %v1903_v5 }
 0xeb7   :  { %v1906_v44 = vpop.xlane.xlu1 %1905 }
 0xeb8   :  { %v1992_v43 = vmax.f32 %v1984_v12, 0.0  ;;  %v7264_v61 = vmul.f32 0.033333335, %v1906_v44  ;;  %v1977_v2 = vmul.f32 %v7262_v31, %v7262_v31 }
 0xeb9   :  { %v1943_v60 = vpop.xlane.xlu0 %1942 }
 0xeba   :  { %v2032_v27 = vadd.f32 1e-05, %v1992_v43  ;;  %v1969_v59 = vmul.f32 0.033333335, %v1943_v60  ;;  %v1978_v28 = vmul.f32 %v7264_v61, %v7264_v61 }
 0xebb   :  { %v1946_v35 = vpop.xlane.xlu1 %1945 }
 0xebc   :  { %5788 = vrsqrt.f32 %v2032_v27  ;;  %v1985_v62 = vsub.f32 %v1969_v59, %v1977_v2  ;;  %v1970_v33 = vmul.f32 0.033333335, %v1946_v35  ;;  %v2001_v59 = vld [vmem:[%s8684_s3 + $0x1b0] sm:$0xff] }
 0xebd   :  { %v1909_v46 = vpop.xlane.xlu0 %1908 }
 0xebe   :  { %v1993_v53 = vmax.f32 %v1985_v62, 0.0  ;;  %v1986_v57 = vsub.f32 %v1970_v33, %v1978_v28  ;;  %v7270_v58 = vmul.f32 0.033333335, %v1909_v46 }
 0xebf   :  { %v1912_v14 = vpop.xlane.xlu1 %1911 }
 0xec0   :  { %v5787_v21 = vpop.eup %5786  ;;  %v2033_v30 = vadd.f32 1e-05, %v1993_v53  ;;  %v1994_v18 = vmax.f32 %v1986_v57, 0.0  ;;  %v7275_v25 = vmul.f32 0.033333335, %v1912_v14  ;;  %v1979_v24 = vmul.f32 %v7270_v58, %v7270_v58  ;;  %v2002_v53 = vld [vmem:[%s8684_s3 + $0x1b8] sm:$0xff] }
 0xec1   :  { %v1949_v32 = vpop.xlane.xlu0 %1948  ;;  %v2047_v3 = vmul.f32 %v5787_v21, %v1999_v0 }
 0xec2   :  { %5790 = vrsqrt.f32 %v2033_v30  ;;  %v2034_v41 = vadd.f32 1e-05, %v1994_v18  ;;  %v1971_v50 = vmul.f32 0.033333335, %v1949_v32  ;;  %v1980_v13 = vmul.f32 %v7275_v25, %v7275_v25 }
 0xec3   :  { %2057 = vperm.xlu0 %5444, %v2047_v3   ;;  %v1952_v51 = vpop.xlane.xlu1 %1951 }
 0xec4   :  { %5792 = vrsqrt.f32 %v2034_v41  ;;  %v1987_v10 = vsub.f32 %v1971_v50, %v1979_v24  ;;  %v1972_v48 = vmul.f32 0.033333335, %v1952_v51  ;;  %v2003_v41 = vld [vmem:[%s8684_s3 + $0x1c0] sm:$0xff]  ;;  %v2004_v50 = vld [vmem:[%s8684_s3 + $0x1c8] sm:$0xff] }
 0xec5   :  { %v1915_v37 = vpop.xlane.xlu0 %1914 }
 0xec6   :  { %v5789_v11 = vpop.eup %5788  ;;  %v1995_v56 = vmax.f32 %v1987_v10, 0.0  ;;  %v1988_v17 = vsub.f32 %v1972_v48, %v1980_v13  ;;  %v7284_v15 = vmul.f32 0.033333335, %v1915_v37  ;;  %v2005_v48 = vld [vmem:[%s8684_s3 + $0x1d0] sm:$0xff]  ;;  %v2006_v37 = vld [vmem:[%s8684_s3 + $0x1d8] sm:$0xff] }
 0xec7   :  { %v1918_v4 = vpop.xlane.xlu1 %1917  ;;  %v2048_v52 = vmul.f32 %v5789_v11, %v2000_v47 }
 0xec8   :  { %v2035_v5 = vadd.f32 1e-05, %v1995_v56  ;;  %v1996_v12 = vmax.f32 %v1988_v17, 0.0  ;;  %v7286_v44 = vmul.f32 0.033333335, %v1918_v4  ;;  %v1981_v27 = vmul.f32 %v7284_v15, %v7284_v15  ;;  %v2013_v4 = vld [vmem:[%s8684_s3 + $0x210] sm:$0xff] }
 0xec9   :  { %v1955_v43 = vpop.xlane.xlu0 %1954  ;;  %2062 = vperm.xlu1 %5445, %v2048_v52   ;;  %v2014_v52 = vld [vmem:[%s8684_s3 + $0x218] sm:$0xff] }
 0xeca   :  { %5794 = vrsqrt.f32 %v2035_v5  ;;  %v2036_v60 = vadd.f32 1e-05, %v1996_v12  ;;  %v1973_v2 = vmul.f32 0.033333335, %v1955_v43  ;;  %v1982_v33 = vmul.f32 %v7286_v44, %v7286_v44 }
 0xecb   :  { %v1958_v35 = vpop.xlane.xlu1 %1957 }
 0xecc   :  { %v5791_v62 = vpop.eup %5790  ;;  %5796 = vrsqrt.f32 %v2036_v60  ;;  %v1989_v28 = vsub.f32 %v1973_v2, %v1981_v27  ;;  %v1974_v46 = vmul.f32 0.033333335, %v1958_v35  ;;  %v2015_v2 = vsub.f32 %v7156_v7, %v7254_v49 }
 0xecd   :  { %v2049_v57 = vmul.f32 %v5791_v62, %v2001_v59  ;;  %v2016_v59 = vsub.f32 %v7158_v26, %v7254_v49 }
 0xece   :  { %v5793_v0 = vpop.eup %5792  ;;  %v1997_v14 = vmax.f32 %v1989_v28, 0.0  ;;  %v1990_v21 = vsub.f32 %v1974_v46, %v1982_v33 }
 0xecf   :  { %2067 = vperm.xlu1 %5445, %v2049_v57   ;;  %v2050_v30 = vmul.f32 %v5793_v0, %v2002_v53  ;;  %v2114_v12 = vpop.permute.xlu1 %2113 }
 0xed0   :  { %v2037_v18 = vadd.f32 1e-05, %v1997_v14  ;;  %v1998_v32 = vmax.f32 %v1990_v21, 0.0  ;;  %v2017_v14 = vsub.f32 %v7166_v42, %v7258_v9  ;;  %v2018_v21 = vsub.f32 %v7168_v54, %v7258_v9 }
 0xed1   :  { %2072 = vperm.xlu0 %5444, %v2050_v30   ;;  %v2119_v5 = vpop.permute.xlu0 %2118  ;;  %v2020_v42 = vsub.f32 %v7178_v45, %v7262_v31  ;;  %v2021_v9 = vsub.f32 %v7186_v20, %v7264_v61 }
 0xed2   :  { %5798 = vrsqrt.f32 %v2037_v18  ;;  %v2038_v3 = vadd.f32 1e-05, %v1998_v32 }
 0xed3   :  { %v2124_v60 = vpop.permute.xlu1 %2123 }
 0xed4   :  { %v5795_v24 = vpop.eup %5794  ;;  %5800 = vrsqrt.f32 %v2038_v3 }
 0xed5   :  { %v2051_v51 = vmul.f32 %v5795_v24, %v2003_v41  ;;  %v2129_v43 = vpop.permute.xlu0 %2128  ;;  %v2019_v41 = vsub.f32 %v7176_v34, %v7262_v31 }
 0xed6   :  { %v5797_v10 = vpop.eup %5796 }
 0xed7   :  { %2077 = vperm.xlu1 %5445, %v2051_v51   ;;  %v2052_v13 = vmul.f32 %v5797_v10, %v2004_v50  ;;  %v2134_v33 = vpop.permute.xlu1 %2133  ;;  %v2022_v51 = vsub.f32 %v7188_v29, %v7264_v61  ;;  %v2023_v29 = vsub.f32 %v7196_v19, %v7270_v58  ;;  %v2024_v61 = vsub.f32 %v7198_v39, %v7270_v58 }
 0xed8   :  { %v2026_v19 = vsub.f32 %v7208_v16, %v7275_v25 }
 0xed9   :  { %2082 = vperm.xlu0 %5444, %v2052_v13   ;;  %v7316_v27 = vpop.permute.xlu0 %2138 }
 0xedc   :  { %v5799_v47 = vpop.eup %5798 }
 0xedd   :  { %v2053_v11 = vmul.f32 %v5799_v47, %v2005_v48 }
 0xede   :  { %v5801_v56 = vpop.eup %5800 }
 0xedf   :  { %2087 = vperm.xlu1 %5445, %v2053_v11   ;;  %v2054_v17 = vmul.f32 %v5801_v56, %v2006_v37 }
 0xee1   :  { %2092 = vperm.xlu0 %5444, %v2054_v17  }
 0xee3   :  { %2143 = vperm.xlu1 %5445, %v2013_v4  }
 0xee5   :  { %2148 = vperm.xlu0 %5444, %v2014_v52  }
 0xf42   :  { %v2058_v35 = vpop.permute.xlu0 %2057 }
 0xf43   :  { %v2095_v62 = vmul.f32 %v2058_v35, %v2015_v2  ;;  %v2096_v28 = vmul.f32 %v2058_v35, %v2016_v59 }
 0xf45   :  { %v2151_v46 = vadd.f32 %v2114_v12, %v2095_v62  ;;  %v2152_v53 = vadd.f32 %v2114_v12, %v2096_v28 }
 0xf47   :  { %v2167_v57 = vmul.f32 0.5, %v2151_v46  ;;  %v2168_v0 = vmul.f32 0.5, %v2152_v53 }
 0xf48   :  { %v2063_v30 = vpop.permute.xlu1 %2062 }
 0xf49   :  { %5802 = vtanh.f32 %v2167_v57  ;;  %v2097_v7 = vmul.f32 %v2063_v30, %v2017_v14  ;;  %v2098_v18 = vmul.f32 %v2063_v30, %v2018_v21  ;;  %v2027_v30 = vsub.f32 %v7216_v6, %v7284_v15 }
 0xf4a   :  { %5804 = vtanh.f32 %v2168_v0 }
 0xf4b   :  { %v7326_v26 = vadd.f32 %v2119_v5, %v2097_v7  ;;  %v7328_v49 = vadd.f32 %v2119_v5, %v2098_v18  ;;  %v2028_v7 = vsub.f32 %v7218_v23, %v7284_v15  ;;  %v2030_v15 = vsub.f32 %v7228_v40, %v7286_v44 }
 0xf4d   :  { %v2169_v32 = vmul.f32 0.5, %v7326_v26  ;;  %v2170_v3 = vmul.f32 0.5, %v7328_v49 }
 0xf4e   :  { %v2068_v54 = vpop.permute.xlu1 %2067 }
 0xf4f   :  { %5806 = vtanh.f32 %v2169_v32  ;;  %v2099_v24 = vmul.f32 %v2068_v54, %v2019_v41  ;;  %v2100_v50 = vmul.f32 %v2068_v54, %v2020_v42  ;;  %v2029_v41 = vsub.f32 %v7226_v36, %v7286_v44 }
 0xf50   :  { %5808 = vtanh.f32 %v2170_v3  ;;  %v2073_v10 = vpop.permute.xlu0 %2072 }
 0xf51   :  { %v7340_v13 = vadd.f32 %v2124_v60, %v2099_v24  ;;  %v7342_v48 = vadd.f32 %v2124_v60, %v2100_v50  ;;  %v2101_v34 = vmul.f32 %v2073_v10, %v2021_v9  ;;  %v2102_v47 = vmul.f32 %v2073_v10, %v2022_v51 }
 0xf53   :  { %v5803_v37 = vpop.eup %5802  ;;  %v2171_v45 = vmul.f32 0.5, %v7340_v13  ;;  %v2172_v31 = vmul.f32 0.5, %v7342_v48  ;;  %v7346_v20 = vadd.f32 %v2129_v43, %v2101_v34  ;;  %v7348_v11 = vadd.f32 %v2129_v43, %v2102_v47 }
 0xf54   :  { %v5805_v56 = vpop.eup %5804  ;;  %v2199_v17 = vadd.f32 1.0, %v5803_v37  ;;  %v2025_v43 = vsub.f32 %v7206_v55, %v7275_v25 }
 0xf55   :  { %v2200_v4 = vadd.f32 1.0, %v5805_v56  ;;  %5810 = vtanh.f32 %v2171_v45  ;;  %v2173_v52 = vmul.f32 0.5, %v7346_v20  ;;  %v2174_v5 = vmul.f32 0.5, %v7348_v11 }
 0xf56   :  { %v2215_v12 = vmul.f32 0.5, %v2199_v17  ;;  %5812 = vtanh.f32 %v2172_v31  ;;  %v2078_v60 = vpop.permute.xlu1 %2077 }
 0xf57   :  { %v2216_v2 = vmul.f32 0.5, %v2200_v4  ;;  %5814 = vtanh.f32 %v2173_v52  ;;  %v2103_v59 = vmul.f32 %v2078_v60, %v2023_v29  ;;  %v2104_v35 = vmul.f32 %v2078_v60, %v2024_v61 }
 0xf58   :  { %5816 = vtanh.f32 %v2174_v5  ;;  %v2083_v39 = vpop.permute.xlu0 %2082  ;;  %v7360_v62 = vmul.f32 %v2215_v12, %v2151_v46 }
 0xf59   :  { %v5807_v58 = vpop.eup %5806  ;;  %v7362_v28 = vadd.f32 %v2134_v33, %v2103_v59  ;;  %v7364_v57 = vadd.f32 %v2134_v33, %v2104_v35  ;;  %v2105_v0 = vmul.f32 %v2083_v39, %v2025_v43  ;;  %v2106_v55 = vmul.f32 %v2083_v39, %v2026_v19 }
 0xf5a   :  { %v5809_v14 = vpop.eup %5808  ;;  %v2201_v21 = vadd.f32 1.0, %v5807_v58  ;;  %v2232_v18 = vmul.f32 %v2216_v2, %v2152_v53  ;;  %v2247_v6 = vsel %vm1440_vm12, %v7360_v62, 0.0 }
 0xf5b   :  { %v2202_v16 = vadd.f32 1.0, %v5809_v14  ;;  %v2175_v25 = vmul.f32 0.5, %v7362_v28  ;;  %v2176_v46 = vmul.f32 0.5, %v7364_v57  ;;  %v7373_v33 = vadd.f32 %v7316_v27, %v2105_v0 }
 0xf5c   :  { %v2217_v32 = vmul.f32 0.5, %v2201_v21  ;;  %v7376_v3 = vadd.f32 %v7316_v27, %v2106_v55  ;;  %v2248_v36 = vsel %vm1441_vm13, %v2232_v18, 0.0 }
 0xf5d   :  { %v2218_v23 = vmul.f32 0.5, %v2202_v16  ;;  %5818 = vtanh.f32 %v2175_v25  ;;  %v2177_v42 = vmul.f32 0.5, %v7373_v33 }
 0xf5e   :  { %v2233_v53 = vmul.f32 %v2217_v32, %v7326_v26  ;;  %5820 = vtanh.f32 %v2176_v46  ;;  %v2178_v27 = vmul.f32 0.5, %v7376_v3  ;;  %v2088_v54 = vpop.permute.xlu1 %2087 }
 0xf5f   :  { %v5811_v9 = vpop.eup %5810  ;;  %v2234_v24 = vmul.f32 %v2218_v23, %v7328_v49  ;;  %v2107_v50 = vmul.f32 %v2088_v54, %v2027_v30  ;;  %v2108_v51 = vmul.f32 %v2088_v54, %v2028_v7  ;;  %5822 = vtanh.f32 %v2177_v42 }
 0xf60   :  { %v5813_v10 = vpop.eup %5812  ;;  %v2249_v40 = vsel %vm1440_vm12, %v2233_v53, 0.0  ;;  %v5249_v44 = vpack.c.bf16 %v2233_v53, %v7360_v62  ;;  %v2203_v26 = vadd.f32 1.0, %v5811_v9  ;;  %v2093_v34 = vpop.permute.xlu0 %2092  ;;  %5824 = vtanh.f32 %v2178_v27 }
 0xf61   :  { %v5815_v47 = vpop.eup %5814  ;;  %v2250_v37 = vsel %vm1441_vm13, %v2234_v24, 0.0  ;;  %v2204_v45 = vadd.f32 1.0, %v5813_v10  ;;  %v2109_v31 = vmul.f32 %v2093_v34, %v2029_v41  ;;  %v2110_v29 = vmul.f32 %v2093_v34, %v2030_v15 }
 0xf62   :  { %v5817_v56 = vpop.eup %5816  ;;  %v2219_v49 = vmul.f32 0.5, %v2203_v26  ;;  %v2205_v17 = vadd.f32 1.0, %v5815_v47  ;;  %v5246_v61 = vpack.c.bf16 %v2234_v24, %v2232_v18  ;;  %v2144_v4 = vpop.permute.xlu1 %2143  ;;  %v7403_v59 = vpack.i.bf16 %v2250_v37, %v2248_v36 }
 0xf63   :  { %v2220_v52 = vmul.f32 0.5, %v2204_v45  ;;  %v2206_v5 = vadd.f32 1.0, %v5817_v56  ;;  %v7396_v12 = vadd.f32 %v2144_v4, %v2107_v50  ;;  %v7398_v60 = vadd.f32 %v2144_v4, %v2108_v51 }
 0xf64   :  { %v2235_v43 = vmul.f32 %v2219_v49, %v7340_v13  ;;  %v2221_v2 = vmul.f32 0.5, %v2205_v17  ;;  %5248 = vmatprep.subr.msk.bf16.mxu0 %vm7070_vm14, %v5246_v61  ;;  %v7405_v35 = vpack.i.bf16 %v2249_v40, %v2247_v6  ;;  %v2149_v19 = vpop.permute.xlu0 %2148  ;;  %5592 = vrot.lane.b32.xlu0 %v7403_v59, %s6011_s21 }
 0xf65   :  { %v2236_v39 = vmul.f32 %v2220_v52, %v7342_v48  ;;  %v2222_v58 = vmul.f32 0.5, %v2206_v5  ;;  %v2179_v62 = vmul.f32 0.5, %v7396_v12  ;;  %v2180_v0 = vmul.f32 0.5, %v7398_v60  ;;  %5251 = vmatpush1.bf16.msk.msra.mxu0 %vm7082_vm2, %v5249_v44 }
 0xf66   :  { %v2251_v13 = vsel %vm1440_vm12, %v2235_v43, 0.0  ;;  %v2237_v14 = vmul.f32 %v2221_v2, %v7346_v20  ;;  %5587 = vrot.lane.b32.xlu1 %v7405_v35, %s6011_s21  ;;  %v2165_v48 = vadd.f32 %v2149_v19, %v2109_v31  ;;  %v2166_v21 = vadd.f32 %v2149_v19, %v2110_v29 }
 0xf67   :  { %v5819_v55 = vpop.eup %5818  ;;  %v2252_v30 = vsel %vm1441_vm13, %v2236_v39, 0.0  ;;  %v2238_v7 = vmul.f32 %v2222_v58, %v7348_v11  ;;  %5826 = vtanh.f32 %v2179_v62 }
 0xf68   :  { %v5821_v18 = vpop.eup %5820  ;;  %v2253_v16 = vsel %vm1440_vm12, %v2237_v14, 0.0  ;;  %v5255_v20 = vpack.c.bf16 %v2237_v14, %v2235_v43  ;;  %v2207_v25 = vadd.f32 1.0, %v5819_v55  ;;  %5828 = vtanh.f32 %v2180_v0 }
 0xf69   :  { %v2254_v46 = vsel %vm1441_vm13, %v2238_v7, 0.0  ;;  %v2208_v32 = vadd.f32 1.0, %v5821_v18  ;;  %v2181_v41 = vmul.f32 0.5, %v2165_v48  ;;  %v2182_v6 = vmul.f32 0.5, %v2166_v21  ;;  %v5823_v23 = vpop.eup %5822  ;;  %v2380_v18 = vld [vmem:[%s8684_s3 + $0xc8] sm:$0xff] }
 0xf6a   :  { %v2223_v15 = vmul.f32 0.5, %v2207_v25  ;;  %v5252_v53 = vpack.c.bf16 %v2238_v7, %v2236_v39  ;;  %v5601_v42 = vpack.i.bf16 %v2254_v46, %v2252_v30  ;;  %v5596_v27 = vpack.i.bf16 %v2253_v16, %v2251_v13  ;;  %v5825_v11 = vpop.eup %5824  ;;  %v2381_v16 = vld [vmem:[%s8684_s3 + $0xd0] sm:$0xff] }
 0xf6b   :  { %v2224_v54 = vmul.f32 0.5, %v2208_v32  ;;  %v2209_v9 = vadd.f32 1.0, %v5823_v23  ;;  %5830 = vtanh.f32 %v2181_v41  ;;  %v2210_v36 = vadd.f32 1.0, %v5825_v11 }
 0xf6c   :  { %5832 = vtanh.f32 %v2182_v6  ;;  %5254 = vmatprep.subr.msk.bf16.mxu0 %vm7070_vm14, %v5252_v53  ;;  %5602 = vrot.lane.b32.xlu0 %v5601_v42, %s6011_s21  ;;  %v2239_v24 = vmul.f32 %v2223_v15, %v7362_v28 }
 0xf6d   :  { %v2240_v50 = vmul.f32 %v2224_v54, %v7364_v57  ;;  %v2225_v51 = vmul.f32 0.5, %v2209_v9  ;;  %5257 = vmatpush1.bf16.msk.msra.mxu0 %vm7082_vm2, %v5255_v20  ;;  %5597 = vrot.lane.b32.xlu1 %v5596_v27, %s6011_s21  ;;  %v2226_v10 = vmul.f32 0.5, %v2210_v36  ;;  %v2382_v20 = vld [vmem:[%s8684_s3 + $0xd8] sm:$0xff] }
 0xf6e   :  { %v2255_v34 = vsel %vm1440_vm12, %v2239_v24, 0.0 }
 0xf6f   :  { %v2241_v40 = vmul.f32 %v2225_v51, %v7373_v33  ;;  %v2242_v44 = vmul.f32 %v2226_v10, %v7376_v3  ;;  %v2256_v28 = vsel %vm1441_vm13, %v2240_v50, 0.0 }
 0xf71   :  { %v5827_v26 = vpop.eup %5826  ;;  %v2257_v57 = vsel %vm1440_vm12, %v2241_v40, 0.0  ;;  %v5261_v47 = vpack.c.bf16 %v2241_v40, %v2239_v24  ;;  %v2258_v45 = vsel %vm1441_vm13, %v2242_v44, 0.0  ;;  %v5258_v56 = vpack.c.bf16 %v2242_v44, %v2240_v50 }
 0xf72   :  { %v5829_v37 = vpop.eup %5828  ;;  %v2211_v31 = vadd.f32 1.0, %v5827_v26  ;;  %v5606_v33 = vpack.i.bf16 %v2257_v57, %v2255_v34  ;;  %v5611_v3 = vpack.i.bf16 %v2258_v45, %v2256_v28 }
 0xf73   :  { %v2212_v49 = vadd.f32 1.0, %v5829_v37  ;;  %5260 = vmatprep.subr.msk.bf16.mxu0 %vm7070_vm14, %v5258_v56 }
 0xf74   :  { %v2227_v17 = vmul.f32 0.5, %v2211_v31  ;;  %5607 = vrot.lane.b32.xlu1 %v5606_v33, %s6011_s21  ;;  %5612 = vrot.lane.b32.xlu0 %v5611_v3, %s6011_s21 }
 0xf75   :  { %v5831_v29 = vpop.eup %5830  ;;  %v2228_v61 = vmul.f32 0.5, %v2212_v49  ;;  %5263 = vmatpush1.bf16.msk.msra.mxu0 %vm7082_vm2, %v5261_v47 }
 0xf76   :  { %v5833_v4 = vpop.eup %5832  ;;  %v2213_v52 = vadd.f32 1.0, %v5831_v29  ;;  %v2243_v43 = vmul.f32 %v2227_v17, %v7396_v12 }
 0xf77   :  { %v2214_v5 = vadd.f32 1.0, %v5833_v4  ;;  %v2244_v2 = vmul.f32 %v2228_v61, %v7398_v60 }
 0xf78   :  { %v2229_v19 = vmul.f32 0.5, %v2213_v52  ;;  %v2259_v0 = vsel %vm1440_vm12, %v2243_v43, 0.0 }
 0xf79   :  { %v2230_v39 = vmul.f32 0.5, %v2214_v5  ;;  %v2260_v13 = vsel %vm1441_vm13, %v2244_v2, 0.0 }
 0xf7a   :  { %v2245_v58 = vmul.f32 %v2229_v19, %v2165_v48  ;;  %v2378_v48 = vld [vmem:[%s8684_s3 + $0xb8] sm:$0xff] }
 0xf7b   :  { %v2246_v62 = vmul.f32 %v2230_v39, %v2166_v21  ;;  %v2379_v21 = vld [vmem:[%s8684_s3 + $0xc0] sm:$0xff] }
 0xf7c   :  { %v2261_v14 = vsel %vm1440_vm12, %v2245_v58, 0.0  ;;  %v5267_v55 = vpack.c.bf16 %v2245_v58, %v2243_v43 }
 0xf7d   :  { %v2262_v30 = vsel %vm1441_vm13, %v2246_v62, 0.0  ;;  %v5264_v12 = vpack.c.bf16 %v2246_v62, %v2244_v2  ;;  %v5656_v7 = vpack.i.bf16 %v2261_v14, %v2259_v0 }
 0xf7e   :  { %v5661_v60 = vpack.i.bf16 %v2262_v30, %v2260_v13 }
 0xf7f   :  { %5266 = vmatprep.subr.msk.bf16.mxu0 %vm7070_vm14, %v5264_v12  ;;  %5617 = vrot.lane.b32.xlu1 %v5656_v7, %s6011_s21 }
 0xf80   :  { %5627 = vrot.lane.b32.xlu0 %v5661_v60, %s6011_s21  ;;  %5269 = vmatpush1.bf16.msk.msra.mxu0 %vm7082_vm2, %v5267_v55 }
 0xf83   :  { %5622 = vrot.lane.b32.xlu1 %v7405_v35, %s6012_s0  ;;  %v2377_v35 = vld [vmem:[%s8684_s3 + $0xb0] sm:$0xff] }
 0xf84   :  { %5632 = vrot.lane.b32.xlu0 %v7403_v59, %s6012_s0  ;;  %v2376_v59 = vld [vmem:[%s8684_s3 + $0xa8] sm:$0xff] }
 0xf87   :  { %5637 = vrot.lane.b32.xlu1 %v5596_v27, %s6012_s0 }
 0xf88   :  { %5642 = vrot.lane.b32.xlu0 %v5601_v42, %s6012_s0 }
 0xf8b   :  { %5647 = vrot.lane.b32.xlu1 %v5606_v33, %s6012_s0 }
 0xf8c   :  { %5652 = vrot.lane.b32.xlu0 %v5611_v3, %s6012_s0 }
 0xf8f   :  { %5657 = vrot.lane.b32.xlu1 %v5656_v7, %s6012_s0 }
 0xf90   :  { %5662 = vrot.lane.b32.xlu0 %v5661_v60, %s6012_s0 }
 0xf93   :  { %2385 = vperm.xlu1 %5445, %v2375_v38  }
 0xf94   :  { %2390 = vperm.xlu0 %5444, %v2376_v59  }
 0xf97   :  { %2395 = vperm.xlu1 %5445, %v2377_v35  }
 0xf98   :  { %2400 = vperm.xlu0 %5444, %v2378_v48  }
 0xf9b   :  { %2405 = vperm.xlu1 %5445, %v2379_v21  }
 0xf9c   :  { %2410 = vperm.xlu0 %5444, %v2380_v18  }
 0xf9f   :  { %2415 = vperm.xlu1 %5445, %v2381_v16  }
 0xfa0   :  { %2420 = vperm.xlu0 %5444, %v2382_v20  }
 0xfd6   :  { %v5593_v25 = vpop.permute.xlu0 %5592 }
 0xfd7   :  { %v5595_v32 = vunpack.i.h.bf16 %v5593_v25  ;;  %v5594_v41 = vunpack.i.l.bf16 %v5593_v25 }
 0xfd8   :  { %v5588_v46 = vpop.permute.xlu1 %5587 }
 0xfd9   :  { %v5590_v6 = vunpack.i.h.bf16 %v5588_v46  ;;  %v5589_v23 = vunpack.i.l.bf16 %v5588_v46 }
 0xfdb   :  { %v2296_v15 = vsel %vm52_vm3, %v5590_v6, %v5595_v32  ;;  %v2295_v53 = vsel %vm52_vm3, %v5589_v23, %v5594_v41  ;;  %v2303_v42 = vsel %vm52_vm3, %v5594_v41, %v5589_v23  ;;  %v2304_v27 = vsel %vm52_vm3, %v5595_v32, %v5590_v6 }
 0xfdc   :  { %v5272_v11 = vpack.c.bf16 %v2296_v15, %v2295_v53  ;;  %v5270_v54 = vpack.c.bf16 %v2304_v27, %v2303_v42 }
 0xfde   :  { %5271 = vmatprep.subr.bf16.mxu0 %v5270_v54  ;;  %v5603_v9 = vpop.permute.xlu0 %5602 }
 0xfdf   :  { %5273 = vmatpush1.bf16.msra.mxu0 %v5272_v11  ;;  %v5605_v36 = vunpack.i.h.bf16 %v5603_v9  ;;  %v5604_v24 = vunpack.i.l.bf16 %v5603_v9  ;;  %v5598_v50 = vpop.permute.xlu1 %5597 }
 0xfe0   :  { %v5600_v51 = vunpack.i.h.bf16 %v5598_v50  ;;  %v5599_v10 = vunpack.i.l.bf16 %v5598_v50 }
 0xfe2   :  { %v2298_v40 = vsel %vm52_vm3, %v5600_v51, %v5605_v36  ;;  %v2297_v44 = vsel %vm52_vm3, %v5599_v10, %v5604_v24  ;;  %v2305_v26 = vsel %vm52_vm3, %v5604_v24, %v5599_v10  ;;  %v2306_v34 = vsel %vm52_vm3, %v5605_v36, %v5600_v51 }
 0xfe3   :  { %v5276_v28 = vpack.c.bf16 %v2298_v40, %v2297_v44  ;;  %v5274_v57 = vpack.c.bf16 %v2306_v34, %v2305_v26 }
 0xfe5   :  { %5275 = vmatprep.subr.bf16.mxu0 %v5274_v57 }
 0xfe6   :  { %5277 = vmatpush1.bf16.msra.mxu0 %v5276_v28  ;;  %v5608_v47 = vpop.permute.xlu1 %5607  ;;  %v5613_v37 = vpop.permute.xlu0 %5612 }
 0xfe7   :  { %v5610_v45 = vunpack.i.h.bf16 %v5608_v47  ;;  %v5609_v31 = vunpack.i.l.bf16 %v5608_v47  ;;  %v5615_v56 = vunpack.i.h.bf16 %v5613_v37  ;;  %v5614_v33 = vunpack.i.l.bf16 %v5613_v37 }
 0xfe9   :  { %v2300_v49 = vsel %vm52_vm3, %v5610_v45, %v5615_v56  ;;  %v2299_v3 = vsel %vm52_vm3, %v5609_v31, %v5614_v33  ;;  %v2307_v17 = vsel %vm52_vm3, %v5614_v33, %v5609_v31  ;;  %v2308_v29 = vsel %vm52_vm3, %v5615_v56, %v5610_v45 }
 0xfea   :  { %v5278_v61 = vpack.c.bf16 %v2308_v29, %v2307_v17  ;;  %v5280_v4 = vpack.c.bf16 %v2300_v49, %v2299_v3 }
 0xfec   :  { %5279 = vmatprep.subr.bf16.mxu0 %v5278_v61 }
 0xfed   :  { %5281 = vmatpush1.bf16.msra.mxu0 %v5280_v4  ;;  %v2359_v4 = vld [vmem:[%s8685_s1 + $0x140] sm:$0xff] }
 0xff1   :  { %v5618_v52 = vpop.permute.xlu1 %5617 }
 0xff2   :  { %v5628_v5 = vpop.permute.xlu0 %5627  ;;  %v5620_v43 = vunpack.i.h.bf16 %v5618_v52  ;;  %v5619_v2 = vunpack.i.l.bf16 %v5618_v52  ;;  %v2362_v52 = vld [vmem:[%s8685_s1 + $0x158] sm:$0xff] }
 0xff3   :  { %v5630_v19 = vunpack.i.h.bf16 %v5628_v5  ;;  %v5629_v39 = vunpack.i.l.bf16 %v5628_v5  ;;  %v2361_v5 = vld [vmem:[%s8685_s1 + $0x150] sm:$0xff] }
 0xff5   :  { %v2302_v58 = vsel %vm52_vm3, %v5620_v43, %v5630_v19  ;;  %v2301_v62 = vsel %vm52_vm3, %v5619_v2, %v5629_v39  ;;  %v5623_v0 = vpop.permute.xlu1 %5622  ;;  %v2309_v13 = vsel %vm52_vm3, %v5629_v39, %v5619_v2  ;;  %v2310_v14 = vsel %vm52_vm3, %v5630_v19, %v5620_v43  ;;  %v2364_v43 = vld [vmem:[%s8685_s1 + $0x168] sm:$0xff]  ;;  %v2363_v2 = vld [vmem:[%s8685_s1 + $0x160] sm:$0xff]  ;;  %v2366_v19 = vld [vmem:[%s8685_s1 + $0x178] sm:$0xff] }
 0xff6   :  { %v5633_v55 = vpop.permute.xlu0 %5632  ;;  %v5625_v30 = vunpack.i.h.bf16 %v5623_v0  ;;  %v5624_v12 = vunpack.i.l.bf16 %v5623_v0  ;;  %v5282_v7 = vpack.c.bf16 %v2310_v14, %v2309_v13  ;;  %v5284_v60 = vpack.c.bf16 %v2302_v58, %v2301_v62  ;;  %v2365_v39 = vld [vmem:[%s8685_s1 + $0x170] sm:$0xff]  ;;  %v2368_v58 = vld [vmem:[%s8685_s1 + $0x188] sm:$0xff]  ;;  %v2367_v62 = vld [vmem:[%s8685_s1 + $0x180] sm:$0xff] }
 0xff7   :  { %v5635_v63 = vunpack.i.h.bf16 %v5633_v55  ;;  %v5634_v38 = vunpack.i.l.bf16 %v5633_v55  ;;  %v2370_v0 = vld [vmem:[%s8685_s1 + $0x198] sm:$0xff]  ;;  %v2369_v13 = vld [vmem:[%s8685_s1 + $0x190] sm:$0xff]  ;;  %v2372_v14 = vld [vmem:[%s8685_s1 + $0x1a8] sm:$0xff]  ;;  %vm2561_vm3 = vcmp.lt.s32.totalorder %v6046_v1, 13 }
 0xff8   :  { %5283 = vmatprep.subr.bf16.mxu0 %v5282_v7  ;;  %v2371_v55 = vld [vmem:[%s8685_s1 + $0x1a0] sm:$0xff]  ;;  %vm7920_vm1 = vmpackc.low %vm2561_vm3, %vm2561_vm3 }
 0xff9   :  { %v2344_v59 = vsel %vm59_vm4, %v5625_v30, %v5635_v63  ;;  %v2343_v35 = vsel %vm59_vm4, %v5624_v12, %v5634_v38  ;;  %5285 = vmatpush1.bf16.msra.mxu0 %v5284_v60  ;;  %v5638_v48 = vpop.permute.xlu1 %5637  ;;  %v2351_v21 = vsel %vm59_vm4, %v5634_v38, %v5624_v12  ;;  %v2352_v18 = vsel %vm59_vm4, %v5635_v63, %v5625_v30  ;;  %v2374_v30 = vld [vmem:[%s8685_s1 + $0x1b8] sm:$0xff]  ;;  %v2373_v12 = vld [vmem:[%s8685_s1 + $0x1b0] sm:$0xff] }
 0xffa   :  { %v5643_v16 = vpop.permute.xlu0 %5642  ;;  %v5640_v20 = vunpack.i.h.bf16 %v5638_v48  ;;  %v5639_v25 = vunpack.i.l.bf16 %v5638_v48  ;;  %v5286_v46 = vpack.c.bf16 %v2352_v18, %v2351_v21  ;;  %v5288_v32 = vpack.c.bf16 %v2344_v59, %v2343_v35 }
 0xffb   :  { %v5645_v41 = vunpack.i.h.bf16 %v5643_v16  ;;  %v5644_v6 = vunpack.i.l.bf16 %v5643_v16 }
 0xffc   :  { %5287 = vmatprep.subr.bf16.mxu0 %v5286_v46 }
 0xffd   :  { %v2346_v23 = vsel %vm59_vm4, %v5640_v20, %v5645_v41  ;;  %v2345_v15 = vsel %vm59_vm4, %v5639_v25, %v5644_v6  ;;  %5289 = vmatpush1.bf16.msra.mxu0 %v5288_v32  ;;  %v5648_v53 = vpop.permute.xlu1 %5647  ;;  %v2353_v42 = vsel %vm59_vm4, %v5644_v6, %v5639_v25  ;;  %v2354_v27 = vsel %vm59_vm4, %v5645_v41, %v5640_v20 }
 0xffe   :  { %v5653_v11 = vpop.permute.xlu0 %5652  ;;  %v5650_v54 = vunpack.i.h.bf16 %v5648_v53  ;;  %v5649_v9 = vunpack.i.l.bf16 %v5648_v53  ;;  %v5290_v36 = vpack.c.bf16 %v2354_v27, %v2353_v42  ;;  %v5292_v24 = vpack.c.bf16 %v2346_v23, %v2345_v15 }
 0xfff   :  { %v5655_v50 = vunpack.i.h.bf16 %v5653_v11  ;;  %v5654_v51 = vunpack.i.l.bf16 %v5653_v11 }
0x1000   :  { %5291 = vmatprep.subr.bf16.mxu0 %v5290_v36 }
0x1001   :  { %v2348_v10 = vsel %vm59_vm4, %v5650_v54, %v5655_v50  ;;  %v2347_v40 = vsel %vm59_vm4, %v5649_v9, %v5654_v51  ;;  %5293 = vmatpush1.bf16.msra.mxu0 %v5292_v24  ;;  %v5658_v44 = vpop.permute.xlu1 %5657  ;;  %v2355_v26 = vsel %vm59_vm4, %v5654_v51, %v5649_v9  ;;  %v2356_v34 = vsel %vm59_vm4, %v5655_v50, %v5650_v54 }
0x1002   :  { %v5663_v28 = vpop.permute.xlu0 %5662  ;;  %v5660_v57 = vunpack.i.h.bf16 %v5658_v44  ;;  %v5659_v47 = vunpack.i.l.bf16 %v5658_v44  ;;  %v5294_v37 = vpack.c.bf16 %v2356_v34, %v2355_v26  ;;  %v5296_v45 = vpack.c.bf16 %v2348_v10, %v2347_v40 }
0x1003   :  { %v5665_v31 = vunpack.i.h.bf16 %v5663_v28  ;;  %v5664_v56 = vunpack.i.l.bf16 %v5663_v28 }
0x1004   :  { %5295 = vmatprep.subr.bf16.mxu0 %v5294_v37 }
0x1005   :  { %v2350_v33 = vsel %vm59_vm4, %v5660_v57, %v5665_v31  ;;  %v2349_v49 = vsel %vm59_vm4, %v5659_v47, %v5664_v56  ;;  %5297 = vmatpush1.bf16.msra.mxu0 %v5296_v45  ;;  %v2357_v3 = vsel %vm59_vm4, %v5664_v56, %v5659_v47  ;;  %v2358_v17 = vsel %vm59_vm4, %v5665_v31, %v5660_v57 }
0x1006   :  { %v5298_v29 = vpack.c.bf16 %v2358_v17, %v2357_v3  ;;  %v5300_v61 = vpack.c.bf16 %v2350_v33, %v2349_v49  ;;  %vm2562_vm4 = vcmp.lt.s32.totalorder %v6053_v8, 13 }
0x1007   :  { %vm7911_vm0 = vmpackc.low %vm2562_vm4, %vm2562_vm4 }
0x1008   :  { %5299 = vmatprep.subr.bf16.mxu0 %v5298_v29 }
0x1009   :  { %5301 = vmatpush1.bf16.msra.mxu0 %v5300_v61 }
0x100c   :  { %2513 = vmatmul.mubr.f32.vlgmr.msra.gmra.mrb[24].mxu0 %v2359_v4 }
0x100d   :  { %4675 = vmatprep.mubr.msk.f32.mxu0 %vm2423_vm15, %v2362_v52 }
0x1010   :  { %2519 = vmatmul.mubr.f32.gmra.mrb[26].mxu0 %v2361_v5 }
0x1011   :  { %4676 = vmatprep.mubr.msk.f32.mxu0 %vm2423_vm15, %v2364_v43 }
0x1012   :  { %v2386_v7 = vpop.permute.xlu1 %2385 }
0x1013   :  { %v2391_v48 = vpop.permute.xlu0 %2390 }
0x1014   :  { %2525 = vmatmul.mubr.f32.gmra.mrb[28].mxu0 %v2363_v2 }
0x1015   :  { %4677 = vmatprep.mubr.msk.f32.mxu0 %vm2423_vm15, %v2366_v19 }
0x1016   :  { %v2396_v15 = vpop.permute.xlu1 %2395 }
0x1017   :  { %v2401_v51 = vpop.permute.xlu0 %2400 }
0x1018   :  { %2531 = vmatmul.mubr.f32.gmra.mrb[30].mxu0 %v2365_v39 }
0x1019   :  { %4678 = vmatprep.mubr.msk.f32.mxu0 %vm2423_vm15, %v2368_v58 }
0x101a   :  { %v2406_v31 = vpop.permute.xlu1 %2405 }
0x101b   :  { %v2411_v5 = vpop.permute.xlu0 %2410 }
0x101c   :  { %2537 = vmatmul.mubr.f32.gmra.mrb[32].mxu0 %v2367_v62 }
0x101d   :  { %4679 = vmatprep.mubr.msk.f32.mxu0 %vm2423_vm15, %v2370_v0 }
0x1020   :  { %2543 = vmatmul.mubr.f32.gmra.mrb[34].mxu0 %v2369_v13 }
0x1021   :  { %4680 = vmatprep.mubr.msk.f32.mxu0 %vm2423_vm15, %v2372_v14 }
0x1024   :  { %2549 = vmatmul.mubr.f32.gmra.mrb[36].mxu0 %v2371_v55 }
0x1025   :  { %4681 = vmatprep.mubr.msk.f32.mxu0 %vm2423_vm15, %v2374_v30 }
0x1028   :  { %2555 = vmatmul.mubr.f32.gmra.mrb[38].mxu0 %v2373_v12  ;;  %v2416_v12 = vpop.permute.xlu1 %2415 }
0x10df   :  { %v2514_v60 = vpop.f32.mrb[24].mxu0 }
0x10e0   :  { %v7621_v63 = vadd.f32 %v2514_v60, %v2386_v7  ;;  %v2516_v38 = vpop.f32.mrb[25].mxu0 }
0x10e1   :  { %v7624_v59 = vadd.f32 %v2516_v38, %v2386_v7 }
0x10e2   :  { %v2567_v35 = vsel %vm2561_vm3, %v7621_v63, 0.0 }
0x10e3   :  { %v2607_v21 = vmul.f32 %v2567_v35, %v2567_v35  ;;  %v2568_v18 = vsel %vm2562_vm4, %v7624_v59, 0.0  ;;  %v2520_v16 = vpop.f32.mrb[26].mxu0 }
0x10e4   :  { %v2583_v20 = vadd.f32 %v2568_v18, %v2567_v35  ;;  %v2608_v25 = vmul.f32 %v2568_v18, %v2568_v18  ;;  %v7632_v46 = vadd.f32 %v2520_v16, %v2391_v48  ;;  %v2522_v32 = vpop.f32.mrb[27].mxu0 }
0x10e5   :  { %v7634_v41 = vadd.f32 %v2522_v32, %v2391_v48 }
0x10e6   :  { %v2569_v6 = vsel %vm2561_vm3, %v7632_v46, 0.0  ;;  %2584 = vadd.xlane.f32.xlu1 %v2583_v20  ;;  %v2623_v23 = vadd.f32 %v2608_v25, %v2607_v21  ;;  %v2421_v25 = vpop.permute.xlu0 %2420 }
0x10e7   :  { %v2609_v53 = vmul.f32 %v2569_v6, %v2569_v6  ;;  %v2570_v42 = vsel %vm2562_vm4, %v7634_v41, 0.0  ;;  %v2526_v27 = vpop.f32.mrb[28].mxu0 }
0x10e8   :  { %v2610_v11 = vmul.f32 %v2570_v42, %v2570_v42  ;;  %v7642_v54 = vadd.f32 %v2526_v27, %v2396_v15  ;;  %v2528_v9 = vpop.f32.mrb[29].mxu0  ;;  %2624 = vadd.xlane.f32.xlu0 %v2623_v23  ;;  %v2586_v24 = vadd.f32 %v2570_v42, %v2569_v6 }
0x10e9   :  { %v7644_v36 = vadd.f32 %v2528_v9, %v2396_v15 }
0x10ea   :  { %v2626_v50 = vadd.f32 %v2610_v11, %v2609_v53  ;;  %v2571_v10 = vsel %vm2561_vm3, %v7642_v54, 0.0 }
0x10eb   :  { %v2572_v40 = vsel %vm2562_vm4, %v7644_v36, 0.0  ;;  %v2532_v44 = vpop.f32.mrb[30].mxu0  ;;  %v2611_v57 = vmul.f32 %v2571_v10, %v2571_v10 }
0x10ec   :  { %v7652_v26 = vadd.f32 %v2532_v44, %v2401_v51  ;;  %v2534_v34 = vpop.f32.mrb[31].mxu0  ;;  %2587 = vadd.xlane.f32.xlu0 %v2586_v24  ;;  %2627 = vadd.xlane.f32.xlu1 %v2626_v50  ;;  %v2589_v47 = vadd.f32 %v2572_v40, %v2571_v10  ;;  %v2612_v37 = vmul.f32 %v2572_v40, %v2572_v40 }
0x10ed   :  { %v7654_v28 = vadd.f32 %v2534_v34, %v2401_v51 }
0x10ee   :  { %v2573_v45 = vsel %vm2561_vm3, %v7652_v26, 0.0  ;;  %v2629_v52 = vadd.f32 %v2612_v37, %v2611_v57  ;;  %v2696_v37 = vld [vmem:[%s8684_s3 + $0x268] sm:$0xff] }
0x10ef   :  { %v2574_v56 = vsel %vm2562_vm4, %v7654_v28, 0.0  ;;  %v2538_v33 = vpop.f32.mrb[32].mxu0  ;;  %v2613_v49 = vmul.f32 %v2573_v45, %v2573_v45 }
0x10f0   :  { %v2592_v3 = vadd.f32 %v2574_v56, %v2573_v45  ;;  %v2614_v17 = vmul.f32 %v2574_v56, %v2574_v56  ;;  %v7662_v29 = vadd.f32 %v2538_v33, %v2406_v31  ;;  %v2540_v61 = vpop.f32.mrb[33].mxu0  ;;  %2590 = vadd.xlane.f32.xlu0 %v2589_v47  ;;  %v2695_v47 = vld [vmem:[%s8684_s3 + $0x260] sm:$0xff]  ;;  %v2697_v45 = vld [vmem:[%s8684_s3 + $0x270] sm:$0xff]  ;;  %v2700_v33 = vld [vmem:[%s8684_s3 + $0x288] sm:$0xff] }
0x10f1   :  { %v7664_v4 = vadd.f32 %v2540_v61, %v2406_v31  ;;  %v2698_v31 = vld [vmem:[%s8684_s3 + $0x278] sm:$0xff]  ;;  %v2699_v56 = vld [vmem:[%s8684_s3 + $0x280] sm:$0xff] }
0x10f2   :  { %2593 = vadd.xlane.f32.xlu1 %v2592_v3  ;;  %v2575_v43 = vsel %vm2561_vm3, %v7662_v29, 0.0  ;;  %v2632_v62 = vadd.f32 %v2614_v17, %v2613_v49 }
0x10f3   :  { %v2576_v2 = vsel %vm2562_vm4, %v7664_v4, 0.0  ;;  %v2544_v19 = vpop.f32.mrb[34].mxu0  ;;  %v2615_v13 = vmul.f32 %v2575_v43, %v2575_v43 }
0x10f4   :  { %v7672_v39 = vadd.f32 %v2544_v19, %v2411_v5  ;;  %v2546_v58 = vpop.f32.mrb[35].mxu0  ;;  %2630 = vadd.xlane.f32.xlu0 %v2629_v52  ;;  %v2595_v14 = vadd.f32 %v2576_v2, %v2575_v43  ;;  %v2616_v55 = vmul.f32 %v2576_v2, %v2576_v2 }
0x10f5   :  { %v7674_v0 = vadd.f32 %v2546_v58, %v2411_v5 }
0x10f6   :  { %v2577_v30 = vsel %vm2561_vm3, %v7672_v39, 0.0  ;;  %2633 = vadd.xlane.f32.xlu1 %v2632_v62  ;;  %v2635_v20 = vadd.f32 %v2616_v55, %v2615_v13 }
0x10f7   :  { %v2578_v7 = vsel %vm2562_vm4, %v7674_v0, 0.0  ;;  %v2550_v60 = vpop.f32.mrb[36].mxu0  ;;  %v2617_v38 = vmul.f32 %v2577_v30, %v2577_v30 }
0x10f8   :  { %v2598_v35 = vadd.f32 %v2578_v7, %v2577_v30  ;;  %v2618_v48 = vmul.f32 %v2578_v7, %v2578_v7  ;;  %v7682_v21 = vadd.f32 %v2550_v60, %v2416_v12  ;;  %v2552_v18 = vpop.f32.mrb[37].mxu0  ;;  %2596 = vadd.xlane.f32.xlu0 %v2595_v14 }
0x10f9   :  { %v7684_v16 = vadd.f32 %v2552_v18, %v2416_v12 }
0x10fa   :  { %2599 = vadd.xlane.f32.xlu1 %v2598_v35  ;;  %v2579_v32 = vsel %vm2561_vm3, %v7682_v21, 0.0  ;;  %v2638_v42 = vadd.f32 %v2618_v48, %v2617_v38 }
0x10fb   :  { %v2580_v6 = vsel %vm2562_vm4, %v7684_v16, 0.0  ;;  %v2556_v23 = vpop.f32.mrb[38].mxu0  ;;  %v2619_v11 = vmul.f32 %v2579_v32, %v2579_v32 }
0x10fc   :  { %v7692_v15 = vadd.f32 %v2556_v23, %v2421_v25  ;;  %v2558_v53 = vpop.f32.mrb[39].mxu0  ;;  %2636 = vadd.xlane.f32.xlu0 %v2635_v20  ;;  %v2601_v9 = vadd.f32 %v2580_v6, %v2579_v32  ;;  %v2620_v24 = vmul.f32 %v2580_v6, %v2580_v6 }
0x10fd   :  { %v7694_v27 = vadd.f32 %v2558_v53, %v2421_v25 }
0x10fe   :  { %v2581_v50 = vsel %vm2561_vm3, %v7692_v15, 0.0  ;;  %2639 = vadd.xlane.f32.xlu1 %v2638_v42  ;;  %v2641_v34 = vadd.f32 %v2620_v24, %v2619_v11  ;;  %v2687_v24 = vld [vmem:[%s8684_s3 + $0x220] sm:$0xff] }
0x10ff   :  { %v2582_v51 = vsel %vm2562_vm4, %v7694_v27, 0.0  ;;  %v2621_v10 = vmul.f32 %v2581_v50, %v2581_v50 }
0x1100   :  { %v2604_v40 = vadd.f32 %v2582_v51, %v2581_v50  ;;  %v2622_v44 = vmul.f32 %v2582_v51, %v2582_v51  ;;  %2602 = vadd.xlane.f32.xlu0 %v2601_v9 }
0x1102   :  { %2605 = vadd.xlane.f32.xlu1 %v2604_v40  ;;  %v2644_v57 = vadd.f32 %v2622_v44, %v2621_v10 }
0x1104   :  { %2642 = vadd.xlane.f32.xlu0 %v2641_v34 }
0x1106   :  { %2645 = vadd.xlane.f32.xlu1 %v2644_v57 }
0x1117   :  { %2801 = vperm.xlu1 %5445, %v2695_v47  }
0x111a   :  { %2806 = vperm.xlu0 %5444, %v2696_v37  }
0x111b   :  { %2811 = vperm.xlu1 %5445, %v2697_v45  }
0x111e   :  { %2816 = vperm.xlu0 %5444, %v2698_v31  }
0x111f   :  { %2821 = vperm.xlu1 %5445, %v2699_v56  }
0x1122   :  { %2826 = vperm.xlu0 %5444, %v2700_v33  }
0x1173   :  { %v2585_v49 = vpop.xlane.xlu1 %2584 }
0x1174   :  { %v7720_v3 = vmul.f32 0.03846154, %v2585_v49 }
0x1175   :  { %v2625_v17 = vpop.xlane.xlu0 %2624 }
0x1176   :  { %v2655_v61 = vmul.f32 0.03846154, %v2625_v17  ;;  %v2663_v52 = vmul.f32 %v7720_v3, %v7720_v3  ;;  %v2688_v17 = vld [vmem:[%s8684_s3 + $0x228] sm:$0xff] }
0x1178   :  { %v2671_v5 = vsub.f32 %v2655_v61, %v2663_v52 }
0x1179   :  { %v2588_v43 = vpop.xlane.xlu0 %2587  ;;  %v2628_v2 = vpop.xlane.xlu1 %2627 }
0x117a   :  { %v2679_v19 = vmax.f32 %v2671_v5, 0.0  ;;  %v7724_v58 = vmul.f32 0.03846154, %v2588_v43  ;;  %v2656_v14 = vmul.f32 0.03846154, %v2628_v2 }
0x117c   :  { %v2719_v62 = vadd.f32 1e-05, %v2679_v19  ;;  %v2664_v13 = vmul.f32 %v7724_v58, %v7724_v58 }
0x117d   :  { %v2591_v55 = vpop.xlane.xlu0 %2590 }
0x117e   :  { %5834 = vrsqrt.f32 %v2719_v62  ;;  %v2672_v30 = vsub.f32 %v2656_v14, %v2664_v13  ;;  %v7728_v12 = vmul.f32 0.03846154, %v2591_v55 }
0x117f   :  { %v2594_v7 = vpop.xlane.xlu1 %2593 }
0x1180   :  { %v2680_v60 = vmax.f32 %v2672_v30, 0.0  ;;  %v7730_v38 = vmul.f32 0.03846154, %v2594_v7  ;;  %v2665_v18 = vmul.f32 %v7728_v12, %v7728_v12 }
0x1181   :  { %v2631_v35 = vpop.xlane.xlu0 %2630 }
0x1182   :  { %v2720_v48 = vadd.f32 1e-05, %v2680_v60  ;;  %v2657_v20 = vmul.f32 0.03846154, %v2631_v35  ;;  %v2666_v6 = vmul.f32 %v7730_v38, %v7730_v38 }
0x1183   :  { %v2634_v25 = vpop.xlane.xlu1 %2633 }
0x1184   :  { %5836 = vrsqrt.f32 %v2720_v48  ;;  %v2673_v32 = vsub.f32 %v2657_v20, %v2665_v18  ;;  %v2658_v23 = vmul.f32 0.03846154, %v2634_v25  ;;  %v2689_v48 = vld [vmem:[%s8684_s3 + $0x230] sm:$0xff] }
0x1185   :  { %v2597_v53 = vpop.xlane.xlu0 %2596 }
0x1186   :  { %v2681_v42 = vmax.f32 %v2673_v32, 0.0  ;;  %v2674_v11 = vsub.f32 %v2658_v23, %v2666_v6  ;;  %v7736_v9 = vmul.f32 0.03846154, %v2597_v53  ;;  %v2690_v23 = vld [vmem:[%s8684_s3 + $0x238] sm:$0xff] }
0x1187   :  { %v2600_v50 = vpop.xlane.xlu1 %2599 }
0x1188   :  { %v5835_v51 = vpop.eup %5834  ;;  %v2721_v10 = vadd.f32 1e-05, %v2681_v42  ;;  %v2682_v40 = vmax.f32 %v2674_v11, 0.0  ;;  %v7741_v44 = vmul.f32 0.03846154, %v2600_v50  ;;  %v2667_v37 = vmul.f32 %v7736_v9, %v7736_v9 }
0x1189   :  { %v2637_v34 = vpop.xlane.xlu0 %2636  ;;  %v2735_v57 = vmul.f32 %v5835_v51, %v2687_v24 }
0x118a   :  { %5838 = vrsqrt.f32 %v2721_v10  ;;  %v2722_v47 = vadd.f32 1e-05, %v2682_v40  ;;  %v2659_v45 = vmul.f32 0.03846154, %v2637_v34  ;;  %v2668_v33 = vmul.f32 %v7741_v44, %v7741_v44  ;;  %v2691_v34 = vld [vmem:[%s8684_s3 + $0x240] sm:$0xff] }
0x118b   :  { %2745 = vperm.xlu0 %5444, %v2735_v57   ;;  %v2640_v31 = vpop.xlane.xlu1 %2639 }
0x118c   :  { %5840 = vrsqrt.f32 %v2722_v47  ;;  %v2675_v56 = vsub.f32 %v2659_v45, %v2667_v37  ;;  %v2660_v49 = vmul.f32 0.03846154, %v2640_v31  ;;  %v2692_v47 = vld [vmem:[%s8684_s3 + $0x248] sm:$0xff] }
0x118d   :  { %v2603_v61 = vpop.xlane.xlu0 %2602 }
0x118e   :  { %v5837_v52 = vpop.eup %5836  ;;  %v2683_v5 = vmax.f32 %v2675_v56, 0.0  ;;  %v2676_v43 = vsub.f32 %v2660_v49, %v2668_v33  ;;  %v7750_v2 = vmul.f32 0.03846154, %v2603_v61  ;;  %v2693_v56 = vld [vmem:[%s8684_s3 + $0x250] sm:$0xff]  ;;  %v2694_v49 = vld [vmem:[%s8684_s3 + $0x258] sm:$0xff] }
0x118f   :  { %v2606_v19 = vpop.xlane.xlu1 %2605  ;;  %v2736_v62 = vmul.f32 %v5837_v52, %v2688_v17 }
0x1190   :  { %v2723_v13 = vadd.f32 1e-05, %v2683_v5  ;;  %v2684_v14 = vmax.f32 %v2676_v43, 0.0  ;;  %v7752_v55 = vmul.f32 0.03846154, %v2606_v19  ;;  %v2669_v60 = vmul.f32 %v7750_v2, %v7750_v2  ;;  %v2701_v5 = vld [vmem:[%s8684_s3 + $0x290] sm:$0xff] }
0x1191   :  { %v2643_v30 = vpop.xlane.xlu0 %2642  ;;  %2750 = vperm.xlu1 %5445, %v2736_v62   ;;  %v2702_v43 = vld [vmem:[%s8684_s3 + $0x298] sm:$0xff]  ;;  %v2975_v19 = vld [vmem:[%s8684_s3 + $0x2a0] sm:$0xff]  ;;  %v2976_v62 = vld [vmem:[%s8684_s3 + $0x2a8] sm:$0xff] }
0x1192   :  { %5842 = vrsqrt.f32 %v2723_v13  ;;  %v2724_v7 = vadd.f32 1e-05, %v2684_v14  ;;  %v2661_v35 = vmul.f32 0.03846154, %v2643_v30  ;;  %v2670_v32 = vmul.f32 %v7752_v55, %v7752_v55  ;;  %v2977_v13 = vld [vmem:[%s8684_s3 + $0x2b0] sm:$0xff]  ;;  %v2978_v14 = vld [vmem:[%s8684_s3 + $0x2b8] sm:$0xff] }
0x1193   :  { %v2646_v18 = vpop.xlane.xlu1 %2645  ;;  %v2979_v30 = vld [vmem:[%s8684_s3 + $0x2c0] sm:$0xff] }
0x1194   :  { %v5839_v20 = vpop.eup %5838  ;;  %5844 = vrsqrt.f32 %v2724_v7  ;;  %v2677_v25 = vsub.f32 %v2661_v35, %v2669_v60  ;;  %v2662_v6 = vmul.f32 0.03846154, %v2646_v18  ;;  %v2980_v7 = vld [vmem:[%s8684_s3 + $0x2c8] sm:$0xff]  ;;  %v2981_v60 = vld [vmem:[%s8684_s3 + $0x2d0] sm:$0xff]  ;;  %v2982_v35 = vld [vmem:[%s8684_s3 + $0x2d8] sm:$0xff] }
0x1195   :  { %v2737_v53 = vmul.f32 %v5839_v20, %v2689_v48  ;;  %v2983_v48 = vld [vmem:[%s8684_s3 + $0x2e0] sm:$0xff]  ;;  %v2984_v18 = vld [vmem:[%s8684_s3 + $0x2e8] sm:$0xff]  ;;  %v2985_v20 = vld [vmem:[%s8684_s3 + $0x2f0] sm:$0xff] }
0x1196   :  { %v5841_v42 = vpop.eup %5840  ;;  %v2685_v11 = vmax.f32 %v2677_v25, 0.0  ;;  %v2678_v24 = vsub.f32 %v2662_v6, %v2670_v32  ;;  %v2986_v25 = vld [vmem:[%s8684_s3 + $0x2f8] sm:$0xff]  ;;  %v2987_v32 = vld [vmem:[%s8684_s3 + $0x300] sm:$0xff]  ;;  %v2988_v6 = vld [vmem:[%s8684_s3 + $0x308] sm:$0xff] }
0x1197   :  { %2755 = vperm.xlu1 %5445, %v2737_v53   ;;  %v2738_v50 = vmul.f32 %v5841_v42, %v2690_v23  ;;  %v2989_v23 = vld [vmem:[%s8684_s3 + $0x310] sm:$0xff]  ;;  %v2990_v53 = vld [vmem:[%s8684_s3 + $0x318] sm:$0xff] }
0x1198   :  { %v2725_v51 = vadd.f32 1e-05, %v2685_v11  ;;  %v2686_v10 = vmax.f32 %v2678_v24, 0.0  ;;  %v2802_v11 = vpop.permute.xlu1 %2801 }
0x1199   :  { %2760 = vperm.xlu0 %5444, %v2738_v50   ;;  %v2807_v42 = vpop.permute.xlu0 %2806 }
0x119a   :  { %5846 = vrsqrt.f32 %v2725_v51  ;;  %v2726_v40 = vadd.f32 1e-05, %v2686_v10  ;;  %v2703_v10 = vsub.f32 %v7621_v63, %v7720_v3  ;;  %v2706_v63 = vsub.f32 %v7634_v41, %v7724_v58 }
0x119b   :  { %v2709_v41 = vsub.f32 %v7652_v26, %v7730_v38 }
0x119c   :  { %v5843_v57 = vpop.eup %5842  ;;  %5848 = vrsqrt.f32 %v2726_v40  ;;  %v2812_v50 = vpop.permute.xlu1 %2811  ;;  %v2704_v40 = vsub.f32 %v7624_v59, %v7720_v3 }
0x119d   :  { %v2739_v37 = vmul.f32 %v5843_v57, %v2691_v34  ;;  %v2817_v24 = vpop.permute.xlu0 %2816 }
0x119e   :  { %v5845_v45 = vpop.eup %5844 }
0x119f   :  { %2765 = vperm.xlu1 %5445, %v2739_v37   ;;  %v2740_v31 = vmul.f32 %v5845_v45, %v2692_v47 }
0x11a0   :  { %v2822_v37 = vpop.permute.xlu1 %2821 }
0x11a1   :  { %2770 = vperm.xlu0 %5444, %v2740_v31   ;;  %v7830_v51 = vpop.permute.xlu0 %2826 }
0x11a4   :  { %v5847_v33 = vpop.eup %5846 }
0x11a5   :  { %v2741_v17 = vmul.f32 %v5847_v33, %v2693_v56 }
0x11a6   :  { %v5849_v61 = vpop.eup %5848 }
0x11a7   :  { %2775 = vperm.xlu1 %5445, %v2741_v17   ;;  %v2742_v52 = vmul.f32 %v5849_v61, %v2694_v49  ;;  %v2705_v49 = vsub.f32 %v7632_v46, %v7724_v58  ;;  %v2708_v46 = vsub.f32 %v7644_v36, %v7728_v12 }
0x11a9   :  { %2780 = vperm.xlu0 %5444, %v2742_v52  }
0x11ab   :  { %2831 = vperm.xlu1 %5445, %v2701_v5  }
0x11ad   :  { %2836 = vperm.xlu0 %5444, %v2702_v43  }
0x11af   :  { %3001 = vperm.xlu1 %5445, %v2975_v19   ;;  %v2707_v19 = vsub.f32 %v7642_v54, %v7728_v12 }
0x11b1   :  { %3006 = vperm.xlu0 %5444, %v2976_v62  }
0x11b3   :  { %3011 = vperm.xlu1 %5445, %v2977_v13  }
0x11b5   :  { %3016 = vperm.xlu0 %5444, %v2978_v14   ;;  %v2710_v14 = vsub.f32 %v7654_v28, %v7730_v38  ;;  %v2711_v28 = vsub.f32 %v7662_v29, %v7736_v9  ;;  %v2714_v29 = vsub.f32 %v7674_v0, %v7741_v44 }
0x11b7   :  { %3021 = vperm.xlu1 %5445, %v2979_v30  }
0x11b9   :  { %3026 = vperm.xlu0 %5444, %v2980_v7  }
0x11bb   :  { %3031 = vperm.xlu1 %5445, %v2981_v60  }
0x11bd   :  { %3036 = vperm.xlu0 %5444, %v2982_v35  }
0x11bf   :  { %3041 = vperm.xlu1 %5445, %v2983_v48  }
0x11c1   :  { %3046 = vperm.xlu0 %5444, %v2984_v18  }
0x11c3   :  { %3051 = vperm.xlu1 %5445, %v2985_v20  }
0x11c5   :  { %3056 = vperm.xlu0 %5444, %v2986_v25  }
0x11c7   :  { %3061 = vperm.xlu1 %5445, %v2987_v32   ;;  %v2712_v32 = vsub.f32 %v7664_v4, %v7736_v9 }
0x11c9   :  { %3066 = vperm.xlu0 %5444, %v2988_v6  }
0x11cb   :  { %3071 = vperm.xlu1 %5445, %v2989_v23  }
0x11cd   :  { %3076 = vperm.xlu0 %5444, %v2990_v53  }
0x120a   :  { %v2746_v34 = vpop.permute.xlu0 %2745 }
0x120b   :  { %v2783_v57 = vmul.f32 %v2746_v34, %v2703_v10  ;;  %v2784_v47 = vmul.f32 %v2746_v34, %v2704_v40 }
0x120d   :  { %v7836_v45 = vadd.f32 %v2802_v11, %v2783_v57  ;;  %v7838_v31 = vadd.f32 %v2802_v11, %v2784_v47 }
0x120f   :  { %v2855_v56 = vmul.f32 0.5, %v7836_v45  ;;  %v2856_v33 = vmul.f32 0.5, %v7838_v31 }
0x1210   :  { %v2751_v17 = vpop.permute.xlu1 %2750 }
0x1211   :  { %5850 = vtanh.f32 %v2855_v56  ;;  %v2785_v59 = vmul.f32 %v2751_v17, %v2705_v49  ;;  %v2786_v3 = vmul.f32 %v2751_v17, %v2706_v63 }
0x1212   :  { %5852 = vtanh.f32 %v2856_v33 }
0x1213   :  { %v2841_v61 = vadd.f32 %v2807_v42, %v2785_v59  ;;  %v7846_v52 = vadd.f32 %v2807_v42, %v2786_v3  ;;  %v2715_v3 = vsub.f32 %v7682_v21, %v7750_v2  ;;  %v2716_v21 = vsub.f32 %v7684_v16, %v7750_v2  ;;  %v2954_v2 = vld [vmem:[%s8687_s2 + $0x18] sm:$0xff] }
0x1215   :  { %v2857_v5 = vmul.f32 0.5, %v2841_v61  ;;  %v2858_v43 = vmul.f32 0.5, %v7846_v52 }
0x1216   :  { %v2756_v62 = vpop.permute.xlu1 %2755 }
0x1217   :  { %5854 = vtanh.f32 %v2857_v5  ;;  %v2787_v58 = vmul.f32 %v2756_v62, %v2707_v19  ;;  %v2788_v13 = vmul.f32 %v2756_v62, %v2708_v46 }
0x1218   :  { %5856 = vtanh.f32 %v2858_v43  ;;  %v2761_v30 = vpop.permute.xlu0 %2760 }
0x1219   :  { %v7857_v7 = vadd.f32 %v2812_v50, %v2787_v58  ;;  %v7859_v60 = vadd.f32 %v2812_v50, %v2788_v13  ;;  %v2789_v54 = vmul.f32 %v2761_v30, %v2709_v41  ;;  %v2790_v35 = vmul.f32 %v2761_v30, %v2710_v14 }
0x121b   :  { %v5851_v48 = vpop.eup %5850  ;;  %v2859_v36 = vmul.f32 0.5, %v7857_v7  ;;  %v2860_v12 = vmul.f32 0.5, %v7859_v60  ;;  %v7863_v26 = vadd.f32 %v2817_v24, %v2789_v54  ;;  %v7865_v18 = vadd.f32 %v2817_v24, %v2790_v35 }
0x121c   :  { %v5853_v20 = vpop.eup %5852  ;;  %v2887_v6 = vadd.f32 1.0, %v5851_v48  ;;  %v2713_v24 = vsub.f32 %v7672_v39, %v7741_v44 }
0x121d   :  { %5858 = vtanh.f32 %v2859_v36  ;;  %v2861_v38 = vmul.f32 0.5, %v7863_v26  ;;  %v2862_v25 = vmul.f32 0.5, %v7865_v18  ;;  %v2888_v23 = vadd.f32 1.0, %v5853_v20 }
0x121e   :  { %5860 = vtanh.f32 %v2860_v12  ;;  %v2766_v53 = vpop.permute.xlu1 %2765  ;;  %v2903_v57 = vmul.f32 0.5, %v2887_v6  ;;  %v2717_v36 = vsub.f32 %v7692_v15, %v7752_v55  ;;  %v2718_v12 = vsub.f32 %v7694_v27, %v7752_v55 }
0x121f   :  { %5862 = vtanh.f32 %v2861_v38  ;;  %v2791_v42 = vmul.f32 %v2766_v53, %v2711_v28  ;;  %v2792_v11 = vmul.f32 %v2766_v53, %v2712_v32  ;;  %v2904_v47 = vmul.f32 0.5, %v2888_v23 }
0x1220   :  { %5864 = vtanh.f32 %v2862_v25  ;;  %v2771_v50 = vpop.permute.xlu0 %2770  ;;  %v7893_v5 = vmul.f32 %v2903_v57, %v7836_v45 }
0x1221   :  { %v5855_v10 = vpop.eup %5854  ;;  %v7877_v40 = vadd.f32 %v2822_v37, %v2791_v42  ;;  %v7879_v34 = vadd.f32 %v2822_v37, %v2792_v11  ;;  %v2793_v4 = vmul.f32 %v2771_v50, %v2713_v24  ;;  %v2794_v33 = vmul.f32 %v2771_v50, %v2714_v29 }
0x1222   :  { %v5857_v9 = vpop.eup %5856  ;;  %v2889_v56 = vadd.f32 1.0, %v5855_v10 }
0x1223   :  { %v2890_v49 = vadd.f32 1.0, %v5857_v9  ;;  %v2863_v63 = vmul.f32 0.5, %v7877_v40  ;;  %v2864_v39 = vmul.f32 0.5, %v7879_v34  ;;  %v7884_v17 = vadd.f32 %v7830_v51, %v2793_v4 }
0x1224   :  { %v2905_v0 = vmul.f32 0.5, %v2889_v56  ;;  %v7887_v44 = vadd.f32 %v7830_v51, %v2794_v33  ;;  %v7899_v51 = vmul.f32 %v2904_v47, %v7838_v31  ;;  %v2953_v31 = vld [vmem:[%s8687_s2 + $0x10] sm:$0xff] }
0x1225   :  { %v2906_v37 = vmul.f32 0.5, %v2890_v49  ;;  %5866 = vtanh.f32 %v2863_v63  ;;  %v2865_v59 = vmul.f32 0.5, %v7884_v17 }
0x1226   :  { %v7895_v43 = vmul.f32 %v2905_v0, %v2841_v61  ;;  %5868 = vtanh.f32 %v2864_v39  ;;  %v2866_v19 = vmul.f32 0.5, %v7887_v44  ;;  %v2776_v46 = vpop.permute.xlu1 %2775  ;;  %8717 = vst [vmem:[#allocation3_spill] sm:$0xff] %v7899_v51 }
0x1227   :  { %v5859_v62 = vpop.eup %5858  ;;  %v7902_v41 = vmul.f32 %v2906_v37, %v7846_v52  ;;  %5870 = vtanh.f32 %v2865_v59  ;;  %v2795_v30 = vmul.f32 %v2776_v46, %v2715_v3  ;;  %v2796_v54 = vmul.f32 %v2776_v46, %v2716_v21 }
0x1228   :  { %8716 = vst [vmem:[#allocation2_spill] sm:$0xff] %v7895_v43  ;;  %v5861_v58 = vpop.eup %5860  ;;  %v5305_v45 = vpack.c.bf16 %v7895_v43, %v7893_v5  ;;  %v2891_v61 = vadd.f32 1.0, %v5859_v62  ;;  %5872 = vtanh.f32 %v2866_v19  ;;  %v2781_v13 = vpop.permute.xlu0 %2780 }
0x1229   :  { %8718 = vst [vmem:[#allocation4_spill] sm:$0xff] %v7902_v41  ;;  %v5863_v52 = vpop.eup %5862  ;;  %v2892_v14 = vadd.f32 1.0, %v5861_v58  ;;  %v5302_v16 = vpack.c.bf16 %v7902_v41, %v7899_v51  ;;  %v2797_v23 = vmul.f32 %v2781_v13, %v2717_v36  ;;  %v2798_v53 = vmul.f32 %v2781_v13, %v2718_v12 }
0x122a   :  { %v5865_v8 = vpop.eup %5864  ;;  %v2907_v35 = vmul.f32 0.5, %v2891_v61  ;;  %v2893_v48 = vadd.f32 1.0, %v5863_v52  ;;  %v2832_v20 = vpop.permute.xlu1 %2831 }
0x122b   :  { %v2908_v28 = vmul.f32 0.5, %v2892_v14  ;;  %v2894_v38 = vadd.f32 1.0, %v5865_v8  ;;  %5304 = vmatprep.subr.msk.bf16.mxu1 %vm7911_vm0, %v5302_v16  ;;  %v2851_v25 = vadd.f32 %v2832_v20, %v2795_v30  ;;  %v2852_v32 = vadd.f32 %v2832_v20, %v2796_v54 }
0x122c   :  { %v2909_v6 = vmul.f32 0.5, %v2893_v48  ;;  %5307 = vmatpush1.bf16.msk.msra.mxu1 %vm7920_vm1, %v5305_v45  ;;  %v2837_v42 = vpop.permute.xlu0 %2836  ;;  %v7933_v27 = vmul.f32 %v2907_v35, %v7857_v7 }
0x122d   :  { %v2910_v11 = vmul.f32 0.5, %v2894_v38  ;;  %v2867_v15 = vmul.f32 0.5, %v2851_v25  ;;  %v2868_v24 = vmul.f32 0.5, %v2852_v32  ;;  %v2853_v29 = vadd.f32 %v2837_v42, %v2797_v23  ;;  %v2951_v38 = vld [vmem:[%s8687_s2] sm:$0xff]  ;;  %v2957_v23 = vld [vmem:[%s8687_s2 + $0x30] sm:$0xff] }
0x122e   :  { %8723 = vst [vmem:[#allocation5_spill] sm:$0xff] %v7933_v27  ;;  %v7936_v55 = vmul.f32 %v2909_v6, %v7863_v26  ;;  %v2854_v50 = vadd.f32 %v2837_v42, %v2798_v53  ;;  %v7939_v4 = vmul.f32 %v2908_v28, %v7859_v60  ;;  %v2956_v6 = vld [vmem:[%s8687_s2 + $0x28] sm:$0xff]  ;;  %v2958_v53 = vld [vmem:[%s8687_s2 + $0x38] sm:$0xff]  ;;  %v2959_v42 = vld [vmem:[%s8687_s2 + $0x40] sm:$0xff] }
0x122f   :  { %v5867_v10 = vpop.eup %5866  ;;  %v7942_v9 = vmul.f32 %v2910_v11, %v7865_v18  ;;  %5874 = vtanh.f32 %v2867_v15  ;;  %v2869_v7 = vmul.f32 0.5, %v2853_v29  ;;  %v2960_v11 = vld [vmem:[%s8687_s2 + $0x48] sm:$0xff]  ;;  %v2961_v15 = vld [vmem:[%s8687_s2 + $0x50] sm:$0xff] }
0x1230   :  { %8724 = vst [vmem:[#allocation6_spill] sm:$0xff] %v7936_v55  ;;  %8725 = vst [vmem:[#allocation7_spill] sm:$0xff] %v7939_v4  ;;  %v5869_v57 = vpop.eup %5868  ;;  %v5311_v47 = vpack.c.bf16 %v7936_v55, %v7933_v27  ;;  %v2895_v56 = vadd.f32 1.0, %v5867_v10  ;;  %5876 = vtanh.f32 %v2868_v24  ;;  %v2870_v49 = vmul.f32 0.5, %v2854_v50  ;;  %v2962_v24 = vld [vmem:[%s8687_s2 + $0x58] sm:$0xff]  ;;  %v2965_v10 = vld [vmem:[%s8687_s2 + $0x70] sm:$0xff] }
0x1231   :  { %8726 = vst [vmem:[#allocation8_spill] sm:$0xff] %v7942_v9  ;;  %v5871_v33 = vpop.eup %5870  ;;  %v2896_v26 = vadd.f32 1.0, %v5869_v57  ;;  %v5308_v63 = vpack.c.bf16 %v7942_v9, %v7939_v4  ;;  %5878 = vtanh.f32 %v2869_v7  ;;  %v2966_v57 = vld [vmem:[%s8687_s2 + $0x78] sm:$0xff] }
0x1232   :  { %v5873_v39 = vpop.eup %5872  ;;  %v2911_v60 = vmul.f32 0.5, %v2895_v56  ;;  %v2897_v0 = vadd.f32 1.0, %v5871_v33  ;;  %5880 = vtanh.f32 %v2870_v49  ;;  %v3007_v49 = vpop.permute.xlu0 %3006 }
0x1233   :  { %v2912_v18 = vmul.f32 0.5, %v2896_v26  ;;  %v2898_v37 = vadd.f32 1.0, %v5873_v39  ;;  %5310 = vmatprep.subr.msk.bf16.mxu1 %vm7911_vm0, %v5308_v63 }
0x1234   :  { %v2913_v59 = vmul.f32 0.5, %v2897_v0  ;;  %5313 = vmatpush1.bf16.msk.msra.mxu1 %vm7920_vm1, %v5311_v47  ;;  %v7953_v19 = vmul.f32 %v2911_v60, %v7877_v40  ;;  %v3002_v47 = vpop.permute.xlu1 %3001 }
0x1235   :  { %v2914_v3 = vmul.f32 0.5, %v2898_v37  ;;  %v7959_v62 = vmul.f32 %v2912_v18, %v7879_v34 }
0x1236   :  { %8727 = vst [vmem:[#allocation9_spill] sm:$0xff] %v7953_v19  ;;  %v7956_v46 = vmul.f32 %v2913_v59, %v7884_v17 }
0x1237   :  { %8729 = vst [vmem:[#allocation11_spill] sm:$0xff] %v7959_v62  ;;  %v7962_v21 = vmul.f32 %v2914_v3, %v7887_v44 }
0x1238   :  { %8728 = vst [vmem:[#allocation10_spill] sm:$0xff] %v7956_v46  ;;  %v5317_v58 = vpack.c.bf16 %v7956_v46, %v7953_v19  ;;  %v3012_v18 = vpop.permute.xlu1 %3011  ;;  %v4394_v46 = vld [vmem:[%s8684_s3 + $0x378] sm:$0xff] }
0x1239   :  { %8730 = vst [vmem:[#allocation12_spill] sm:$0xff] %v7962_v21  ;;  %v5875_v45 = vpop.eup %5874  ;;  %v5314_v61 = vpack.c.bf16 %v7962_v21, %v7959_v62 }
0x123a   :  { %v5877_v13 = vpop.eup %5876  ;;  %v2899_v52 = vadd.f32 1.0, %v5875_v45  ;;  %v3017_v45 = vpop.permute.xlu0 %3016 }
0x123b   :  { %v2900_v40 = vadd.f32 1.0, %v5877_v13  ;;  %5316 = vmatprep.subr.msk.bf16.mxu1 %vm7911_vm0, %v5314_v61  ;;  %v5879_v17 = vpop.eup %5878 }
0x123c   :  { %5319 = vmatpush1.bf16.msk.msra.mxu1 %vm7920_vm1, %v5317_v58  ;;  %v5881_v34 = vpop.eup %5880  ;;  %v2915_v44 = vmul.f32 0.5, %v2899_v52  ;;  %v2901_v14 = vadd.f32 1.0, %v5879_v17  ;;  %v3022_v17 = vpop.permute.xlu1 %3021 }
0x123d   :  { %v2916_v30 = vmul.f32 0.5, %v2900_v40  ;;  %v2902_v54 = vadd.f32 1.0, %v5881_v34 }
0x123e   :  { %v2917_v16 = vmul.f32 0.5, %v2901_v14  ;;  %v7972_v35 = vmul.f32 %v2915_v44, %v2851_v25  ;;  %v2952_v25 = vld [vmem:[%s8687_s2 + $0x8] sm:$0xff] }
0x123f   :  { %v2918_v8 = vmul.f32 0.5, %v2902_v54  ;;  %v7976_v36 = vmul.f32 %v2916_v30, %v2852_v32  ;;  %v2955_v32 = vld [vmem:[%s8687_s2 + $0x20] sm:$0xff]  ;;  %v3027_v54 = vpop.permute.xlu0 %3026 }
0x1240   :  { %8731 = vst [vmem:[#allocation13_spill] sm:$0xff] %v7972_v35  ;;  %v7974_v48 = vmul.f32 %v2917_v16, %v2853_v29  ;;  %v2963_v29 = vld [vmem:[%s8687_s2 + $0x60] sm:$0xff] }
0x1241   :  { %8733 = vst [vmem:[#allocation15_spill] sm:$0xff] %v7976_v36  ;;  %v7978_v12 = vmul.f32 %v2918_v8, %v2854_v50  ;;  %v2964_v50 = vld [vmem:[%s8687_s2 + $0x68] sm:$0xff] }
0x1242   :  { %8732 = vst [vmem:[#allocation14_spill] sm:$0xff] %v7974_v48  ;;  %v5323_v20 = vpack.c.bf16 %v7974_v48, %v7972_v35  ;;  %v4392_v35 = vld [vmem:[%s8684_s3 + $0x368] sm:$0xff] }
0x1243   :  { %8734 = vst [vmem:[#allocation16_spill] sm:$0xff] %v7978_v12  ;;  %v5320_v28 = vpack.c.bf16 %v7978_v12, %v7976_v36 }
0x1245   :  { %5322 = vmatprep.subr.msk.bf16.mxu1 %vm7911_vm0, %v5320_v28 }
0x1246   :  { %5325 = vmatpush1.bf16.msk.msra.mxu1 %vm7920_vm1, %v5323_v20 }
0x1249   :  { %4698 = vmatmul.mubr.msk.f32.vlgmr.msra.gmra.mrb[28].mxu1 %vm2423_vm15, %v2951_v38  ;;  %v3032_v38 = vpop.permute.xlu1 %3031 }
0x124a   :  { %3261 = vmatprep.mubr.f32.mxu1 %v8711_v22 }
0x124d   :  { %4699 = vmatmul.mubr.msk.f32.gmra.mrb[30].mxu1 %vm2423_vm15, %v2952_v25 }
0x124e   :  { %3267 = vmatprep.mubr.f32.mxu1 %v8711_v22 }
0x1251   :  { %4700 = vmatmul.mubr.msk.f32.gmra.mrb[32].mxu1 %vm2423_vm15, %v2953_v31 }
0x1252   :  { %3273 = vmatprep.mubr.f32.mxu1 %v8711_v22 }
0x1255   :  { %4701 = vmatmul.mubr.msk.f32.gmra.mrb[34].mxu1 %vm2423_vm15, %v2954_v2 }
0x1256   :  { %3279 = vmatprep.mubr.f32.mxu1 %v8711_v22 }
0x1259   :  { %4702 = vmatmul.mubr.msk.f32.gmra.mrb[36].mxu1 %vm2423_vm15, %v2955_v32 }
0x125a   :  { %3285 = vmatprep.mubr.f32.mxu1 %v8711_v22 }
0x125d   :  { %4703 = vmatmul.mubr.msk.f32.gmra.mrb[38].mxu1 %vm2423_vm15, %v2956_v6  ;;  %v3037_v6 = vpop.permute.xlu0 %3036 }
0x125e   :  { %3291 = vmatprep.mubr.f32.mxu1 %v8711_v22 }
0x1261   :  { %4704 = vmatmul.mubr.msk.f32.gmra.mrb[40].mxu1 %vm2423_vm15, %v2957_v23 }
0x1262   :  { %3297 = vmatprep.mubr.f32.mxu1 %v8711_v22 }
0x1265   :  { %4705 = vmatmul.mubr.msk.f32.gmra.mrb[42].mxu1 %vm2423_vm15, %v2958_v53 }
0x1266   :  { %3303 = vmatprep.mubr.f32.mxu1 %v8711_v22 }
0x1269   :  { %4706 = vmatmul.mubr.msk.f32.gmra.mrb[44].mxu1 %vm2423_vm15, %v2959_v42 }
0x126a   :  { %3309 = vmatprep.mubr.f32.mxu1 %v8711_v22 }
0x126d   :  { %4707 = vmatmul.mubr.msk.f32.gmra.mrb[46].mxu1 %vm2423_vm15, %v2960_v11 }
0x126e   :  { %3315 = vmatprep.mubr.f32.mxu1 %v8711_v22 }
0x1271   :  { %4708 = vmatmul.mubr.msk.f32.gmra.mrb[48].mxu1 %vm2423_vm15, %v2961_v15 }
0x1272   :  { %3321 = vmatprep.mubr.f32.mxu1 %v8711_v22 }
0x1275   :  { %4709 = vmatmul.mubr.msk.f32.gmra.mrb[50].mxu1 %vm2423_vm15, %v2962_v24 }
0x1276   :  { %3327 = vmatprep.mubr.f32.mxu1 %v8711_v22 }
0x1279   :  { %4710 = vmatmul.mubr.msk.f32.gmra.mrb[52].mxu1 %vm2423_vm15, %v2963_v29  ;;  %v3042_v29 = vpop.permute.xlu1 %3041 }
0x127a   :  { %3333 = vmatprep.mubr.f32.mxu1 %v8711_v22 }
0x127d   :  { %4711 = vmatmul.mubr.msk.f32.gmra.mrb[54].mxu1 %vm2423_vm15, %v2964_v50  ;;  %v3047_v50 = vpop.permute.xlu0 %3046 }
0x127e   :  { %3339 = vmatprep.mubr.f32.mxu1 %v8711_v22 }
0x1281   :  { %4712 = vmatmul.mubr.msk.f32.gmra.mrb[56].mxu1 %vm2423_vm15, %v2965_v10 }
0x1282   :  { %3345 = vmatprep.mubr.f32.mxu1 %v8711_v22 }
0x1285   :  { %4713 = vmatmul.mubr.msk.f32.gmra.mrb[58].mxu1 %vm2423_vm15, %v2966_v57 }
0x1286   :  { %3351 = vmatprep.mubr.f32.mxu1 %v8711_v22 }
0x131c   :  { %v3257_v56 = vpop.f32.mrb[28].mxu1 }
0x131d   :  { %v3258_v7 = vadd.f32 %v3257_v56, %v3002_v47  ;;  %v3259_v33 = vpop.f32.mrb[29].mxu1 }
0x131e   :  { %v3260_v26 = vadd.f32 %v3259_v33, %v3002_v47 }
0x131f   :  { %3401 = vxpose.xlu1.b32.start [1/8] (short) %v3258_v7, 128 }
0x1320   :  { %v3263_v63 = vpop.f32.mrb[30].mxu1  ;;  %3893 = vxpose.xlu0.b32.start [1/8] (short) %v3260_v26, 128 }
0x1321   :  { %v3264_v39 = vadd.f32 %v3263_v63, %v3007_v49  ;;  %v3265_v60 = vpop.f32.mrb[31].mxu1 }
0x1322   :  { %v3266_v0 = vadd.f32 %v3265_v60, %v3007_v49  ;;  %v3052_v60 = vpop.permute.xlu1 %3051 }
0x1323   :  { %3402 = vxpose.xlu1.b32.cont [2/8] (short) %v3264_v39, 128 }
0x1324   :  { %v3269_v37 = vpop.f32.mrb[32].mxu1  ;;  %3894 = vxpose.xlu0.b32.cont [2/8] (short) %v3266_v0, 128  ;;  %v3057_v0 = vpop.permute.xlu0 %3056 }
0x1325   :  { %v3270_v59 = vadd.f32 %v3269_v37, %v3012_v18  ;;  %v3271_v3 = vpop.f32.mrb[33].mxu1 }
0x1326   :  { %v3272_v58 = vadd.f32 %v3271_v3, %v3012_v18 }
0x1327   :  { %3403 = vxpose.xlu1.b32.cont [3/8] (short) %v3270_v59, 128 }
0x1328   :  { %v3275_v61 = vpop.f32.mrb[34].mxu1  ;;  %3895 = vxpose.xlu0.b32.cont [3/8] (short) %v3272_v58, 128 }
0x1329   :  { %v3276_v13 = vadd.f32 %v3275_v61, %v3017_v45  ;;  %v3277_v52 = vpop.f32.mrb[35].mxu1 }
0x132a   :  { %v3278_v40 = vadd.f32 %v3277_v52, %v3017_v45 }
0x132b   :  { %3404 = vxpose.xlu1.b32.cont [4/8] (short) %v3276_v13, 128 }
0x132c   :  { %v3281_v34 = vpop.f32.mrb[36].mxu1  ;;  %3896 = vxpose.xlu0.b32.cont [4/8] (short) %v3278_v40, 128 }
0x132d   :  { %v3282_v44 = vadd.f32 %v3281_v34, %v3022_v17  ;;  %v3283_v14 = vpop.f32.mrb[37].mxu1  ;;  %v3067_v34 = vpop.permute.xlu0 %3066 }
0x132e   :  { %v3284_v30 = vadd.f32 %v3283_v14, %v3022_v17  ;;  %v3062_v17 = vpop.permute.xlu1 %3061 }
0x132f   :  { %3405 = vxpose.xlu1.b32.cont [5/8] (short) %v3282_v44, 128 }
0x1330   :  { %v3287_v16 = vpop.f32.mrb[38].mxu1  ;;  %3897 = vxpose.xlu0.b32.cont [5/8] (short) %v3284_v30, 128 }
0x1331   :  { %v3288_v8 = vadd.f32 %v3287_v16, %v3027_v54  ;;  %v3289_v20 = vpop.f32.mrb[39].mxu1 }
0x1332   :  { %v3290_v28 = vadd.f32 %v3289_v20, %v3027_v54 }
0x1333   :  { %3406 = vxpose.xlu1.b32.cont [6/8] (short) %v3288_v8, 128 }
0x1334   :  { %v3293_v25 = vpop.f32.mrb[40].mxu1  ;;  %3898 = vxpose.xlu0.b32.cont [6/8] (short) %v3290_v28, 128 }
0x1335   :  { %v3294_v31 = vadd.f32 %v3293_v25, %v3032_v38  ;;  %v3295_v2 = vpop.f32.mrb[41].mxu1 }
0x1336   :  { %v3296_v32 = vadd.f32 %v3295_v2, %v3032_v38  ;;  %v3077_v2 = vpop.permute.xlu0 %3076 }
0x1337   :  { %3407 = vxpose.xlu1.b32.cont [7/8] (short) %v3294_v31, 128  ;;  %v3072_v31 = vpop.permute.xlu1 %3071 }
0x1338   :  { %v3299_v23 = vpop.f32.mrb[42].mxu1  ;;  %3899 = vxpose.xlu0.b32.cont [7/8] (short) %v3296_v32, 128 }
0x1339   :  { %v3300_v53 = vadd.f32 %v3299_v23, %v3037_v6  ;;  %v3301_v42 = vpop.f32.mrb[43].mxu1 }
0x133a   :  { %v3302_v11 = vadd.f32 %v3301_v42, %v3037_v6 }
0x133b   :  { %3408 = vxpose.xlu1.b32.end [8/8] (short) %v3300_v53, 128 }
0x133c   :  { %v3305_v15 = vpop.f32.mrb[44].mxu1  ;;  %3900 = vxpose.xlu0.b32.end [8/8] (short) %v3302_v11, 128 }
0x133d   :  { %v3307_v24 = vpop.f32.mrb[45].mxu1  ;;  %v3306_v57 = vadd.f32 %v3305_v15, %v3042_v29 }
0x133e   :  { %v3308_v7 = vadd.f32 %v3307_v24, %v3042_v29 }
0x1340   :  { %v3311_v10 = vpop.f32.mrb[46].mxu1 }
0x1341   :  { %v3312_v47 = vadd.f32 %v3311_v10, %v3047_v50  ;;  %v3313_v56 = vpop.f32.mrb[47].mxu1 }
0x1342   :  { %v3314_v33 = vadd.f32 %v3313_v56, %v3047_v50 }
0x1343   :  { %v5326_v26 = vpack.c.bf16 %v3312_v47, %v3306_v57 }
0x1344   :  { %v5374_v49 = vpack.c.bf16 %v3314_v33, %v3308_v7  ;;  %v3317_v63 = vpop.f32.mrb[48].mxu1 }
0x1345   :  { %v3319_v39 = vpop.f32.mrb[49].mxu1  ;;  %5327 = vmatprep.subr.bf16.mxu0 %v5326_v26  ;;  %v3318_v37 = vadd.f32 %v3317_v63, %v3052_v60 }
0x1346   :  { %5329 = vmatpush3.bf16.msra.mxu0 %v5326_v26  ;;  %v3320_v58 = vadd.f32 %v3319_v39, %v3052_v60 }
0x1348   :  { %v3323_v18 = vpop.f32.mrb[50].mxu1 }
0x1349   :  { %v3324_v59 = vadd.f32 %v3323_v18, %v3057_v0  ;;  %v3325_v3 = vpop.f32.mrb[51].mxu1 }
0x134a   :  { %v3326_v45 = vadd.f32 %v3325_v3, %v3057_v0 }
0x134b   :  { %v5330_v61 = vpack.c.bf16 %v3324_v59, %v3318_v37 }
0x134c   :  { %v5378_v13 = vpack.c.bf16 %v3326_v45, %v3320_v58  ;;  %v3329_v52 = vpop.f32.mrb[52].mxu1 }
0x134d   :  { %v3331_v40 = vpop.f32.mrb[53].mxu1  ;;  %5331 = vmatprep.subr.bf16.mxu0 %v5330_v61  ;;  %v3330_v14 = vadd.f32 %v3329_v52, %v3062_v17 }
0x134e   :  { %5333 = vmatpush3.bf16.msra.mxu0 %v5330_v61  ;;  %v3332_v16 = vadd.f32 %v3331_v40, %v3062_v17 }
0x1350   :  { %v3335_v44 = vpop.f32.mrb[54].mxu1 }
0x1351   :  { %v3336_v30 = vadd.f32 %v3335_v44, %v3067_v34  ;;  %v3337_v54 = vpop.f32.mrb[55].mxu1 }
0x1352   :  { %v3338_v8 = vadd.f32 %v3337_v54, %v3067_v34 }
0x1353   :  { %v5334_v20 = vpack.c.bf16 %v3336_v30, %v3330_v14 }
0x1354   :  { %v5382_v28 = vpack.c.bf16 %v3338_v8, %v3332_v16  ;;  %v3341_v38 = vpop.f32.mrb[56].mxu1 }
0x1355   :  { %v3343_v25 = vpop.f32.mrb[57].mxu1  ;;  %5335 = vmatprep.subr.bf16.mxu0 %v5334_v20  ;;  %v3342_v6 = vadd.f32 %v3341_v38, %v3072_v31 }
0x1356   :  { %5337 = vmatpush3.bf16.msra.mxu0 %v5334_v20  ;;  %v3344_v42 = vadd.f32 %v3343_v25, %v3072_v31 }
0x1358   :  { %v3347_v32 = vpop.f32.mrb[58].mxu1 }
0x1359   :  { %v3348_v23 = vadd.f32 %v3347_v32, %v3077_v2  ;;  %v3349_v53 = vpop.f32.mrb[59].mxu1 }
0x135a   :  { %v3350_v11 = vadd.f32 %v3349_v53, %v3077_v2 }
0x135b   :  { %v5338_v15 = vpack.c.bf16 %v3348_v23, %v3342_v6 }
0x135c   :  { %v5386_v24 = vpack.c.bf16 %v3350_v11, %v3344_v42 }
0x135d   :  { %5339 = vmatprep.subr.bf16.mxu0 %v5338_v15 }
0x135e   :  { %5341 = vmatpush3.bf16.msra.mxu0 %v5338_v15 }
0x135f   :  { %5375 = vmatprep.subr.bf16.mxu0 %v5374_v49 }
0x139f   :  { %v3417_v29 = vpop.trf.xlu1 }
0x13a0   :  { %4874 = vmatprep.mubr.msk.f32.mxu0 %vm2423_vm15, %v3417_v29  ;;  %v3909_v50 = vpop.trf.xlu0 }
0x13a3   :  { %v3418_v10 = vpop.trf.xlu1 }
0x13a4   :  { %4875 = vmatmul.mubr.msk.f32.vlgmr.msra.gmra.mrb[40].mxu0 %vm2423_vm15, %v3418_v10  ;;  %v3910_v57 = vpop.trf.xlu0 }
0x13a5   :  { %5377 = vmatpush3.bf16.msra.mxu0 %v5374_v49 }
0x13a6   :  { %5379 = vmatprep.subr.bf16.mxu0 %v5378_v13 }
0x13a7   :  { %v3419_v47 = vpop.trf.xlu1 }
0x13a8   :  { %4877 = vmatprep.mubr.msk.f32.mxu0 %vm2423_vm15, %v3419_v47  ;;  %v3911_v7 = vpop.trf.xlu0 }
0x13a9   :  { %5381 = vmatpush3.bf16.msra.mxu0 %v5378_v13 }
0x13aa   :  { %5383 = vmatprep.subr.bf16.mxu0 %v5382_v28 }
0x13ab   :  { %v3420_v56 = vpop.trf.xlu1 }
0x13ac   :  { %4878 = vmatmul.mubr.msk.f32.gmra.mrb[42].mxu0 %vm2423_vm15, %v3420_v56  ;;  %v3912_v26 = vpop.trf.xlu0 }
0x13ad   :  { %5385 = vmatpush3.bf16.msra.mxu0 %v5382_v28 }
0x13ae   :  { %5387 = vmatprep.subr.bf16.mxu0 %v5386_v24 }
0x13af   :  { %v3421_v33 = vpop.trf.xlu1 }
0x13b0   :  { %4880 = vmatprep.mubr.msk.f32.mxu0 %vm2423_vm15, %v3421_v33  ;;  %v3913_v39 = vpop.trf.xlu0 }
0x13b1   :  { %5389 = vmatpush3.bf16.msra.mxu0 %v5386_v24 }
0x13b3   :  { %v3422_v63 = vpop.trf.xlu1 }
0x13b4   :  { %4881 = vmatmul.mubr.msk.f32.gmra.mrb[44].mxu0 %vm2423_vm15, %v3422_v63  ;;  %v3914_v0 = vpop.trf.xlu0 }
0x13b7   :  { %v3423_v49 = vpop.trf.xlu1 }
0x13b8   :  { %4883 = vmatprep.mubr.msk.f32.mxu0 %vm2423_vm15, %v3423_v49  ;;  %v3915_v59 = vpop.trf.xlu0 }
0x13bb   :  { %v3424_v60 = vpop.trf.xlu1 }
0x13bc   :  { %4884 = vmatmul.mubr.msk.f32.gmra.mrb[46].mxu0 %vm2423_vm15, %v3424_v60  ;;  %v3916_v58 = vpop.trf.xlu0 }
0x13bf   :  { %v3425_v18 = vpop.trf.xlu1 }
0x13c0   :  { %4886 = vmatprep.mubr.msk.f32.mxu0 %vm2423_vm15, %v3425_v18  ;;  %v3917_v13 = vpop.trf.xlu0 }
0x13c3   :  { %v3426_v37 = vpop.trf.xlu1 }
0x13c4   :  { %4887 = vmatmul.mubr.msk.f32.gmra.mrb[48].mxu0 %vm2423_vm15, %v3426_v37  ;;  %v3918_v40 = vpop.trf.xlu0 }
0x13c7   :  { %v3427_v3 = vpop.trf.xlu1 }
0x13c8   :  { %4889 = vmatprep.mubr.msk.f32.mxu0 %vm2423_vm15, %v3427_v3  ;;  %v3919_v44 = vpop.trf.xlu0 }
0x13cb   :  { %v3428_v45 = vpop.trf.xlu1 }
0x13cc   :  { %4890 = vmatmul.mubr.msk.f32.gmra.mrb[50].mxu0 %vm2423_vm15, %v3428_v45  ;;  %v3920_v14 = vpop.trf.xlu0 }
0x13cf   :  { %v3429_v61 = vpop.trf.xlu1 }
0x13d0   :  { %4892 = vmatprep.mubr.msk.f32.mxu0 %vm2423_vm15, %v3429_v61  ;;  %v3921_v30 = vpop.trf.xlu0 }
0x13d3   :  { %v3430_v52 = vpop.trf.xlu1 }
0x13d4   :  { %4893 = vmatmul.mubr.msk.f32.gmra.mrb[52].mxu0 %vm2423_vm15, %v3430_v52  ;;  %v3922_v54 = vpop.trf.xlu0 }
0x13d7   :  { %v3431_v17 = vpop.trf.xlu1 }
0x13d8   :  { %4895 = vmatprep.mubr.msk.f32.mxu0 %vm2423_vm15, %v3431_v17  ;;  %v3923_v16 = vpop.trf.xlu0 }
0x13db   :  { %v3432_v34 = vpop.trf.xlu1 }
0x13dc   :  { %4896 = vmatmul.mubr.msk.f32.gmra.mrb[54].mxu0 %vm2423_vm15, %v3432_v34  ;;  %v3924_v8 = vpop.trf.xlu0 }
0x13dd   :  { %4958 = vmatprep.mubr.msk.f32.mxu0 %vm2423_vm15, %v3909_v50 }
0x13e0   :  { %4959 = vmatmul.mubr.msk.f32.vlgmr.msra.gmra.mrb[56].mxu0 %vm2423_vm15, %v3910_v57 }
0x13e1   :  { %4961 = vmatprep.mubr.msk.f32.mxu0 %vm2423_vm15, %v3911_v7 }
0x13e4   :  { %4962 = vmatmul.mubr.msk.f32.gmra.mrb[58].mxu0 %vm2423_vm15, %v3912_v26 }
0x13e5   :  { %4964 = vmatprep.mubr.msk.f32.mxu0 %vm2423_vm15, %v3913_v39 }
0x13e8   :  { %4965 = vmatmul.mubr.msk.f32.gmra.mrb[60].mxu0 %vm2423_vm15, %v3914_v0 }
0x13e9   :  { %4967 = vmatprep.mubr.msk.f32.mxu0 %vm2423_vm15, %v3915_v59 }
0x13ec   :  { %4968 = vmatmul.mubr.msk.f32.gmra.mrb[62].mxu0 %vm2423_vm15, %v3916_v58 }
0x13ed   :  { %4970 = vmatprep.mubr.msk.f32.mxu0 %vm2423_vm15, %v3917_v13 }
0x13f0   :  { %4971 = vmatmul.mubr.msk.f32.gmra.mrb[64].mxu0 %vm2423_vm15, %v3918_v40 }
0x13f1   :  { %4973 = vmatprep.mubr.msk.f32.mxu0 %vm2423_vm15, %v3919_v44 }
0x13f4   :  { %4974 = vmatmul.mubr.msk.f32.gmra.mrb[66].mxu0 %vm2423_vm15, %v3920_v14 }
0x13f5   :  { %4976 = vmatprep.mubr.msk.f32.mxu0 %vm2423_vm15, %v3921_v30 }
0x13f8   :  { %4977 = vmatmul.mubr.msk.f32.gmra.mrb[68].mxu0 %vm2423_vm15, %v3922_v54  ;;  %v2967_v54 = vld [vmem:[%s8687_s2 + $0x80] sm:$0xff] }
0x13f9   :  { %4979 = vmatprep.mubr.msk.f32.mxu0 %vm2423_vm15, %v3923_v16  ;;  %4714 = vmatmul.mubr.msk.f32.gmra.mrb[60].mxu1 %vm2423_vm15, %v2967_v54 }
0x13fa   :  { %3357 = vmatprep.mubr.f32.mxu1 %v8711_v22 }
0x13fc   :  { %4980 = vmatmul.mubr.msk.f32.gmra.mrb[70].mxu0 %vm2423_vm15, %v3924_v8 }
0x1477   :  { %v4876_v20 = vpop.f32.mrb[40].mxu0 }
0x1478   :  { %v3547_v28 = vpop.f32.mrb[41].mxu0  ;;  %v8128_v33 = vsel %vm2561_vm3, %v4876_v20, -1e+30  ;;  %v2968_v20 = vld [vmem:[%s8687_s2 + $0x88] sm:$0xff] }
0x1479   :  { %v8132_v63 = vsel %vm2561_vm3, %v3547_v28, -1e+30  ;;  %4715 = vmatmul.mubr.msk.f32.gmra.mrb[62].mxu1 %vm2423_vm15, %v2968_v20 }
0x147a   :  { %3363 = vmatprep.mubr.f32.mxu1 %v8711_v22 }
0x147f   :  { %v4879_v38 = vpop.f32.mrb[42].mxu0 }
0x1480   :  { %v3557_v25 = vpop.f32.mrb[43].mxu0  ;;  %v8148_v37 = vsel %vm2561_vm3, %v4879_v38, -1e+30 }
0x1481   :  { %v8152_v3 = vsel %vm2561_vm3, %v3557_v25, -1e+30 }
0x1487   :  { %v4882_v31 = vpop.f32.mrb[44].mxu0 }
0x1488   :  { %v3567_v2 = vpop.f32.mrb[45].mxu0  ;;  %v8168_v40 = vsel %vm2561_vm3, %v4882_v31, -1e+30 }
0x1489   :  { %v8172_v34 = vsel %vm2561_vm3, %v3567_v2, -1e+30 }
0x148f   :  { %v4885_v32 = vpop.f32.mrb[46].mxu0 }
0x1490   :  { %v3577_v6 = vpop.f32.mrb[47].mxu0  ;;  %v8196_v28 = vsel %vm2561_vm3, %v4885_v32, -1e+30  ;;  %v2969_v32 = vld [vmem:[%s8687_s2 + $0x90] sm:$0xff] }
0x1491   :  { %v8201_v25 = vsel %vm2561_vm3, %v3577_v6, -1e+30  ;;  %4716 = vmatmul.mubr.msk.f32.gmra.mrb[64].mxu1 %vm2423_vm15, %v2969_v32  ;;  %v2970_v6 = vld [vmem:[%s8687_s2 + $0x98] sm:$0xff] }
0x1492   :  { %3369 = vmatprep.mubr.f32.mxu1 %v8711_v22 }
0x1495   :  { %4717 = vmatmul.mubr.msk.f32.gmra.mrb[66].mxu1 %vm2423_vm15, %v2970_v6 }
0x1496   :  { %3375 = vmatprep.mubr.f32.mxu1 %v8711_v22 }
0x1497   :  { %v8100_v23 = vpop.f32.mrb[48].mxu0 }
0x1498   :  { %v8102_v53 = vpop.f32.mrb[49].mxu0 }
0x149f   :  { %v8104_v42 = vpop.f32.mrb[50].mxu0 }
0x14a0   :  { %v8106_v11 = vpop.f32.mrb[51].mxu0 }
0x14a7   :  { %v8108_v15 = vpop.f32.mrb[52].mxu0 }
0x14a8   :  { %v8110_v24 = vpop.f32.mrb[53].mxu0 }
0x14af   :  { %v8112_v29 = vpop.f32.mrb[54].mxu0 }
0x14b0   :  { %v8114_v50 = vpop.f32.mrb[55].mxu0 }
0x14b3   :  { %v4960_v10 = vpop.f32.mrb[56].mxu0 }
0x14b4   :  { %v8118_v57 = vsel %vm2561_vm3, %v4960_v10, -1e+30  ;;  %v4039_v47 = vpop.f32.mrb[57].mxu0  ;;  %v8227_v10 = vsel %vm2561_vm3, %v8100_v23, -1e+30 }
0x14b5   :  { %v8122_v56 = vsel %vm2561_vm3, %v4039_v47, -1e+30  ;;  %4136 = vmax.xlane.f32.xlu1 %v8118_v57  ;;  %v8233_v47 = vsel %vm2561_vm3, %v8102_v53, -1e+30  ;;  %v2972_v53 = vld [vmem:[%s8687_s2 + $0xa8] sm:$0xff] }
0x14b6   :  { %4134 = vmax.xlane.f32.xlu0 %v8122_v56 }
0x14b7   :  { %v4963_v7 = vpop.f32.mrb[58].mxu0 }
0x14b8   :  { %v4049_v26 = vpop.f32.mrb[59].mxu0  ;;  %v8138_v49 = vsel %vm2561_vm3, %v4963_v7, -1e+30 }
0x14b9   :  { %3646 = vmax.xlane.f32.xlu1 %v8128_v33  ;;  %v8142_v39 = vsel %vm2561_vm3, %v4049_v26, -1e+30  ;;  %v2971_v26 = vld [vmem:[%s8687_s2 + $0xa0] sm:$0xff] }
0x14ba   :  { %3644 = vmax.xlane.f32.xlu0 %v8132_v63  ;;  %4718 = vmatmul.mubr.msk.f32.gmra.mrb[68].mxu1 %vm2423_vm15, %v2971_v26 }
0x14bb   :  { %v4966_v60 = vpop.f32.mrb[60].mxu0  ;;  %3381 = vmatprep.mubr.f32.mxu1 %v8711_v22 }
0x14bc   :  { %v4059_v0 = vpop.f32.mrb[61].mxu0  ;;  %v8158_v58 = vsel %vm2561_vm3, %v4966_v60, -1e+30  ;;  %v8259_v60 = vsel %vm2561_vm3, %v8104_v42, -1e+30 }
0x14bd   :  { %4140 = vmax.xlane.f32.xlu1 %v8138_v49  ;;  %v8162_v45 = vsel %vm2561_vm3, %v4059_v0, -1e+30  ;;  %v8265_v0 = vsel %vm2561_vm3, %v8106_v11, -1e+30  ;;  %v8288_v11 = vsel %vm2561_vm3, %v8108_v15, -1e+30 }
0x14be   :  { %4138 = vmax.xlane.f32.xlu0 %v8142_v39  ;;  %4719 = vmatmul.mubr.msk.f32.gmra.mrb[70].mxu1 %vm2423_vm15, %v2972_v53 }
0x14bf   :  { %v4969_v18 = vpop.f32.mrb[62].mxu0  ;;  %3387 = vmatprep.mubr.f32.mxu1 %v8711_v22 }
0x14c0   :  { %v4069_v59 = vpop.f32.mrb[63].mxu0  ;;  %v8178_v44 = vsel %vm2561_vm3, %v4969_v18, -1e+30 }
0x14c1   :  { %3650 = vmax.xlane.f32.xlu1 %v8148_v37  ;;  %v8182_v14 = vsel %vm2561_vm3, %v4069_v59, -1e+30  ;;  %v2973_v59 = vld [vmem:[%s8687_s2 + $0xb0] sm:$0xff] }
0x14c2   :  { %3648 = vmax.xlane.f32.xlu0 %v8152_v3  ;;  %4720 = vmatmul.mubr.msk.f32.gmra.mrb[72].mxu1 %vm2423_vm15, %v2973_v59 }
0x14c3   :  { %v4972_v61 = vpop.f32.mrb[64].mxu0  ;;  %3393 = vmatprep.mubr.f32.mxu1 %v8711_v22 }
0x14c4   :  { %v4079_v13 = vpop.f32.mrb[65].mxu0  ;;  %v8208_v31 = vsel %vm2561_vm3, %v4972_v61, -1e+30  ;;  %v2974_v61 = vld [vmem:[%s8687_s2 + $0xb8] sm:$0xff] }
0x14c5   :  { %4144 = vmax.xlane.f32.xlu1 %v8158_v58  ;;  %v8212_v2 = vsel %vm2561_vm3, %v4079_v13, -1e+30  ;;  %v8296_v13 = vsel %vm2561_vm3, %v8110_v24, -1e+30  ;;  %v8314_v24 = vsel %vm2561_vm3, %v8112_v29, -1e+30 }
0x14c6   :  { %4142 = vmax.xlane.f32.xlu0 %v8162_v45  ;;  %4721 = vmatmul.mubr.msk.f32.gmra.mrb[74].mxu1 %vm2423_vm15, %v2974_v61 }
0x14c7   :  { %v4975_v52 = vpop.f32.mrb[66].mxu0 }
0x14c8   :  { %v4089_v17 = vpop.f32.mrb[67].mxu0  ;;  %v8240_v7 = vsel %vm2561_vm3, %v4975_v52, -1e+30 }
0x14c9   :  { %3654 = vmax.xlane.f32.xlu1 %v8168_v40  ;;  %v8244_v23 = vsel %vm2561_vm3, %v4089_v17, -1e+30  ;;  %v8319_v17 = vsel %vm2561_vm3, %v8114_v50, -1e+30 }
0x14ca   :  { %3652 = vmax.xlane.f32.xlu0 %v8172_v34 }
0x14cb   :  { %v4978_v30 = vpop.f32.mrb[68].mxu0 }
0x14cc   :  { %v4099_v16 = vpop.f32.mrb[69].mxu0  ;;  %v8272_v18 = vsel %vm2561_vm3, %v4978_v30, -1e+30 }
0x14cd   :  { %4148 = vmax.xlane.f32.xlu1 %v8178_v44  ;;  %v8276_v42 = vsel %vm2561_vm3, %v4099_v16, -1e+30 }
0x14ce   :  { %4146 = vmax.xlane.f32.xlu0 %v8182_v14 }
0x14cf   :  { %v4981_v8 = vpop.f32.mrb[70].mxu0 }
0x14d0   :  { %v4109_v38 = vpop.f32.mrb[71].mxu0  ;;  %v8303_v52 = vsel %vm2561_vm3, %v4981_v8, -1e+30 }
0x14d1   :  { %3658 = vmax.xlane.f32.xlu1 %v8196_v28  ;;  %v8307_v15 = vsel %vm2561_vm3, %v4109_v38, -1e+30 }
0x14d2   :  { %3656 = vmax.xlane.f32.xlu0 %v8201_v25 }
0x14d5   :  { %4152 = vmax.xlane.f32.xlu1 %v8208_v31 }
0x14d6   :  { %4150 = vmax.xlane.f32.xlu0 %v8212_v2 }
0x14d9   :  { %3662 = vmax.xlane.f32.xlu1 %v8227_v10 }
0x14da   :  { %3660 = vmax.xlane.f32.xlu0 %v8233_v47 }
0x14dd   :  { %4156 = vmax.xlane.f32.xlu1 %v8240_v7 }
0x14de   :  { %4154 = vmax.xlane.f32.xlu0 %v8244_v23 }
0x14e1   :  { %3666 = vmax.xlane.f32.xlu1 %v8259_v60 }
0x14e2   :  { %3664 = vmax.xlane.f32.xlu0 %v8265_v0 }
0x14e5   :  { %4160 = vmax.xlane.f32.xlu1 %v8272_v18 }
0x14e6   :  { %4158 = vmax.xlane.f32.xlu0 %v8276_v42 }
0x14e9   :  { %3670 = vmax.xlane.f32.xlu1 %v8288_v11 }
0x14ea   :  { %3668 = vmax.xlane.f32.xlu0 %v8296_v13 }
0x14ed   :  { %4164 = vmax.xlane.f32.xlu1 %v8303_v52 }
0x14ee   :  { %4162 = vmax.xlane.f32.xlu0 %v8307_v15 }
0x14f1   :  { %3674 = vmax.xlane.f32.xlu1 %v8314_v24 }
0x14f2   :  { %3672 = vmax.xlane.f32.xlu0 %v8319_v17 }
0x1542   :  { %v4137_v30 = vpop.xlane.xlu1 %4136 }
0x1543   :  { %v4135_v54 = vpop.xlane.xlu0 %4134  ;;  %v4167_v50 = vsub.f32 %v8118_v57, %v4137_v30 }
0x1544   :  { %v4166_v61 = vsub.f32 %v8122_v56, %v4135_v54 }
0x1546   :  { %v3647_v16 = vpop.xlane.xlu1 %3646 }
0x1547   :  { %v3677_v8 = vsub.f32 %v8128_v33, %v3647_v16  ;;  %v3645_v20 = vpop.xlane.xlu0 %3644 }
0x1548   :  { %v3676_v38 = vsub.f32 %v8132_v63, %v3645_v20  ;;  %v4184_v63 = vmul.f32 1.442695, %v4167_v50  ;;  %v4182_v20 = vmul.f32 1.442695, %v4166_v61 }
0x1549   :  { %v3694_v32 = vmul.f32 1.442695, %v3677_v8 }
0x154a   :  { %v3692_v29 = vmul.f32 1.442695, %v3676_v38  ;;  %v4141_v6 = vpop.xlane.xlu1 %4140 }
0x154b   :  { %5882 = vpow2.f32 %v3694_v32  ;;  %v4139_v26 = vpop.xlane.xlu0 %4138  ;;  %v4169_v56 = vsub.f32 %v8138_v49, %v4141_v6 }
0x154c   :  { %5884 = vpow2.f32 %v3692_v29 }
0x154d   :  { %v4188_v50 = vmul.f32 1.442695, %v4169_v56 }
0x154e   :  { %v3651_v1 = vpop.xlane.xlu1 %3650 }
0x154f   :  { %v3679_v53 = vsub.f32 %v8148_v37, %v3651_v1  ;;  %v3649_v59 = vpop.xlane.xlu0 %3648 }
0x1550   :  { %v3678_v12 = vsub.f32 %v8152_v3, %v3649_v59 }
0x1551   :  { %v3698_v33 = vmul.f32 1.442695, %v3679_v53 }
0x1552   :  { %v3696_v16 = vmul.f32 1.442695, %v3678_v12  ;;  %v4145_v48 = vpop.xlane.xlu1 %4144  ;;  %v4168_v12 = vsub.f32 %v8142_v39, %v4139_v26 }
0x1553   :  { %5886 = vpow2.f32 %v3698_v33  ;;  %v4143_v8 = vpop.xlane.xlu0 %4142  ;;  %v4171_v39 = vsub.f32 %v8158_v58, %v4145_v48 }
0x1554   :  { %5888 = vpow2.f32 %v3696_v16  ;;  %v4186_v59 = vmul.f32 1.442695, %v4168_v12  ;;  %v4170_v26 = vsub.f32 %v8162_v45, %v4143_v8 }
0x1555   :  { %v8329_v38 = vpop.eup %5882  ;;  %5890 = vpow2.f32 %v4184_v63  ;;  %v4192_v48 = vmul.f32 1.442695, %v4171_v39 }
0x1556   :  { %v8331_v32 = vpop.eup %5884  ;;  %v3655_v57 = vpop.xlane.xlu1 %3654  ;;  %3726 = vadd.xlane.f32.xlu1 %v8329_v38  ;;  %5892 = vpow2.f32 %v4182_v20 }
0x1557   :  { %v3681_v37 = vsub.f32 %v8168_v40, %v3655_v57  ;;  %v3653_v3 = vpop.xlane.xlu0 %3652  ;;  %3724 = vadd.xlane.f32.xlu0 %v8331_v32 }
0x1558   :  { %v3680_v30 = vsub.f32 %v8172_v34, %v3653_v3 }
0x1559   :  { %v3702_v54 = vmul.f32 1.442695, %v3681_v37 }
0x155a   :  { %v3700_v29 = vmul.f32 1.442695, %v3680_v30  ;;  %v4149_v1 = vpop.xlane.xlu1 %4148 }
0x155b   :  { %5894 = vpow2.f32 %v3702_v54  ;;  %v4147_v53 = vpop.xlane.xlu0 %4146  ;;  %v4173_v8 = vsub.f32 %v8178_v44, %v4149_v1 }
0x155c   :  { %5896 = vpow2.f32 %v3700_v29  ;;  %v4172_v30 = vsub.f32 %v8182_v14, %v4147_v53 }
0x155d   :  { %v8339_v61 = vpop.eup %5886  ;;  %5898 = vpow2.f32 %v4188_v50  ;;  %v4196_v44 = vmul.f32 1.442695, %v4173_v8 }
0x155e   :  { %v8341_v49 = vpop.eup %5888  ;;  %v3659_v40 = vpop.xlane.xlu1 %3658  ;;  %3730 = vadd.xlane.f32.xlu1 %v8339_v61  ;;  %5900 = vpow2.f32 %v4186_v59  ;;  %v4194_v1 = vmul.f32 1.442695, %v4172_v30 }
0x155f   :  { %v3683_v34 = vsub.f32 %v8196_v28, %v3659_v40  ;;  %v3657_v6 = vpop.xlane.xlu0 %3656  ;;  %3728 = vadd.xlane.f32.xlu0 %v8341_v49  ;;  %v8349_v16 = vpop.eup %5890  ;;  %v4190_v28 = vmul.f32 1.442695, %v4170_v26 }
0x1560   :  { %v3682_v33 = vsub.f32 %v8201_v25, %v3657_v6  ;;  %v8351_v20 = vpop.eup %5892 }
0x1561   :  { %v3706_v63 = vmul.f32 1.442695, %v3683_v34 }
0x1562   :  { %v3704_v57 = vmul.f32 1.442695, %v3682_v33  ;;  %v4153_v56 = vpop.xlane.xlu1 %4152  ;;  %4216 = vadd.xlane.f32.xlu1 %v8349_v16 }
0x1563   :  { %5902 = vpow2.f32 %v3706_v63  ;;  %v4151_v58 = vpop.xlane.xlu0 %4150  ;;  %4214 = vadd.xlane.f32.xlu0 %v8351_v20  ;;  %v4175_v53 = vsub.f32 %v8208_v31, %v4153_v56 }
0x1564   :  { %5904 = vpow2.f32 %v3704_v57  ;;  %v4174_v33 = vsub.f32 %v8212_v2, %v4151_v58 }
0x1565   :  { %v8355_v37 = vpop.eup %5894  ;;  %5906 = vpow2.f32 %v4192_v48  ;;  %v4200_v31 = vmul.f32 1.442695, %v4175_v53 }
0x1566   :  { %v8357_v45 = vpop.eup %5896  ;;  %v3663_v25 = vpop.xlane.xlu1 %3662  ;;  %3734 = vadd.xlane.f32.xlu1 %v8355_v37  ;;  %5908 = vpow2.f32 %v4190_v28  ;;  %v4198_v56 = vmul.f32 1.442695, %v4174_v33 }
0x1567   :  { %v3685_v3 = vsub.f32 %v8227_v10, %v3663_v25  ;;  %v3661_v12 = vpop.xlane.xlu0 %3660  ;;  %3732 = vadd.xlane.f32.xlu0 %v8357_v45  ;;  %v8365_v29 = vpop.eup %5898 }
0x1568   :  { %v3684_v54 = vsub.f32 %v8233_v47, %v3661_v12  ;;  %v8367_v59 = vpop.eup %5900 }
0x1569   :  { %v3710_v50 = vmul.f32 1.442695, %v3685_v3 }
0x156a   :  { %v3708_v40 = vmul.f32 1.442695, %v3684_v54  ;;  %v4157_v39 = vpop.xlane.xlu1 %4156  ;;  %4220 = vadd.xlane.f32.xlu1 %v8365_v29 }
0x156b   :  { %5910 = vpow2.f32 %v3710_v50  ;;  %v4155_v10 = vpop.xlane.xlu0 %4154  ;;  %4218 = vadd.xlane.f32.xlu0 %v8367_v59  ;;  %v4177_v58 = vsub.f32 %v8240_v7, %v4157_v39 }
0x156c   :  { %5912 = vpow2.f32 %v3708_v40  ;;  %v4176_v54 = vsub.f32 %v8244_v23, %v4155_v10 }
0x156d   :  { %v8371_v34 = vpop.eup %5902  ;;  %5914 = vpow2.f32 %v4196_v44  ;;  %v4204_v7 = vmul.f32 1.442695, %v4177_v58 }
0x156e   :  { %v8373_v14 = vpop.eup %5904  ;;  %v3667_v47 = vpop.xlane.xlu1 %3666  ;;  %3738 = vadd.xlane.f32.xlu1 %v8371_v34  ;;  %5916 = vpow2.f32 %v4194_v1  ;;  %v4202_v39 = vmul.f32 1.442695, %v4176_v54 }
0x156f   :  { %v3687_v6 = vsub.f32 %v8259_v60, %v3667_v47  ;;  %v3665_v26 = vpop.xlane.xlu0 %3664  ;;  %3736 = vadd.xlane.f32.xlu0 %v8373_v14  ;;  %v8381_v57 = vpop.eup %5906 }
0x1570   :  { %v3686_v63 = vsub.f32 %v8265_v0, %v3665_v26  ;;  %v8383_v28 = vpop.eup %5908 }
0x1571   :  { %v3714_v48 = vmul.f32 1.442695, %v3687_v6 }
0x1572   :  { %v3712_v25 = vmul.f32 1.442695, %v3686_v63  ;;  %v4161_v8 = vpop.xlane.xlu1 %4160  ;;  %4224 = vadd.xlane.f32.xlu1 %v8381_v57 }
0x1573   :  { %5918 = vpow2.f32 %v3714_v48  ;;  %v4159_v60 = vpop.xlane.xlu0 %4158  ;;  %4222 = vadd.xlane.f32.xlu0 %v8383_v28  ;;  %v4179_v10 = vsub.f32 %v8272_v18, %v4161_v8 }
0x1574   :  { %5920 = vpow2.f32 %v3712_v25  ;;  %v4178_v63 = vsub.f32 %v8276_v42, %v4159_v60 }
0x1575   :  { %v8387_v3 = vpop.eup %5910  ;;  %5922 = vpow2.f32 %v4200_v31  ;;  %v4208_v58 = vmul.f32 1.442695, %v4179_v10 }
0x1576   :  { %v8389_v2 = vpop.eup %5912  ;;  %v3671_v0 = vpop.xlane.xlu1 %3670  ;;  %3742 = vadd.xlane.f32.xlu1 %v8387_v3  ;;  %5924 = vpow2.f32 %v4198_v56 }
0x1577   :  { %v3689_v12 = vsub.f32 %v8288_v11, %v3671_v0  ;;  %v3669_v30 = vpop.xlane.xlu0 %3668  ;;  %3740 = vadd.xlane.f32.xlu0 %v8389_v2  ;;  %v8397_v40 = vpop.eup %5914 }
0x1578   :  { %v3688_v50 = vsub.f32 %v8296_v13, %v3669_v30  ;;  %v8399_v1 = vpop.eup %5916 }
0x1579   :  { %v3718_v44 = vmul.f32 1.442695, %v3689_v12 }
0x157a   :  { %v3716_v47 = vmul.f32 1.442695, %v3688_v50  ;;  %4228 = vadd.xlane.f32.xlu1 %v8397_v40  ;;  %v4165_v53 = vpop.xlane.xlu1 %4164 }
0x157b   :  { %5926 = vpow2.f32 %v3718_v44  ;;  %v4163_v11 = vpop.xlane.xlu0 %4162  ;;  %4226 = vadd.xlane.f32.xlu0 %v8399_v1  ;;  %v4181_v18 = vsub.f32 %v8303_v52, %v4165_v53 }
0x157c   :  { %5928 = vpow2.f32 %v3716_v47  ;;  %v4180_v8 = vsub.f32 %v8307_v15, %v4163_v11  ;;  %v8454_v11 = vpop.f32.mrb[60].mxu1 }
0x157d   :  { %v8403_v6 = vpop.eup %5918  ;;  %5930 = vpow2.f32 %v4204_v7  ;;  %v4212_v60 = vmul.f32 1.442695, %v4181_v18  ;;  %v2992_v7 = vld [vmem:[%s8684_s3 + $0x328] sm:$0xff]  ;;  %v2994_v18 = vld [vmem:[%s8684_s3 + $0x338] sm:$0xff] }
0x157e   :  { %v8405_v23 = vpop.eup %5920  ;;  %3746 = vadd.xlane.f32.xlu1 %v8403_v6  ;;  %v3675_v13 = vpop.xlane.xlu1 %3674  ;;  %5932 = vpow2.f32 %v4202_v39  ;;  %v4210_v12 = vmul.f32 1.442695, %v4180_v8  ;;  %v2997_v8 = vld [vmem:[%s8684_s3 + $0x350] sm:$0xff] }
0x157f   :  { %v3691_v26 = vsub.f32 %v8314_v24, %v3675_v13  ;;  %3744 = vadd.xlane.f32.xlu0 %v8405_v23  ;;  %v3673_v33 = vpop.xlane.xlu0 %3672  ;;  %v8413_v25 = vpop.eup %5922  ;;  %v4206_v24 = vmul.f32 1.442695, %v4178_v63  ;;  %v2991_v63 = vld [vmem:[%s8684_s3 + $0x320] sm:$0xff] }
0x1580   :  { %v3690_v48 = vsub.f32 %v8319_v17, %v3673_v33  ;;  %v8415_v56 = vpop.eup %5924  ;;  %v8456_v39 = vpop.f32.mrb[61].mxu1 }
0x1581   :  { %v3722_v31 = vmul.f32 1.442695, %v3691_v26  ;;  %v8458_v13 = vpop.f32.mrb[62].mxu1  ;;  %v2993_v26 = vld [vmem:[%s8684_s3 + $0x330] sm:$0xff] }
0x1582   :  { %v3720_v0 = vmul.f32 1.442695, %v3690_v48  ;;  %4232 = vadd.xlane.f32.xlu1 %v8413_v25  ;;  %v8460_v10 = vpop.f32.mrb[63].mxu1 }
0x1583   :  { %5934 = vpow2.f32 %v3722_v31  ;;  %4230 = vadd.xlane.f32.xlu0 %v8415_v56  ;;  %v8465_v33 = vpop.f32.mrb[64].mxu1  ;;  %v2995_v31 = vld [vmem:[%s8684_s3 + $0x340] sm:$0xff] }
0x1584   :  { %5936 = vpow2.f32 %v3720_v0  ;;  %v8470_v48 = vpop.f32.mrb[65].mxu1 }
0x1585   :  { %v8421_v42 = vpop.eup %5926  ;;  %5938 = vpow2.f32 %v4208_v58  ;;  %v8475_v0 = vpop.f32.mrb[66].mxu1 }
0x1586   :  { %v8423_v17 = vpop.eup %5928  ;;  %3750 = vadd.xlane.f32.xlu1 %v8421_v42  ;;  %5940 = vpow2.f32 %v4206_v24  ;;  %v8477_v58 = vpop.f32.mrb[67].mxu1 }
0x1587   :  { %3748 = vadd.xlane.f32.xlu0 %v8423_v17  ;;  %v8427_v52 = vpop.eup %5930  ;;  %5942 = vpow2.f32 %v4212_v60 }
0x1588   :  { %v8429_v30 = vpop.eup %5932  ;;  %5944 = vpow2.f32 %v4210_v12  ;;  %v2996_v12 = vld [vmem:[%s8684_s3 + $0x348] sm:$0xff] }
0x158a   :  { %4236 = vadd.xlane.f32.xlu1 %v8427_v52 }
0x158b   :  { %4234 = vadd.xlane.f32.xlu0 %v8429_v30 }
0x158d   :  { %v8433_v15 = vpop.eup %5934  ;;  %v8482_v24 = vpop.f32.mrb[68].mxu1 }
0x158e   :  { %v8435_v54 = vpop.eup %5936  ;;  %3754 = vadd.xlane.f32.xlu1 %v8433_v15  ;;  %v8487_v60 = vpop.f32.mrb[69].mxu1 }
0x158f   :  { %3752 = vadd.xlane.f32.xlu0 %v8435_v54  ;;  %v8439_v50 = vpop.eup %5938 }
0x1590   :  { %v8441_v44 = vpop.eup %5940 }
0x1591   :  { %v8445_v47 = vpop.eup %5942 }
0x1592   :  { %4240 = vadd.xlane.f32.xlu1 %v8439_v50  ;;  %v8447_v53 = vpop.eup %5944 }
0x1593   :  { %4238 = vadd.xlane.f32.xlu0 %v8441_v44 }
0x1596   :  { %4244 = vadd.xlane.f32.xlu1 %v8445_v47 }
0x1597   :  { %4242 = vadd.xlane.f32.xlu0 %v8447_v53 }
0x15a7   :  { %3086 = vperm.xlu1 %5445, %v2992_v7   ;;  %v8492_v7 = vpop.f32.mrb[70].mxu1 }
0x15ab   :  { %3091 = vperm.xlu1 %5445, %v2993_v26   ;;  %v4391_v26 = vld [vmem:[%s8684_s3 + $0x360] sm:$0xff] }
0x15ad   :  { %3081 = vperm.xlu0 %5444, %v2991_v63   ;;  %v8497_v63 = vpop.f32.mrb[71].mxu1 }
0x15af   :  { %3101 = vperm.xlu1 %5445, %v2995_v31   ;;  %v2998_v31 = vld [vmem:[%s8684_s3 + $0x358] sm:$0xff] }
0x15b1   :  { %3096 = vperm.xlu0 %5444, %v2994_v18   ;;  %v8502_v18 = vpop.f32.mrb[72].mxu1 }
0x15b2   :  { %v8507_v36 = vpop.f32.mrb[73].mxu1 }
0x15b3   :  { %3111 = vperm.xlu1 %5445, %v2997_v8   ;;  %v4393_v8 = vld [vmem:[%s8684_s3 + $0x370] sm:$0xff]  ;;  %v8515_v21 = vpop.f32.mrb[74].mxu1 }
0x15b5   :  { %3106 = vperm.xlu0 %5444, %v2996_v12   ;;  %v4395_v12 = vld [vmem:[%s8684_s3 + $0x380] sm:$0xff] }
0x15b7   :  { %4401 = vperm.xlu1 %5445, %v4391_v26   ;;  %v8517_v26 = vpop.f32.mrb[75].mxu1 }
0x15b9   :  { %3116 = vperm.xlu0 %5444, %v2998_v31   ;;  %v4397_v31 = vld [vmem:[%s8684_s3 + $0x390] sm:$0xff] }
0x15bb   :  { %4411 = vperm.xlu1 %5445, %v4393_v8   ;;  %v4396_v8 = vld [vmem:[%s8684_s3 + $0x388] sm:$0xff] }
0x15bd   :  { %4406 = vperm.xlu0 %5444, %v4392_v35   ;;  %v4398_v35 = vld [vmem:[%s8684_s3 + $0x398] sm:$0xff] }
0x15bf   :  { %4421 = vperm.xlu1 %5445, %v4395_v12  }
0x15c1   :  { %4416 = vperm.xlu0 %5444, %v4394_v46  }
0x15c3   :  { %4431 = vperm.xlu1 %5445, %v4397_v31  }
0x15c5   :  { %4426 = vperm.xlu0 %5444, %v4396_v8  }
0x15c9   :  { %4436 = vperm.xlu0 %5444, %v4398_v35  }
0x15e3   :  { %v3727_v62 = vpop.xlane.xlu1 %3726 }
0x15e4   :  { %5946 = vrcp.f32 %v3727_v62  ;;  %v3725_v19 = vpop.xlane.xlu0 %3724 }
0x15e5   :  { %5948 = vrcp.f32 %v3725_v19 }
0x15eb   :  { %v3731_v12 = vpop.xlane.xlu1 %3730 }
0x15ec   :  { %5950 = vrcp.f32 %v3731_v12  ;;  %v3729_v9 = vpop.xlane.xlu0 %3728 }
0x15ed   :  { %5952 = vrcp.f32 %v3729_v9 }
0x15ee   :  { %v5947_v46 = vpop.eup %5946 }
0x15ef   :  { %v5949_v55 = vpop.eup %5948  ;;  %v4217_v4 = vpop.xlane.xlu1 %4216  ;;  %v3759_v27 = vmul.f32 %v5947_v46, %v8329_v38 }
0x15f0   :  { %5954 = vrcp.f32 %v4217_v4  ;;  %v4215_v31 = vpop.xlane.xlu0 %4214  ;;  %v3757_v8 = vmul.f32 %v5949_v55, %v8331_v32 }
0x15f1   :  { %5956 = vrcp.f32 %v4215_v31 }
0x15f2   :  { %v5342_v41 = vpack.c.bf16 %v3759_v27, %v3757_v8 }
0x15f3   :  { %v3735_v35 = vpop.xlane.xlu1 %3734 }
0x15f4   :  { %5958 = vrcp.f32 %v3735_v35  ;;  %5343 = vmatprep.subr.bf16.mxu1 %v5342_v41  ;;  %v3733_v62 = vpop.xlane.xlu0 %3732 }
0x15f5   :  { %5960 = vrcp.f32 %v3733_v62  ;;  %5345 = vmatpush3.bf16.xpose.msra.mxu1 %v5342_v41 }
0x15f6   :  { %v5951_v19 = vpop.eup %5950 }
0x15f7   :  { %v5953_v12 = vpop.eup %5952  ;;  %v4221_v9 = vpop.xlane.xlu1 %4220  ;;  %v3763_v43 = vmul.f32 %v5951_v19, %v8339_v61 }
0x15f8   :  { %5962 = vrcp.f32 %v4221_v9  ;;  %v4219_v51 = vpop.xlane.xlu0 %4218  ;;  %v3761_v4 = vmul.f32 %v5953_v12, %v8341_v49 }
0x15f9   :  { %5964 = vrcp.f32 %v4219_v51 }
0x15fa   :  { %v5955_v38 = vpop.eup %5954  ;;  %v5346_v55 = vpack.c.bf16 %v3763_v43, %v3761_v4 }
0x15fb   :  { %v5957_v32 = vpop.eup %5956  ;;  %v3739_v27 = vpop.xlane.xlu1 %3738  ;;  %v4249_v46 = vmul.f32 %v5955_v38, %v8349_v16 }
0x15fc   :  { %5966 = vrcp.f32 %v3739_v27  ;;  %5347 = vmatprep.subr.bf16.mxu1 %v5346_v55  ;;  %v3737_v31 = vpop.xlane.xlu0 %3736  ;;  %v4247_v41 = vmul.f32 %v5957_v32, %v8351_v20 }
0x15fd   :  { %5968 = vrcp.f32 %v3737_v31  ;;  %5349 = vmatpush3.bf16.xpose.msra.mxu1 %v5346_v55 }
0x15fe   :  { %v5959_v8 = vpop.eup %5958  ;;  %v5390_v61 = vpack.c.bf16 %v4249_v46, %v4247_v41 }
0x15ff   :  { %v5961_v35 = vpop.eup %5960  ;;  %v4225_v62 = vpop.xlane.xlu1 %4224  ;;  %v3767_v49 = vmul.f32 %v5959_v8, %v8355_v37 }
0x1600   :  { %5970 = vrcp.f32 %v4225_v62  ;;  %5391 = vmatprep.subr.bf16.mxu0 %v5390_v61  ;;  %v4223_v43 = vpop.xlane.xlu0 %4222  ;;  %v3765_v51 = vmul.f32 %v5961_v35, %v8357_v45 }
0x1601   :  { %5972 = vrcp.f32 %v4223_v43  ;;  %5393 = vmatpush3.bf16.xpose.msra.mxu0 %v5390_v61 }
0x1602   :  { %v5963_v16 = vpop.eup %5962  ;;  %v5350_v19 = vpack.c.bf16 %v3767_v49, %v3765_v51 }
0x1603   :  { %v5965_v12 = vpop.eup %5964  ;;  %v3743_v9 = vpop.xlane.xlu1 %3742  ;;  %v4253_v20 = vmul.f32 %v5963_v16, %v8365_v29 }
0x1604   :  { %5974 = vrcp.f32 %v3743_v9  ;;  %5351 = vmatprep.subr.bf16.mxu1 %v5350_v19  ;;  %v3741_v4 = vpop.xlane.xlu0 %3740  ;;  %v4251_v38 = vmul.f32 %v5965_v12, %v8367_v59 }
0x1605   :  { %5976 = vrcp.f32 %v3741_v4  ;;  %5353 = vmatpush3.bf16.xpose.msra.mxu1 %v5350_v19 }
0x1606   :  { %v5967_v37 = vpop.eup %5966  ;;  %v5394_v55 = vpack.c.bf16 %v4253_v20, %v4251_v38 }
0x1607   :  { %v5969_v32 = vpop.eup %5968  ;;  %v4229_v27 = vpop.xlane.xlu1 %4228  ;;  %v3771_v45 = vmul.f32 %v5967_v37, %v8371_v34 }
0x1608   :  { %5978 = vrcp.f32 %v4229_v27  ;;  %5395 = vmatprep.subr.bf16.mxu0 %v5394_v55  ;;  %v4227_v46 = vpop.xlane.xlu0 %4226  ;;  %v3769_v31 = vmul.f32 %v5969_v32, %v8373_v14 }
0x1609   :  { %5980 = vrcp.f32 %v4227_v46  ;;  %5397 = vmatpush3.bf16.xpose.msra.mxu0 %v5394_v55 }
0x160a   :  { %v5971_v29 = vpop.eup %5970  ;;  %v5354_v41 = vpack.c.bf16 %v3771_v45, %v3769_v31 }
0x160b   :  { %v5973_v8 = vpop.eup %5972  ;;  %v3747_v61 = vpop.xlane.xlu1 %3746  ;;  %v4257_v59 = vmul.f32 %v5971_v29, %v8381_v57 }
0x160c   :  { %5982 = vrcp.f32 %v3747_v61  ;;  %5355 = vmatprep.subr.bf16.mxu1 %v5354_v41  ;;  %v3745_v35 = vpop.xlane.xlu0 %3744  ;;  %v4255_v62 = vmul.f32 %v5973_v8, %v8383_v28 }
0x160d   :  { %5984 = vrcp.f32 %v3745_v35  ;;  %5357 = vmatpush3.bf16.xpose.msra.mxu1 %v5354_v41 }
0x160e   :  { %v5975_v34 = vpop.eup %5974  ;;  %v5398_v49 = vpack.c.bf16 %v4257_v59, %v4255_v62 }
0x160f   :  { %v5977_v43 = vpop.eup %5976  ;;  %v4233_v51 = vpop.xlane.xlu1 %4232  ;;  %v3775_v14 = vmul.f32 %v5975_v34, %v8387_v3 }
0x1610   :  { %5986 = vrcp.f32 %v4233_v51  ;;  %5399 = vmatprep.subr.bf16.mxu0 %v5398_v49  ;;  %v4231_v16 = vpop.xlane.xlu0 %4230  ;;  %v3773_v19 = vmul.f32 %v5977_v43, %v8389_v2 }
0x1611   :  { %5988 = vrcp.f32 %v4231_v16  ;;  %5401 = vmatpush3.bf16.xpose.msra.mxu0 %v5398_v49 }
0x1612   :  { %v5979_v57 = vpop.eup %5978  ;;  %v5358_v12 = vpack.c.bf16 %v3775_v14, %v3773_v19 }
0x1613   :  { %v5981_v9 = vpop.eup %5980  ;;  %v3751_v20 = vpop.xlane.xlu1 %3750  ;;  %v4261_v28 = vmul.f32 %v5979_v57, %v8397_v40 }
0x1614   :  { %5990 = vrcp.f32 %v3751_v20  ;;  %5359 = vmatprep.subr.bf16.mxu1 %v5358_v12  ;;  %v3749_v4 = vpop.xlane.xlu0 %3748  ;;  %v4259_v38 = vmul.f32 %v5981_v9, %v8399_v1 }
0x1615   :  { %5992 = vrcp.f32 %v3749_v4  ;;  %5361 = vmatpush3.bf16.xpose.msra.mxu1 %v5358_v12 }
0x1616   :  { %v5983_v3 = vpop.eup %5982  ;;  %v5402_v37 = vpack.c.bf16 %v4261_v28, %v4259_v38 }
0x1617   :  { %v5985_v55 = vpop.eup %5984  ;;  %v4237_v32 = vpop.xlane.xlu1 %4236  ;;  %v3779_v2 = vmul.f32 %v5983_v3, %v8403_v6 }
0x1618   :  { %5994 = vrcp.f32 %v4237_v32  ;;  %5403 = vmatprep.subr.bf16.mxu0 %v5402_v37  ;;  %v4235_v27 = vpop.xlane.xlu0 %4234  ;;  %v3777_v45 = vmul.f32 %v5985_v55, %v8405_v23 }
0x1619   :  { %5996 = vrcp.f32 %v4235_v27  ;;  %5405 = vmatpush3.bf16.xpose.msra.mxu0 %v5402_v37 }
0x161a   :  { %v5987_v40 = vpop.eup %5986  ;;  %v5362_v46 = vpack.c.bf16 %v3779_v2, %v3777_v45 }
0x161b   :  { %v5989_v31 = vpop.eup %5988  ;;  %v3755_v29 = vpop.xlane.xlu1 %3754  ;;  %v4265_v1 = vmul.f32 %v5987_v40, %v8413_v25 }
0x161c   :  { %5998 = vrcp.f32 %v3755_v29  ;;  %5363 = vmatprep.subr.bf16.mxu1 %v5362_v46  ;;  %v3753_v41 = vpop.xlane.xlu0 %3752  ;;  %v4263_v8 = vmul.f32 %v5989_v31, %v8415_v56 }
0x161d   :  { %6000 = vrcp.f32 %v3753_v41  ;;  %5365 = vmatpush3.bf16.xpose.msra.mxu1 %v5362_v46 }
0x161e   :  { %v5991_v6 = vpop.eup %5990  ;;  %v5406_v61 = vpack.c.bf16 %v4265_v1, %v4263_v8 }
0x161f   :  { %v5993_v59 = vpop.eup %5992  ;;  %v4241_v35 = vpop.xlane.xlu1 %4240  ;;  %v3783_v23 = vmul.f32 %v5991_v6, %v8421_v42 }
0x1620   :  { %6002 = vrcp.f32 %v4241_v35  ;;  %5407 = vmatprep.subr.bf16.mxu0 %v5406_v61  ;;  %v4239_v62 = vpop.xlane.xlu0 %4238  ;;  %v3781_v34 = vmul.f32 %v5993_v59, %v8423_v17 }
0x1621   :  { %6004 = vrcp.f32 %v4239_v62  ;;  %5409 = vmatpush3.bf16.xpose.msra.mxu0 %v5406_v61 }
0x1622   :  { %v5995_v25 = vpop.eup %5994  ;;  %v5366_v49 = vpack.c.bf16 %v3783_v23, %v3781_v34 }
0x1623   :  { %v5997_v43 = vpop.eup %5996  ;;  %v4245_v51 = vpop.xlane.xlu1 %4244  ;;  %v4269_v56 = vmul.f32 %v5995_v25, %v8427_v52 }
0x1624   :  { %6006 = vrcp.f32 %v4245_v51  ;;  %5367 = vmatprep.subr.bf16.mxu1 %v5366_v49  ;;  %v4243_v14 = vpop.xlane.xlu0 %4242  ;;  %v4267_v16 = vmul.f32 %v5997_v43, %v8429_v30 }
0x1625   :  { %6008 = vrcp.f32 %v4243_v14  ;;  %5369 = vmatpush3.bf16.xpose.msra.mxu1 %v5366_v49 }
0x1626   :  { %v5999_v42 = vpop.eup %5998  ;;  %v5410_v19 = vpack.c.bf16 %v4269_v56, %v4267_v16 }
0x1627   :  { %v6001_v57 = vpop.eup %6000  ;;  %v3087_v12 = vpop.permute.xlu1 %3086  ;;  %v3787_v17 = vmul.f32 %v5999_v42, %v8433_v15 }
0x1628   :  { %5411 = vmatprep.subr.bf16.mxu0 %v5410_v19  ;;  %v3785_v9 = vmul.f32 %v6001_v57, %v8435_v54  ;;  %v3360_v45 = vadd.f32 %v8458_v13, %v3087_v12  ;;  %v4383_v57 = vld [vmem:[%s8687_s2 + $0xc0] sm:$0xff] }
0x1629   :  { %5413 = vmatpush3.bf16.xpose.msra.mxu0 %v5410_v19 }
0x162a   :  { %v6003_v20 = vpop.eup %6002  ;;  %v5370_v28 = vpack.c.bf16 %v3787_v17, %v3785_v9  ;;  %v4385_v17 = vld [vmem:[%s8687_s2 + $0xd0] sm:$0xff]  ;;  %v4386_v9 = vld [vmem:[%s8687_s2 + $0xd8] sm:$0xff] }
0x162b   :  { %v6005_v52 = vpop.eup %6004  ;;  %v4273_v4 = vmul.f32 %v6003_v20, %v8439_v50  ;;  %v3092_v38 = vpop.permute.xlu1 %3091  ;;  %v4387_v20 = vld [vmem:[%s8687_s2 + $0xe0] sm:$0xff] }
0x162c   :  { %5371 = vmatprep.subr.bf16.mxu1 %v5370_v28  ;;  %v3082_v30 = vpop.permute.xlu0 %3081  ;;  %v4271_v3 = vmul.f32 %v6005_v52, %v8441_v44  ;;  %v3368_v41 = vadd.f32 %v8470_v48, %v3092_v38  ;;  %v4389_v52 = vld [vmem:[%s8687_s2 + $0xf0] sm:$0xff] }
0x162d   :  { %v3354_v37 = vadd.f32 %v8454_v11, %v3082_v30  ;;  %v3356_v55 = vadd.f32 %v8456_v39, %v3082_v30  ;;  %5373 = vmatpush3.bf16.xpose.msra.mxu1 %v5370_v28  ;;  %v3366_v11 = vadd.f32 %v8465_v33, %v3092_v38  ;;  %v3362_v33 = vadd.f32 %v8460_v10, %v3087_v12  ;;  %v4384_v12 = vld [vmem:[%s8687_s2 + $0xc8] sm:$0xff] }
0x162e   :  { %v6007_v15 = vpop.eup %6006  ;;  %v5414_v32 = vpack.c.bf16 %v4273_v4, %v4271_v3  ;;  %v4388_v28 = vld [vmem:[%s8687_s2 + $0xe8] sm:$0xff]  ;;  %v4390_v4 = vld [vmem:[%s8687_s2 + $0xf8] sm:$0xff] }
0x162f   :  { %v6009_v2 = vpop.eup %6008  ;;  %4930 = vmatprep.mubr.f32.mxu1 %v3354_v37  ;;  %5014 = vmatprep.mubr.f32.mxu0 %v3356_v55  ;;  %v4277_v54 = vmul.f32 %v6007_v15, %v8445_v47  ;;  %v3102_v44 = vpop.permute.xlu1 %3101 }
0x1630   :  { %5415 = vmatprep.subr.bf16.mxu0 %v5414_v32  ;;  %v3097_v27 = vpop.permute.xlu0 %3096  ;;  %v4275_v50 = vmul.f32 %v6009_v2, %v8447_v53  ;;  %v3378_v31 = vadd.f32 %v8482_v24, %v3102_v44  ;;  %v3380_v24 = vadd.f32 %v8487_v60, %v3102_v44  ;;  %v8735_v2 = vld [vmem:[#allocation3_spill] sm:$0xff]  ;;  %v8736_v44 = vld [vmem:[#allocation2_spill] sm:$0xff] }
0x1631   :  { %5417 = vmatpush3.bf16.xpose.msra.mxu0 %v5414_v32  ;;  %v3372_v46 = vadd.f32 %v8475_v0, %v3097_v27  ;;  %v3374_v0 = vadd.f32 %v8477_v58, %v3097_v27 }
0x1632   :  { %v5418_v40 = vpack.c.bf16 %v4277_v54, %v4275_v50 }
0x1633   :  { %v3112_v47 = vpop.permute.xlu1 %3111 }
0x1634   :  { %4931 = vmatmul.mubr.f32.vlgmr.msra.gmra.mrb[76].mxu1 %v3360_v45  ;;  %5419 = vmatprep.subr.bf16.mxu0 %v5418_v40  ;;  %v3107_v39 = vpop.permute.xlu0 %3106  ;;  %v3390_v13 = vadd.f32 %v8502_v18, %v3112_v47  ;;  %v3392_v18 = vadd.f32 %v8507_v36, %v3112_v47 }
0x1635   :  { %4933 = vmatprep.mubr.f32.mxu1 %v3366_v11  ;;  %v3384_v53 = vadd.f32 %v8492_v7, %v3107_v39  ;;  %v3386_v7 = vadd.f32 %v8497_v63, %v3107_v39  ;;  %v8737_v39 = vld [vmem:[#allocation4_spill] sm:$0xff] }
0x1637   :  { %v4402_v38 = vpop.permute.xlu1 %4401 }
0x1638   :  { %4934 = vmatmul.mubr.f32.gmra.mrb[78].mxu1 %v3372_v46  ;;  %v3117_v29 = vpop.permute.xlu0 %3116 }
0x1639   :  { %4936 = vmatprep.mubr.f32.mxu1 %v3378_v31  ;;  %5421 = vmatpush3.bf16.xpose.msra.mxu0 %v5418_v40  ;;  %v3396_v1 = vadd.f32 %v8515_v21, %v3117_v29  ;;  %v3398_v21 = vadd.f32 %v8517_v26, %v3117_v29 }
0x163b   :  { %v4412_v11 = vpop.permute.xlu1 %4411 }
0x163c   :  { %4937 = vmatmul.mubr.f32.gmra.mrb[80].mxu1 %v3384_v53  ;;  %v4407_v32 = vpop.permute.xlu0 %4406 }
0x163d   :  { %4939 = vmatprep.mubr.f32.mxu1 %v3390_v13  ;;  %v8738_v13 = vld [vmem:[#allocation5_spill] sm:$0xff] }
0x1640   :  { %4940 = vmatmul.mubr.f32.gmra.mrb[82].mxu1 %v3396_v1  ;;  %5015 = vmatmul.mubr.f32.vlgmr.msra.gmra.mrb[72].mxu0 %v3362_v33  ;;  %v4417_v33 = vpop.permute.xlu0 %4416  ;;  %v8739_v1 = vld [vmem:[#allocation7_spill] sm:$0xff] }
0x1641   :  { %5017 = vmatprep.mubr.f32.mxu0 %v3368_v41  ;;  %4527 = vmatprep.mubr.f32.mxu1 %v8711_v22 }
0x1644   :  { %5018 = vmatmul.mubr.f32.gmra.mrb[74].mxu0 %v3374_v0 }
0x1645   :  { %5020 = vmatprep.mubr.f32.mxu0 %v3380_v24 }
0x1648   :  { %5021 = vmatmul.mubr.f32.gmra.mrb[76].mxu0 %v3386_v7 }
0x1649   :  { %5023 = vmatprep.mubr.f32.mxu0 %v3392_v18 }
0x164c   :  { %5024 = vmatmul.mubr.f32.gmra.mrb[78].mxu0 %v3398_v21  ;;  %v8740_v21 = vld [vmem:[#allocation6_spill] sm:$0xff] }
0x1707   :  { %v4932_v10 = vpop.f32.mrb[76].mxu1 }
0x1708   :  { %v3854_v48 = vpop.f32.mrb[77].mxu1 }
0x1709   :  { %v5424_v8 = vpack.c.bf16 %v4932_v10, %v3854_v48  ;;  %v4422_v48 = vpop.permute.xlu1 %4421 }
0x170b   :  { %v4935_v6 = vpop.f32.mrb[78].mxu1 }
0x170c   :  { %v3864_v61 = vpop.f32.mrb[79].mxu1 }
0x170d   :  { %v5428_v59 = vpack.c.bf16 %v4935_v6, %v3864_v61 }
0x170f   :  { %v4938_v58 = vpop.f32.mrb[80].mxu1 }
0x1710   :  { %v3874_v35 = vpop.f32.mrb[81].mxu1 }
0x1711   :  { %v5432_v60 = vpack.c.bf16 %v4938_v58, %v3874_v35 }
0x1713   :  { %v4941_v23 = vpop.f32.mrb[82].mxu1  ;;  %v5016_v62 = vpop.f32.mrb[72].mxu0 }
0x1714   :  { %v3884_v34 = vpop.f32.mrb[83].mxu1  ;;  %v4344_v63 = vpop.f32.mrb[73].mxu0 }
0x1715   :  { %v5436_v25 = vpack.c.bf16 %v4941_v23, %v3884_v34  ;;  %v5422_v36 = vpack.c.bf16 %v5016_v62, %v4344_v63  ;;  %v4427_v62 = vpop.permute.xlu0 %4426  ;;  %v8743_v34 = vld [vmem:[#allocation11_spill] sm:$0xff] }
0x1717   :  { %v5019_v49 = vpop.f32.mrb[74].mxu0  ;;  %5423 = vmatprep.subr.bf16.mxu1 %v5422_v36 }
0x1718   :  { %v4354_v43 = vpop.f32.mrb[75].mxu0  ;;  %5425 = vmatpush1.bf16.msra.mxu1 %v5424_v8  ;;  %v8741_v8 = vld [vmem:[#allocation8_spill] sm:$0xff] }
0x1719   :  { %v5426_v26 = vpack.c.bf16 %v5019_v49, %v4354_v43 }
0x171b   :  { %v5022_v51 = vpop.f32.mrb[76].mxu0  ;;  %5427 = vmatprep.subr.bf16.mxu1 %v5426_v26  ;;  %v8744_v26 = vld [vmem:[#allocation10_spill] sm:$0xff] }
0x171c   :  { %v4364_v56 = vpop.f32.mrb[77].mxu0  ;;  %5429 = vmatpush1.bf16.msra.mxu1 %v5428_v59 }
0x171d   :  { %v5430_v14 = vpack.c.bf16 %v5022_v51, %v4364_v56  ;;  %v4432_v56 = vpop.permute.xlu1 %4431 }
0x171f   :  { %v5025_v16 = vpop.f32.mrb[78].mxu0  ;;  %5431 = vmatprep.subr.bf16.mxu1 %v5430_v14  ;;  %v8745_v14 = vld [vmem:[#allocation12_spill] sm:$0xff] }
0x1720   :  { %v4374_v42 = vpop.f32.mrb[79].mxu0  ;;  %5433 = vmatpush1.bf16.msra.mxu1 %v5432_v60  ;;  %v8742_v60 = vld [vmem:[#allocation9_spill] sm:$0xff] }
0x1721   :  { %v5434_v19 = vpack.c.bf16 %v5025_v16, %v4374_v42 }
0x1723   :  { %5435 = vmatprep.subr.bf16.mxu1 %v5434_v19 }
0x1724   :  { %5437 = vmatpush1.bf16.msra.mxu1 %v5436_v25 }
0x1727   :  { %4754 = vmatmul.mubr.msk.f32.vlgmr.msra.gmra.mrb[84].mxu1 %vm2423_vm15, %v4383_v57 }
0x1728   :  { %4533 = vmatprep.mubr.f32.mxu1 %v8711_v22 }
0x172b   :  { %4755 = vmatmul.mubr.msk.f32.gmra.mrb[86].mxu1 %vm2423_vm15, %v4384_v12 }
0x172c   :  { %4539 = vmatprep.mubr.f32.mxu1 %v8711_v22 }
0x172f   :  { %4756 = vmatmul.mubr.msk.f32.gmra.mrb[88].mxu1 %vm2423_vm15, %v4385_v17  ;;  %v8746_v17 = vld [vmem:[#allocation13_spill] sm:$0xff] }
0x1730   :  { %4545 = vmatprep.mubr.f32.mxu1 %v8711_v22 }
0x1733   :  { %4757 = vmatmul.mubr.msk.f32.gmra.mrb[90].mxu1 %vm2423_vm15, %v4386_v9 }
0x1734   :  { %4551 = vmatprep.mubr.f32.mxu1 %v8711_v22 }
0x1737   :  { %4758 = vmatmul.mubr.msk.f32.gmra.mrb[92].mxu1 %vm2423_vm15, %v4387_v20  ;;  %v4437_v20 = vpop.permute.xlu0 %4436 }
0x1738   :  { %4557 = vmatprep.mubr.f32.mxu1 %v8711_v22 }
0x173b   :  { %4759 = vmatmul.mubr.msk.f32.gmra.mrb[94].mxu1 %vm2423_vm15, %v4388_v28  ;;  %v8747_v28 = vld [vmem:[#allocation15_spill] sm:$0xff] }
0x173c   :  { %4563 = vmatprep.mubr.f32.mxu1 %v8711_v22 }
0x173f   :  { %4760 = vmatmul.mubr.msk.f32.gmra.mrb[96].mxu1 %vm2423_vm15, %v4389_v52 }
0x1740   :  { %4569 = vmatprep.mubr.f32.mxu1 %v8711_v22 }
0x1743   :  { %4761 = vmatmul.mubr.msk.f32.gmra.mrb[98].mxu1 %vm2423_vm15, %v4390_v4 }
0x17fa   :  { %v4529_v30 = vpop.f32.mrb[84].mxu1 }
0x17fb   :  { %v4530_v3 = vadd.f32 %v4529_v30, %v4402_v38  ;;  %v4531_v37 = vpop.f32.mrb[85].mxu1 }
0x17fc   :  { %v4532_v55 = vadd.f32 %v4531_v37, %v4402_v38  ;;  %v8748_v37 = vld [vmem:[#allocation14_spill] sm:$0xff] }
0x17fd   :  { %v4576_v15 = vadd.f32 %v4530_v3, %v7893_v5 }
0x17fe   :  { %v4577_v54 = vadd.f32 %v4532_v55, %v8735_v2  ;;  %v4535_v27 = vpop.f32.mrb[86].mxu1 }
0x17ff   :  { %4592 = vst [vmem:[%s8688_s5] sm:$0xff] %v4576_v15  ;;  %v4536_v22 = vadd.f32 %v4535_v27, %v4407_v32  ;;  %v4537_v50 = vpop.f32.mrb[87].mxu1  ;;  %v8749_v15 = vld [vmem:[#allocation16_spill] sm:$0xff] }
0x1800   :  { %4593 = vst [vmem:[%s8688_s5 + $0x8] sm:$0xff] %v4577_v54  ;;  %v4538_v45 = vadd.f32 %v4537_v50, %v4407_v32 }
0x1801   :  { %v4578_v40 = vadd.f32 %v4536_v22, %v8736_v44 }
0x1802   :  { %v4579_v5 = vadd.f32 %v4538_v45, %v8737_v39  ;;  %v4541_v46 = vpop.f32.mrb[88].mxu1 }
0x1803   :  { %4594 = vst [vmem:[%s8688_s5 + $0x10] sm:$0xff] %v4578_v40  ;;  %v4542_v31 = vadd.f32 %v4541_v46, %v4412_v11  ;;  %v4543_v47 = vpop.f32.mrb[89].mxu1 }
0x1804   :  { %4595 = vst [vmem:[%s8688_s5 + $0x18] sm:$0xff] %v4579_v5  ;;  %v4544_v53 = vadd.f32 %v4543_v47, %v4412_v11 }
0x1805   :  { %v4580_v29 = vadd.f32 %v4542_v31, %v8738_v13 }
0x1806   :  { %v4581_v41 = vadd.f32 %v4544_v53, %v8739_v1  ;;  %v4547_v0 = vpop.f32.mrb[90].mxu1 }
0x1807   :  { %4596 = vst [vmem:[%s8688_s5 + $0x20] sm:$0xff] %v4580_v29  ;;  %v4548_v24 = vadd.f32 %v4547_v0, %v4417_v33  ;;  %v4549_v7 = vpop.f32.mrb[91].mxu1 }
0x1808   :  { %4597 = vst [vmem:[%s8688_s5 + $0x28] sm:$0xff] %v4581_v41  ;;  %v4550_v18 = vadd.f32 %v4549_v7, %v4417_v33 }
0x1809   :  { %v4582_v10 = vadd.f32 %v4548_v24, %v8740_v21 }
0x180a   :  { %v4583_v6 = vadd.f32 %v4550_v18, %v8741_v8  ;;  %v4553_v61 = vpop.f32.mrb[92].mxu1 }
0x180b   :  { %4598 = vst [vmem:[%s8688_s5 + $0x30] sm:$0xff] %v4582_v10  ;;  %v4554_v59 = vadd.f32 %v4553_v61, %v4422_v48  ;;  %v4555_v58 = vpop.f32.mrb[93].mxu1 }
0x180c   :  { %4599 = vst [vmem:[%s8688_s5 + $0x38] sm:$0xff] %v4583_v6  ;;  %v4556_v35 = vadd.f32 %v4555_v58, %v4422_v48 }
0x180d   :  { %v4584_v23 = vadd.f32 %v4554_v59, %v8742_v60 }
0x180e   :  { %v4585_v63 = vadd.f32 %v4556_v35, %v8743_v34  ;;  %v4559_v25 = vpop.f32.mrb[94].mxu1 }
0x180f   :  { %4600 = vst [vmem:[%s8688_s5 + $0x40] sm:$0xff] %v4584_v23  ;;  %v4560_v36 = vadd.f32 %v4559_v25, %v4427_v62  ;;  %v4561_v49 = vpop.f32.mrb[95].mxu1 }
0x1810   :  { %4601 = vst [vmem:[%s8688_s5 + $0x48] sm:$0xff] %v4585_v63  ;;  %v4562_v43 = vadd.f32 %v4561_v49, %v4427_v62 }
0x1811   :  { %v4586_v51 = vadd.f32 %v4560_v36, %v8744_v26 }
0x1812   :  { %v4587_v16 = vadd.f32 %v4562_v43, %v8745_v14  ;;  %v4565_v42 = vpop.f32.mrb[96].mxu1 }
0x1813   :  { %4602 = vst [vmem:[%s8688_s5 + $0x50] sm:$0xff] %v4586_v51  ;;  %v4566_v19 = vadd.f32 %v4565_v42, %v4432_v56  ;;  %v4567_v57 = vpop.f32.mrb[97].mxu1 }
0x1814   :  { %4603 = vst [vmem:[%s8688_s5 + $0x58] sm:$0xff] %v4587_v16  ;;  %v4568_v12 = vadd.f32 %v4567_v57, %v4432_v56 }
0x1815   :  { %v4588_v9 = vadd.f32 %v4566_v19, %v8746_v17 }
0x1816   :  { %v4589_v52 = vadd.f32 %v4568_v12, %v8747_v28  ;;  %v4571_v4 = vpop.f32.mrb[98].mxu1 }
0x1817   :  { %4604 = vst [vmem:[%s8688_s5 + $0x60] sm:$0xff] %v4588_v9  ;;  %v4572_v38 = vadd.f32 %v4571_v4, %v4437_v20  ;;  %v4573_v30 = vpop.f32.mrb[99].mxu1 }
0x1818   :  { %4605 = vst [vmem:[%s8688_s5 + $0x68] sm:$0xff] %v4589_v52  ;;  %v4574_v3 = vadd.f32 %v4573_v30, %v4437_v20 }
0x1819   :  { %v4590_v55 = vadd.f32 %v4572_v38, %v8748_v37 }
0x181a   :  { %v4591_v32 = vadd.f32 %v4574_v3, %v8749_v15 }
0x181b   :  { %4606 = vst [vmem:[%s8688_s5 + $0x70] sm:$0xff] %v4590_v55 }
0x181c   :  { %4607 = vst [vmem:[%s8688_s5 + $0x78] sm:$0xff] %v4591_v32 }

</bundles_post_ra>
